<compile_context>
chip_gen: v7x
topology: tpu7x:2x2x1
jax: 0.10.0
libtpu: 0.0.40
codegen_flags: <defaults>
</compile_context>

<pallas_src>
import functools

import jax
import jax.numpy as jnp
from jax.experimental import pallas as pl
from jax.experimental.pallas import tpu as pltpu


_LANES = 128
_TILE_BYTES_TARGET = 4 * 1024 * 1024     # per input tile (x2 double-buffered)
_VMEM_LIMIT_BYTES = 32 * 1024 * 1024     # valid on v5e/v6e/v7x
_SEG_BYTES_CAP = 4 * 1024 * 1024         # resident reduction-matrix budget


def _mean_tanh_lane_dense_kernel(x_ref, seg_ref, o_ref):
    """x_ref: (tq, 128*W) tile; row q packs 128 original rows of length W.
    seg_ref: (128*W, 128) resident matrix, seg[m, l] = 1/W iff m // W == l.
    o_ref:  (tq, 128) lane-dense tanh(mean) tile."""
    x = x_ref[...].astype(jnp.float32)
    means = jnp.dot(x, seg_ref[...],
                    preferred_element_type=jnp.float32,
                    precision=jax.lax.Precision.HIGHEST)   # (tq, 128)
    o_ref[...] = jnp.tanh(means).astype(o_ref.dtype)


def _mean_tanh_reduce_kernel(x_ref, o_ref, acc_ref, *, w, tkw, mask_ragged):
    """Fallback: grid (row tiles, W chunks). x_ref (tr, tkw); o_ref (tr, 1)."""
    k = pl.program_id(1)

    @pl.when(k == 0)
    def _init():
        acc_ref[...] = jnp.zeros_like(acc_ref)

    x = x_ref[...].astype(jnp.float32)
    if mask_ragged:  # static: only emitted when W % tkw != 0
        col = k * tkw + jax.lax.broadcasted_iota(jnp.int32, x.shape, 1)
        x = jnp.where(col < w, x, 0.0)
    acc_ref[...] += jnp.sum(x, axis=-1, keepdims=True)

    @pl.when(k == pl.num_programs(1) - 1)
    def _finalize():
        o_ref[...] = jnp.tanh(acc_ref[...] * (1.0 / w)).astype(o_ref.dtype)


def _pick_tile_rows(total_rows: int, row_bytes: int) -> int:
    """Row-tile size: multiple of 8 (or the full extent), ~_TILE_BYTES_TARGET,
    and small enough that the grid has >= 2 steps when the shape allows it."""
    if total_rows <= 8:
        return total_rows                            # full extent, always legal
    cap = _TILE_BYTES_TARGET // max(row_bytes, 1)
    cap = min(cap, -(-total_rows // 2))              # >= 2 grid steps (megacore)
    cap = max(cap, 8)
    return (cap // 8) * 8


def default_backend_forward(x):
    """y = tanh(mean(x, -1)) -- matches the PyTorch _DefaultBackend.forward."""
    orig_shape = x.shape
    w = int(orig_shape[-1])
    lead = orig_shape[:-1]
    r = 1
    for d in lead:
        r *= int(d)

    itemsize = jnp.dtype(x.dtype).itemsize
    seg_bytes = _LANES * w * _LANES * 4

    if w >= 1 and r % _LANES == 0 and seg_bytes <= _SEG_BYTES_CAP:
        # -------- lane-dense main path ---------------------------------
        q_rows = r // _LANES
        kw = _LANES * w
        # Free for a contiguous (default-layout) x; a strided upstream layout
        # would make XLA materialize a copy here (correct, just more HBM).
        x3 = x.reshape(q_rows, kw)

        # Block reduction matrix, hoisted out of the kernel (VMEM-resident).
        m_idx = jax.lax.broadcasted_iota(jnp.int32, (kw, _LANES), 0)
        l_idx = jax.lax.broadcasted_iota(jnp.int32, (kw, _LANES), 1)
        seg = jnp.where(m_idx // w == l_idx,
                        jnp.float32(1.0 / w), jnp.float32(0.0))

        tq = _pick_tile_rows(q_rows, kw * itemsize)
        grid = (pl.cdiv(q_rows, tq),)
        cost = pl.CostEstimate(
            flops=2 * q_rows * kw * _LANES,
            transcendentals=r,
            bytes_accessed=r * w * itemsize + r * itemsize + seg_bytes,
        )
        out2d = pl.pallas_call(
            _mean_tanh_lane_dense_kernel,
            out_shape=jax.ShapeDtypeStruct((q_rows, _LANES), x.dtype),
            grid=grid,
            in_specs=[
                pl.BlockSpec((tq, kw), lambda i: (i, 0)),
                pl.BlockSpec((kw, _LANES), lambda i: (0, 0)),   # resident
            ],
            out_specs=pl.BlockSpec((tq, _LANES), lambda i: (i, 0)),
            compiler_params=pltpu.CompilerParams(
                dimension_semantics=("parallel",),
                vmem_limit_bytes=_VMEM_LIMIT_BYTES,
            ),
            cost_estimate=cost,
        )(x3, seg)
        return out2d.reshape(lead)

    # -------- generic fallback: 2-D (rows x W-chunk) reduction ----------
    x2d = x.reshape(r, w)
    tkw = w if w <= 512 else 512
    mask_ragged = (w % tkw) != 0
    tr = _pick_tile_rows(r, max(tkw, _LANES) * itemsize)
    grid = (pl.cdiv(r, tr), pl.cdiv(w, tkw))
    cost = pl.CostEstimate(
        flops=2 * r * w,
        transcendentals=r,
        bytes_accessed=r * w * itemsize + r * itemsize,
    )
    out2d = pl.pallas_call(
        functools.partial(_mean_tanh_reduce_kernel,
                          w=w, tkw=tkw, mask_ragged=mask_ragged),
        out_shape=jax.ShapeDtypeStruct((r, 1), x.dtype),
        grid=grid,
        in_specs=[pl.BlockSpec((tr, tkw), lambda i, k: (i, k))],
        out_specs=pl.BlockSpec((tr, 1), lambda i, k: (i, 0)),
        scratch_shapes=[pltpu.VMEM((tr, 1), jnp.float32)],
        compiler_params=pltpu.CompilerParams(
            dimension_semantics=("parallel", "arbitrary"),
            vmem_limit_bytes=_VMEM_LIMIT_BYTES,
        ),
        cost_estimate=cost,
    )(x2d)
    return out2d.reshape(lead)


if __name__ == "__main__":
    key = jax.random.PRNGKey(0)

    # Main (lane-dense) path: small NCHW input, R = 2*4*16 = 128, W = 16.
    x = jax.random.normal(key, (2, 4, 16, 16), dtype=jnp.float32)
    y = default_backend_forward(x)
    jax.block_until_ready(y)
    y_ref = jnp.tanh(jnp.mean(x, axis=-1))
    assert y.shape == y_ref.shape == (2, 4, 16)
    assert jnp.allclose(y, y_ref, atol=1e-5, rtol=1e-5)

    # Fallback path: odd shape (R % 128 != 0), exercises the accumulator grid.
    x2 = jax.random.normal(jax.random.PRNGKey(0), (3, 5, 24), dtype=jnp.float32)
    y2 = default_backend_forward(x2)
    jax.block_until_ready(y2)
    y2_ref = jnp.tanh(jnp.mean(x2, axis=-1))
    assert y2.shape == y2_ref.shape == (3, 5)
    assert jnp.allclose(y2, y2_ref, atol=1e-5, rtol=1e-5)

    print("KERNEL_OK")
</pallas_src>

<mosaic_0001>
module attributes {stable_mosaic.version = 11 : i64} {
  func.func @_mean_tanh_lane_dense_kernel(%arg0: i32, %arg1: memref<1x2048xf32, #tpu.memory_space<vmem>>, %arg2: memref<2048x128xf32, #tpu.memory_space<vmem>>, %arg3: memref<1x128xf32, #tpu.memory_space<vmem>>) attributes {dimension_semantics = [#tpu.dimension_semantics<parallel>], iteration_bounds = array<i64: 1>, scalar_prefetch = 0 : i64, scratch_operands = 0 : i64, tpu.core_type = #tpu.core_type<tc>, window_params = [{transform_indices = @transform_0, window_bounds = array<i64: 1, 2048>}, {pipeline_mode = #tpu.pipeline_mode<synchronous>, transform_indices = @transform_1, window_bounds = array<i64: 2048, 128>}, {transform_indices = @transform_2, window_bounds = array<i64: 1, 128>}]} {
    %c0 = arith.constant 0 : index
    %c0_0 = arith.constant 0 : index
    %0 = vector.load %arg1[%c0, %c0_0] : memref<1x2048xf32, #tpu.memory_space<vmem>>, vector<1x2048xf32>
    %c0_1 = arith.constant 0 : index
    %c0_2 = arith.constant 0 : index
    %1 = vector.load %arg2[%c0_1, %c0_2] : memref<2048x128xf32, #tpu.memory_space<vmem>>, vector<2048x128xf32>
    %cst = arith.constant dense<0.000000e+00> : vector<1x128xf32>
    %2 = tpu.matmul %0, %1, %cst {dimension_numbers = #tpu.dot_dimension_numbers<[1], [0], [0], [1], [0, 0, 1, 1], [], []>, precision = #tpu.contract_precision<fp32>} : vector<1x2048xf32>, vector<2048x128xf32>, vector<1x128xf32> -> vector<1x128xf32>
    %3 = math.tanh %2 : vector<1x128xf32>
    %c0_3 = arith.constant 0 : index
    %c0_4 = arith.constant 0 : index
    %4 = vector.load %arg3[%c0_3, %c0_4] : memref<1x128xf32, #tpu.memory_space<vmem>>, vector<1x128xf32>
    tpu.vector_store %arg3[%c0_3, %c0_4], %3 {strides = array<i32>} : memref<1x128xf32, #tpu.memory_space<vmem>>, vector<1x128xf32>,
    return
  }
  func.func @transform_0(%arg0: i32) -> (i32, i32) {
    %c0_i32 = arith.constant 0 : i32
    %c0_i32_0 = arith.constant 0 : i32
    return %arg0, %c0_i32 : i32, i32
  }
  func.func @transform_1(%arg0: i32) -> (i32, i32) {
    %c0_i32 = arith.constant 0 : i32
    %c0_i32_0 = arith.constant 0 : i32
    %c0_i32_1 = arith.constant 0 : i32
    return %c0_i32, %c0_i32_0 : i32, i32
  }
  func.func @transform_2(%arg0: i32) -> (i32, i32) {
    %c0_i32 = arith.constant 0 : i32
    %c0_i32_0 = arith.constant 0 : i32
    return %arg0, %c0_i32 : i32, i32
  }
}

</mosaic_0001>

<bundles_post_ra>
// kernel: tpu_custom_call.1
= control target key start
LH: loop header
LB: loop body
LE: loop exit
PB: predicated region body
PF: predicated region fallthrough
CT: control target
= control target key end

     0   :  { %7 = vsyncpa [#allocation3], 0  ;;  %s14683_s0 = inlined_call_operand.hbm [shape: f32[1,2048], index: 0, kind: input, shape index: {}]   ;;  %s14684_s1 = inlined_call_operand.hbm [shape: f32[2048,128], index: 1, kind: input, shape index: {}]   ;;  %s14685_s2 = inlined_call_operand.hbm [shape: f32[1,128], index: 2, kind: output, shape index: {}]  }
   0x1   :  { %8 = vsyncpa [#allocation6], 0 }
   0x2   :  { %9 = vsyncpa [#allocation4], 0  ;;  %s10591_s9 = smov [#allocation2]   ;;  %s10592_s11 = smov [#allocation5]  }
   0x3   :  { %s16_s10 = sshll.u32 %s10591_s9, 4  ;;  %s25_s12 = sshll.u32 %s10592_s11, 4  ;;  %s17_s10 = int_to_ptr.vmem [resolvable:$true] %s16_s10  ;;  %s10611_s12 = int_to_ptr.vmem [resolvable:$true] %s25_s12 }
   0x4   :  { %s10519_s15 = scalar_lea.hbm %s14683_s0, 256 }
   0x5   :  { %p10520_p0 = scmp.ne.s32.totalorder %s14683_s0, %s10519_s15  ;;  %p10523_p1 = scmp.lt.u32.totalorder %s10519_s15, %s14683_s0 }
   0x7   :  { %p10525_p2 = pnand %p10523_p1, %p10520_p0 }
   0x9   :  { %10528 = shalt.err (!%p10525_p2)
}
   0xa   :  { %s10529_s20 = scalar_lea.vmem %s17_s10, 256  ;;  %p10534_p4 = scmp.lt.s32.totalorder %s17_s10, %s17_s10 }
   0xb   :  { %p10530_p3 = scmp.ne.s32.totalorder %s17_s10, %s10529_s20  ;;  %p10535_p5 = scmp.lt.s32.totalorder %s10529_s20, %s10529_s20 }
   0xd   :  { %p10536_p6 = por %p10535_p5, %p10534_p4 }
   0xf   :  { %p10537_p7 = pnand %p10536_p6, %p10530_p3 }
  0x11   :  { %10540 = shalt.err (!%p10537_p7)
}
  0x12   :  { %19 = dma.hbm_to_vmem [thread:$0]  %s14683_s0, 256, %s17_s10, [#allocation3]  }
  0x13   :  { %s10541_s25 = scalar_lea.hbm %s14684_s1, 32768 }
  0x14   :  { %p10542_p8 = scmp.ne.s32.totalorder %s14684_s1, %s10541_s25  ;;  %p10545_p9 = scmp.lt.u32.totalorder %s10541_s25, %s14684_s1 }
  0x16   :  { %p10547_p10 = pnand %p10545_p9, %p10542_p8 }
  0x18   :  { %10550 = shalt.err (!%p10547_p10)
}
  0x19   :  { %s10551_s30 = scalar_lea.vmem %s10611_s12, 32768  ;;  %p10556_p12 = scmp.lt.s32.totalorder %s10611_s12, %s10611_s12 }
  0x1a   :  { %p10552_p11 = scmp.ne.s32.totalorder %s10611_s12, %s10551_s30  ;;  %p10557_p13 = scmp.lt.s32.totalorder %s10551_s30, %s10551_s30 }
  0x1c   :  { %p10558_p0 = por %p10557_p13, %p10556_p12 }
  0x1e   :  { %p10559_p1 = pnand %p10558_p0, %p10552_p11 }
  0x20   :  { %10562 = shalt.err (!%p10559_p1)
}
  0x21   :  { %s10593_s0 = smov 128   ;;  %s10594_s3 = smov 8  }
  0x22   :  { %31 = dma.hbm_to_vmem [thread:$0]  %s14684_s1, 32768, %s10611_s12, [#allocation6], %s10593_s0, %s10593_s0, %s10594_s3  }
  0x23   :  { %10585 = dma.done.wait [#allocation3], 256  }
  0x24   :  { %10586 = vsyncadd [#allocation3], 4294967040 }
  0x25   :  { %10587 = dma.done.wait [#allocation6], 32768  }
  0x26   :  { %10588 = vsyncadd [#allocation6], 4294934528  ;;  %v298_v0 = vlaneseq  ;;  %v56_v2 = vld [vmem:[#allocation5 + $0x80] sm:$0xff]  ;;  %v57_v3 = vld [vmem:[#allocation5 + $0x88] sm:$0xff]  ;;  %s10595_s1 = smov [#allocation7]  }
  0x27   :  { %v40_v4 = vld [vmem:[#allocation5] sm:$0xff]  ;;  %v427_v5 = vand.u32 4294901760, %v56_v2  ;;  %v430_v6 = vand.u32 4294901760, %v57_v3  ;;  %v41_v7 = vld [vmem:[#allocation5 + $0x8] sm:$0xff]  ;;  %v58_v9 = vld [vmem:[#allocation5 + $0x90] sm:$0xff]  ;;  %s7282_s6 = sshll.u32 %s10595_s1, 4  ;;  %s7283_s6 = int_to_ptr.vmem [resolvable:$true] %s7282_s6 }
  0x28   :  { %v10642_v1 = vshrl.u32 %v298_v0, 7  ;;  %v379_v8 = vand.u32 4294901760, %v40_v4  ;;  %v59_v10 = vld [vmem:[#allocation5 + $0x98] sm:$0xff]  ;;  %v382_v11 = vand.u32 4294901760, %v41_v7  ;;  %v433_v12 = vand.u32 4294901760, %v58_v9  ;;  %v42_v14 = vld [vmem:[#allocation5 + $0x10] sm:$0xff]  ;;  %p10568_p3 = scmp.lt.s32.totalorder %s7283_s6, %s7283_s6 }
  0x29   :  { %v436_v13 = vand.u32 4294901760, %v59_v10  ;;  %v43_v15 = vld [vmem:[#allocation5 + $0x18] sm:$0xff]  ;;  %v10645_v17 = vpack.c.bf16 %v430_v6, %v427_v5  ;;  %v385_v19 = vand.u32 4294901760, %v42_v14  ;;  %v60_v21 = vld [vmem:[#allocation5 + $0xa0] sm:$0xff]  ;;  %v61_v22 = vld [vmem:[#allocation5 + $0xa8] sm:$0xff]  ;;  %v10666_v35 = vsub.f32 %v56_v2, %v427_v5  ;;  %s10563_s7 = scalar_lea.vmem %s7283_s6, 16 }
  0x2a   :  { %15118 = vst [vmem:[#allocation11_spill] sm:$0xff] %v10642_v1  ;;  %v10647_v18 = vsub.f32 %v40_v4, %v379_v8  ;;  %v388_v20 = vand.u32 4294901760, %v43_v15  ;;  %v10649_v23 = vpack.c.bf16 %v382_v11, %v379_v8  ;;  %v10651_v24 = vsub.f32 %v41_v7, %v382_v11  ;;  %v44_v26 = vld [vmem:[#allocation5 + $0x20] sm:$0xff]  ;;  %v45_v27 = vld [vmem:[#allocation5 + $0x28] sm:$0xff]  ;;  %v62_v41 = vld [vmem:[#allocation5 + $0xb0] sm:$0xff]  ;;  %p10564_p2 = scmp.ne.s32.totalorder %s7283_s6, %s10563_s7  ;;  %s10567_s8 = scalar_lea.vmem %s7283_s6, 32 }
  0x2b   :  { %v10653_v25 = vpack.c.bf16 %v436_v13, %v433_v12  ;;  %8973 = vmatprep.subr.bf16.mxu0 %v10645_v17  ;;  %v10657_v29 = vsub.f32 %v58_v9, %v433_v12  ;;  %v10659_v30 = vsub.f32 %v59_v10, %v436_v13  ;;  %v10663_v32 = vsub.f32 %v42_v14, %v385_v19  ;;  %v63_v46 = vld [vmem:[#allocation5 + $0xb8] sm:$0xff]  ;;  %v46_v59 = vld [vmem:[#allocation5 + $0x30] sm:$0xff]  ;;  %v64_v10 = vld [vmem:[#allocation5 + $0xc0] sm:$0xff]  ;;  %p10569_p4 = scmp.lt.s32.totalorder %s10567_s8, %s10563_s7 }
  0x2c   :  { %v10661_v31 = vpack.c.bf16 %v388_v20, %v385_v19  ;;  %8975 = vmatpush3.bf16.msra.mxu0 %v10649_v23  ;;  %v439_v33 = vand.u32 4294901760, %v60_v21  ;;  %v442_v34 = vand.u32 4294901760, %v61_v22  ;;  %v10668_v36 = vsub.f32 %v57_v3, %v430_v6  ;;  %v47_v60 = vld [vmem:[#allocation5 + $0x38] sm:$0xff]  ;;  %v65_v11 = vld [vmem:[#allocation5 + $0xc8] sm:$0xff]  ;;  %v48_v19 = vld [vmem:[#allocation5 + $0x40] sm:$0xff] }
  0x2d   :  { %8977 = vmatprep.subr.bf16.mxu0 %v10653_v25  ;;  %v391_v37 = vand.u32 4294901760, %v44_v26  ;;  %v394_v38 = vand.u32 4294901760, %v45_v27  ;;  %v14699_v39 = vand.u32 4294901760, %v10647_v18  ;;  %v14698_v40 = vand.u32 4294901760, %v10651_v24  ;;  %p10570_p5 = por %p10569_p4, %p10568_p3 }
  0x2e   :  { %v10673_v42 = vsub.f32 %v43_v15, %v388_v20  ;;  %v10675_v43 = vpack.c.bf16 %v442_v34, %v439_v33  ;;  %v10677_v44 = vsub.f32 %v60_v21, %v439_v33  ;;  %v14703_v45 = vand.u32 4294901760, %v10666_v35 }
  0x2f   :  { %v10680_v47 = vsub.f32 %v61_v22, %v442_v34  ;;  %v14701_v48 = vand.u32 4294901760, %v10668_v36  ;;  %v10683_v49 = vpack.c.bf16 %v394_v38, %v391_v37  ;;  %v10685_v50 = vsub.f32 %v44_v26, %v391_v37  ;;  %p10571_p6 = pnand %p10570_p5, %p10564_p2 }
  0x30   :  { %8979 = vmatpush3.bf16.msra.mxu0 %v10661_v31  ;;  %v606_v51 = vsub.f32 %v10666_v35, %v14703_v45  ;;  %v494_v52 = vsub.f32 %v10647_v18, %v14699_v39  ;;  %v501_v53 = vsub.f32 %v10651_v24, %v14698_v40  ;;  %v445_v54 = vand.u32 4294901760, %v62_v41  ;;  %v70_v40 = vld [vmem:[#allocation5 + $0xf0] sm:$0xff]  ;;  %v71_v39 = vld [vmem:[#allocation5 + $0xf8] sm:$0xff] }
  0x31   :  { %8981 = vmatprep.subr.bf16.mxu0 %v10675_v43  ;;  %v613_v55 = vsub.f32 %v10668_v36, %v14701_v48  ;;  %v448_v56 = vand.u32 4294901760, %v63_v46  ;;  %v14696_v57 = vand.u32 4294901760, %v10657_v29  ;;  %v14694_v58 = vand.u32 4294901760, %v10659_v30 }
  0x32   :  { %v607_v61 = vand.u32 4294901760, %v606_v51  ;;  %v10703_v62 = vsub.f32 %v45_v27, %v394_v38  ;;  %v495_v63 = vand.u32 4294901760, %v494_v52  ;;  %v502_v0 = vand.u32 4294901760, %v501_v53  ;;  %v49_v38 = vld [vmem:[#allocation5 + $0x48] sm:$0xff] }
  0x33   :  { %v614_v2 = vand.u32 4294901760, %v613_v55  ;;  %v10705_v3 = vpack.c.bf16 %v448_v56, %v445_v54  ;;  %v10707_v4 = vsub.f32 %v62_v41, %v445_v54  ;;  %v620_v5 = vsub.f32 %v10657_v29, %v14696_v57 }
  0x34   :  { %8983 = vmatpush3.bf16.msra.mxu0 %v10683_v49  ;;  %v9006_v6 = vpack.c.bf16 %v502_v0, %v495_v63  ;;  %v627_v7 = vsub.f32 %v10659_v30, %v14694_v58  ;;  %v397_v8 = vand.u32 4294901760, %v46_v59  ;;  %v400_v9 = vand.u32 4294901760, %v47_v60 }
  0x35   :  { %v9004_v12 = vpack.c.bf16 %v614_v2, %v607_v61  ;;  %8985 = vmatprep.subr.bf16.mxu0 %v10705_v3  ;;  %v621_v13 = vand.u32 4294901760, %v620_v5  ;;  %v14693_v14 = vand.u32 4294901760, %v10663_v32  ;;  %v14691_v15 = vand.u32 4294901760, %v10673_v42  ;;  %v66_v2 = vld [vmem:[#allocation5 + $0xd0] sm:$0xff]  ;;  %v67_v5 = vld [vmem:[#allocation5 + $0xd8] sm:$0xff] }
  0x36   :  { %v10719_v20 = vsub.f32 %v63_v46, %v448_v56  ;;  %v628_v21 = vand.u32 4294901760, %v627_v7  ;;  %v10721_v22 = vpack.c.bf16 %v400_v9, %v397_v8  ;;  %v10723_v26 = vsub.f32 %v46_v59, %v397_v8 }
  0x37   :  { %9005 = vmatprep.subr.bf16.mxu1 %v9004_v12  ;;  %v508_v27 = vsub.f32 %v10663_v32, %v14693_v14  ;;  %v515_v33 = vsub.f32 %v10673_v42, %v14691_v15  ;;  %v451_v34 = vand.u32 4294901760, %v64_v10  ;;  %v454_v37 = vand.u32 4294901760, %v65_v11 }
  0x38   :  { %9007 = vmatpush3.bf16.msra.mxu1 %v9006_v6  ;;  %v9008_v41 = vpack.c.bf16 %v628_v21, %v621_v13  ;;  %8987 = vmatpush3.bf16.msra.mxu0 %v10721_v22  ;;  %v14689_v46 = vand.u32 4294901760, %v10677_v44  ;;  %v14688_v51 = vand.u32 4294901760, %v10680_v47  ;;  %v403_v52 = vand.u32 4294901760, %v48_v19 }
  0x39   :  { %v10734_v53 = vsub.f32 %v47_v60, %v400_v9  ;;  %v509_v54 = vand.u32 4294901760, %v508_v27  ;;  %v516_v55 = vand.u32 4294901760, %v515_v33  ;;  %v10736_v56 = vpack.c.bf16 %v454_v37, %v451_v34  ;;  %v50_v9 = vld [vmem:[#allocation5 + $0x50] sm:$0xff] }
  0x3a   :  { %9009 = vmatprep.subr.bf16.mxu1 %v9008_v41  ;;  %v10738_v59 = vsub.f32 %v64_v10, %v451_v34  ;;  %v634_v61 = vsub.f32 %v10677_v44, %v14689_v46  ;;  %v641_v63 = vsub.f32 %v10680_v47, %v14688_v51  ;;  %v406_v0 = vand.u32 4294901760, %v49_v38  ;;  %v68_v51 = vld [vmem:[#allocation5 + $0xe0] sm:$0xff]  ;;  %v69_v46 = vld [vmem:[#allocation5 + $0xe8] sm:$0xff] }
  0x3b   :  { %v9010_v60 = vpack.c.bf16 %v516_v55, %v509_v54  ;;  %8989 = vmatprep.subr.bf16.mxu0 %v10736_v56  ;;  %v10747_v6 = vsub.f32 %v65_v11, %v454_v37  ;;  %v14686_v7 = vand.u32 4294901760, %v10685_v50  ;;  %v14687_v8 = vand.u32 4294901760, %v10703_v62  ;;  %v51_v37 = vld [vmem:[#allocation5 + $0x58] sm:$0xff] }
  0x3c   :  { %v635_v10 = vand.u32 4294901760, %v634_v61  ;;  %v642_v12 = vand.u32 4294901760, %v641_v63  ;;  %v10751_v13 = vpack.c.bf16 %v406_v0, %v403_v52  ;;  %v10753_v21 = vsub.f32 %v48_v19, %v403_v52 }
  0x3d   :  { %9011 = vmatpush3.bf16.msra.mxu1 %v9010_v60  ;;  %v522_v27 = vsub.f32 %v10685_v50, %v14686_v7  ;;  %v529_v11 = vsub.f32 %v10703_v62, %v14687_v8  ;;  %v457_v33 = vand.u32 4294901760, %v66_v2  ;;  %v460_v34 = vand.u32 4294901760, %v67_v5 }
  0x3e   :  { %v9012_v41 = vpack.c.bf16 %v642_v12, %v635_v10  ;;  %8991 = vmatpush3.bf16.msra.mxu0 %v10751_v13  ;;  %v14690_v54 = vand.u32 4294901760, %v10707_v4  ;;  %v14692_v19 = vand.u32 4294901760, %v10719_v20  ;;  %v409_v52 = vand.u32 4294901760, %v50_v9 }
  0x3f   :  { %v10764_v55 = vsub.f32 %v49_v38, %v406_v0  ;;  %v523_v61 = vand.u32 4294901760, %v522_v27  ;;  %v530_v63 = vand.u32 4294901760, %v529_v11  ;;  %v10766_v60 = vpack.c.bf16 %v460_v34, %v457_v33  ;;  %v52_v11 = vld [vmem:[#allocation5 + $0x60] sm:$0xff] }
  0x40   :  { %9013 = vmatprep.subr.bf16.mxu1 %v9012_v41  ;;  %v10768_v7 = vsub.f32 %v66_v2, %v457_v33  ;;  %v648_v10 = vsub.f32 %v10707_v4, %v14690_v54  ;;  %v655_v12 = vsub.f32 %v10719_v20, %v14692_v19  ;;  %v412_v8 = vand.u32 4294901760, %v51_v37  ;;  %v53_v19 = vld [vmem:[#allocation5 + $0x68] sm:$0xff] }
  0x41   :  { %v9014_v38 = vpack.c.bf16 %v530_v63, %v523_v61  ;;  %8993 = vmatprep.subr.bf16.mxu0 %v10766_v60  ;;  %v10777_v0 = vsub.f32 %v67_v5, %v460_v34  ;;  %v14695_v27 = vand.u32 4294901760, %v10723_v26  ;;  %v14697_v2 = vand.u32 4294901760, %v10734_v53 }
  0x42   :  { %v649_v33 = vand.u32 4294901760, %v648_v10  ;;  %v656_v41 = vand.u32 4294901760, %v655_v12  ;;  %v10781_v54 = vpack.c.bf16 %v412_v8, %v409_v52  ;;  %v10783_v15 = vsub.f32 %v50_v9, %v409_v52 }
  0x43   :  { %9015 = vmatpush3.bf16.msra.mxu1 %v9014_v38  ;;  %v536_v61 = vsub.f32 %v10723_v26, %v14695_v27  ;;  %v543_v5 = vsub.f32 %v10734_v53, %v14697_v2  ;;  %v463_v34 = vand.u32 4294901760, %v68_v51  ;;  %v466_v63 = vand.u32 4294901760, %v69_v46 }
  0x44   :  { %15119 = vst [vmem:[#allocation12_spill] sm:$0xff] %v10781_v54  ;;  %v9016_v14 = vpack.c.bf16 %v656_v41, %v649_v33  ;;  %8995 = vmatpush3.bf16.msra.mxu0 %v10781_v54  ;;  %v14700_v10 = vand.u32 4294901760, %v10738_v59  ;;  %v14702_v9 = vand.u32 4294901760, %v10747_v6  ;;  %v415_v52 = vand.u32 4294901760, %v52_v11 }
  0x45   :  { %v10794_v12 = vsub.f32 %v51_v37, %v412_v8  ;;  %v537_v38 = vand.u32 4294901760, %v536_v61  ;;  %v544_v58 = vand.u32 4294901760, %v543_v5  ;;  %v10796_v27 = vpack.c.bf16 %v466_v63, %v463_v34  ;;  %v54_v61 = vld [vmem:[#allocation5 + $0x70] sm:$0xff] }
  0x46   :  { %9017 = vmatprep.subr.bf16.mxu1 %v9016_v14  ;;  %v10798_v57 = vsub.f32 %v68_v51, %v463_v34  ;;  %v662_v33 = vsub.f32 %v10738_v59, %v14700_v10  ;;  %v669_v41 = vsub.f32 %v10747_v6, %v14702_v9  ;;  %v418_v2 = vand.u32 4294901760, %v53_v19  ;;  %v55_v9 = vld [vmem:[#allocation5 + $0x78] sm:$0xff] }
  0x47   :  { %15120 = vst [vmem:[#allocation13_spill] sm:$0xff] %v10796_v27  ;;  %v9018_v8 = vpack.c.bf16 %v544_v58, %v537_v38  ;;  %8997 = vmatprep.subr.bf16.mxu0 %v10796_v27  ;;  %v10807_v37 = vsub.f32 %v69_v46, %v466_v63  ;;  %v14704_v14 = vand.u32 4294901760, %v10753_v21  ;;  %v14705_v51 = vand.u32 4294901760, %v10764_v55 }
  0x48   :  { %v663_v5 = vand.u32 4294901760, %v662_v33  ;;  %v670_v34 = vand.u32 4294901760, %v669_v41  ;;  %v10811_v10 = vpack.c.bf16 %v418_v2, %v415_v52  ;;  %v10813_v48 = vsub.f32 %v52_v11, %v415_v52 }
  0x49   :  { %9019 = vmatpush3.bf16.msra.mxu1 %v9018_v8  ;;  %v550_v58 = vsub.f32 %v10753_v21, %v14704_v14  ;;  %v557_v46 = vsub.f32 %v10764_v55, %v14705_v51  ;;  %v469_v63 = vand.u32 4294901760, %v70_v40  ;;  %v472_v38 = vand.u32 4294901760, %v71_v39 }
  0x4a   :  { %15121 = vst [vmem:[#allocation14_spill] sm:$0xff] %v10811_v10  ;;  %v9020_v45 = vpack.c.bf16 %v670_v34, %v663_v5  ;;  %8999 = vmatpush3.bf16.msra.mxu0 %v10811_v10  ;;  %v14708_v33 = vand.u32 4294901760, %v10768_v7  ;;  %v14709_v11 = vand.u32 4294901760, %v10777_v0  ;;  %v421_v52 = vand.u32 4294901760, %v54_v61  ;;  %v10836_v10 = vld [vmem:[#allocation2] sm:$0xff] }
  0x4b   :  { %v10824_v41 = vsub.f32 %v53_v19, %v418_v2  ;;  %v551_v8 = vand.u32 4294901760, %v550_v58  ;;  %v558_v28 = vand.u32 4294901760, %v557_v46  ;;  %v10826_v14 = vpack.c.bf16 %v472_v38, %v469_v63  ;;  %15123 = vst [vmem:[#allocation16_spill] sm:$0xff] %v10836_v10 }
  0x4c   :  { %9021 = vmatprep.subr.bf16.mxu1 %v9020_v45  ;;  %v10828_v16 = vsub.f32 %v70_v40, %v469_v63  ;;  %v676_v5 = vsub.f32 %v10768_v7, %v14708_v33  ;;  %v683_v34 = vsub.f32 %v10777_v0, %v14709_v11  ;;  %v424_v51 = vand.u32 4294901760, %v55_v9 }
  0x4d   :  { %15122 = vst [vmem:[#allocation15_spill] sm:$0xff] %v10826_v14  ;;  %v9022_v19 = vpack.c.bf16 %v558_v28, %v551_v8  ;;  %9001 = vmatprep.subr.bf16.mxu0 %v10826_v14  ;;  %v10839_v2 = vsub.f32 %v71_v39, %v472_v38  ;;  %v14710_v45 = vand.u32 4294901760, %v10783_v15  ;;  %v14711_v40 = vand.u32 4294901760, %v10794_v12 }
  0x4e   :  { %v677_v58 = vand.u32 4294901760, %v676_v5  ;;  %v684_v46 = vand.u32 4294901760, %v683_v34  ;;  %v10843_v63 = vpack.c.bf16 %v424_v51, %v421_v52  ;;  %v10845_v33 = vsub.f32 %v54_v61, %v421_v52 }
  0x4f   :  { %9023 = vmatpush3.bf16.msra.mxu1 %v9022_v19  ;;  %v564_v11 = vsub.f32 %v10783_v15, %v14710_v45  ;;  %v571_v28 = vsub.f32 %v10794_v12, %v14711_v40  ;;  %v15125_v39 = vsub.s32 1, %v10642_v1  ;;  %v14720_v8 = vand.u32 4294901760, %v10798_v57 }
  0x50   :  { %15124 = vst [vmem:[#allocation17_spill] sm:$0xff] %v10843_v63  ;;  %v9024_v5 = vpack.c.bf16 %v684_v46, %v677_v58  ;;  %9003 = vmatpush3.bf16.msra.mxu0 %v10843_v63  ;;  %v14721_v61 = vand.u32 4294901760, %v10807_v37  ;;  %v9036_v52 = vpack.c.bf16 %v10668_v36, %v10666_v35  ;;  %v15126_v34 = vsub.s32 0, %v10642_v1 }
  0x51   :  { %v305_v38 = vrot.slane %v10836_v10, %v15125_v39  ;;  %v565_v45 = vand.u32 4294901760, %v564_v11  ;;  %v572_v40 = vand.u32 4294901760, %v571_v28  ;;  %v690_v39 = vsub.f32 %v10798_v57, %v14720_v8 }
  0x52   :  { %v301_v19 = vrot.slane %v10836_v10, %v15126_v34  ;;  %9025 = vmatprep.subr.bf16.mxu1 %v9024_v5  ;;  %v697_v58 = vsub.f32 %v10807_v37, %v14721_v61  ;;  %9037 = vmatprep.subr.bf16.mxu0 %v9036_v52  ;;  %v14722_v1 = vand.u32 4294901760, %v10813_v48  ;;  %v14723_v34 = vand.u32 4294901760, %v10824_v41 }
  0x53   :  { %v10864_v14 = vand.u32 4294901760, %v305_v38  ;;  %v10876_v11 = vsub.f32 %v55_v9, %v424_v51  ;;  %v9026_v28 = vpack.c.bf16 %v572_v40, %v565_v45  ;;  %v691_v63 = vand.u32 4294901760, %v690_v39 }
  0x54   :  { %v10872_v46 = vand.u32 4294901760, %v301_v19  ;;  %v698_v5 = vand.u32 4294901760, %v697_v58  ;;  %v578_v52 = vsub.f32 %v10813_v48, %v14722_v1  ;;  %v585_v9 = vsub.f32 %v10824_v41, %v14723_v34 }
  0x55   :  { %15127 = vst [vmem:[#allocation18_spill] sm:$0xff] %v10864_v14  ;;  %v10879_v10 = vsub.f32 %v305_v38, %v10864_v14  ;;  %715 = vmatprep.mubr.f32.mxu1 %v10864_v14  ;;  %9027 = vmatpush3.bf16.msra.mxu1 %v9026_v28  ;;  %v14728_v45 = vand.u32 4294901760, %v10828_v16  ;;  %v14729_v40 = vand.u32 4294901760, %v10839_v2  ;;  %v591_v34 = vand.u32 4294901760, %v10845_v33 }
  0x56   :  { %v10883_v8 = vsub.f32 %v301_v19, %v10872_v46  ;;  %v9028_v38 = vpack.c.bf16 %v698_v5, %v691_v63  ;;  %v579_v19 = vand.u32 4294901760, %v578_v52  ;;  %v586_v58 = vand.u32 4294901760, %v585_v9 }
  0x57   :  { %v476_v51 = vand.u32 4294901760, %v10879_v10  ;;  %v704_v1 = vsub.f32 %v10828_v16, %v14728_v45  ;;  %v711_v28 = vsub.f32 %v10839_v2, %v14729_v40  ;;  %v9038_v52 = vpack.c.bf16 %v10651_v24, %v10647_v18 }
  0x58   :  { %v14732_v39 = vand.u32 4294901760, %v10883_v8  ;;  %9029 = vmatprep.subr.bf16.mxu1 %v9028_v38  ;;  %v9030_v5 = vpack.c.bf16 %v586_v58, %v579_v19  ;;  %v598_v9 = vand.u32 4294901760, %v10876_v11  ;;  %v592_v40 = vsub.f32 %v10845_v33, %v591_v34 }
  0x59   :  { %v477_v61 = vsub.f32 %v10879_v10, %v476_v51  ;;  %v705_v27 = vand.u32 4294901760, %v704_v1  ;;  %v712_v45 = vand.u32 4294901760, %v711_v28  ;;  %v9040_v38 = vpack.c.bf16 %v10659_v30, %v10657_v29 }
  0x5a   :  { %v483_v63 = vsub.f32 %v10883_v8, %v14732_v39  ;;  %9031 = vmatpush3.bf16.msra.mxu1 %v9030_v5  ;;  %v599_v19 = vsub.f32 %v10876_v11, %v598_v9  ;;  %v593_v39 = vand.u32 4294901760, %v592_v40  ;;  %v9042_v1 = vpack.c.bf16 %v10673_v42, %v10663_v32 }
  0x5b   :  { %v478_v14 = vand.u32 4294901760, %v477_v61  ;;  %v9032_v58 = vpack.c.bf16 %v712_v45, %v705_v27  ;;  %v9046_v5 = vpack.c.bf16 %v10703_v62, %v10685_v50  ;;  %v15128_v27 = vand.u32 4294901760, %v10666_v35 }
  0x5c   :  { %v484_v54 = vand.u32 4294901760, %v483_v63  ;;  %v600_v61 = vand.u32 4294901760, %v599_v19  ;;  %v9044_v63 = vpack.c.bf16 %v10680_v47, %v10677_v44  ;;  %v15130_v45 = vand.u32 4294901760, %v10647_v18 }
  0x5d   :  { %479 = vmatprep.mubr.f32.mxu0 %v478_v14  ;;  %9033 = vmatprep.subr.bf16.mxu1 %v9032_v58  ;;  %v15131_v40 = vand.u32 4294901760, %v10651_v24  ;;  %v15134_v58 = vand.u32 4294901760, %v10663_v32  ;;  %v15136_v35 = vand.u32 4294901760, %v10677_v44  ;;  %v15138_v24 = vand.u32 4294901760, %v10685_v50 }
  0x5e   :  { %485 = vmatmul.mubr.f32.vlgmr.msra.gmra.mrb[0].mxu0 %v484_v54  ;;  %v9034_v28 = vpack.c.bf16 %v600_v61, %v593_v39  ;;  %v15129_v54 = vand.u32 4294901760, %v10668_v36  ;;  %v15132_v39 = vand.u32 4294901760, %v10657_v29  ;;  %v15135_v61 = vand.u32 4294901760, %v10673_v42 }
  0x5f   :  { %9039 = vmatpush3.bf16.msra.mxu0 %v9038_v52  ;;  %852 = vmatprep.mubr.f32.mxu0 %v10879_v10  ;;  %v9102_v52 = vpack.c.bf16 %v15131_v40, %v15130_v45  ;;  %v15137_v36 = vand.u32 4294901760, %v10680_v47  ;;  %v15139_v29 = vand.u32 4294901760, %v10703_v62  ;;  %v15141_v32 = vand.u32 4294901760, %v10719_v20 }
  0x60   :  { %9041 = vmatprep.subr.bf16.mxu0 %v9040_v38  ;;  %v9100_v14 = vpack.c.bf16 %v15129_v54, %v15128_v27  ;;  %v15133_v38 = vand.u32 4294901760, %v10659_v30  ;;  %v10940_v10 = vpack.c.bf16 %v15135_v61, %v15134_v58  ;;  %9035 = vmatpush3.bf16.msra.mxu1 %v9034_v28  ;;  %v15140_v30 = vand.u32 4294901760, %v10707_v4 }
  0x61   :  { %v10946_v18 = vpack.c.bf16 %v15137_v36, %v15136_v35  ;;  %v10952_v27 = vpack.c.bf16 %v15139_v29, %v15138_v24  ;;  %v15142_v28 = vand.u32 4294901760, %v10723_v26  ;;  %v15143_v44 = vand.u32 4294901760, %v10734_v53  ;;  %9069 = vmatprep.subr.bf16.mxu1 %v10645_v17 }
  0x62   :  { %v9104_v19 = vpack.c.bf16 %v15133_v38, %v15132_v39  ;;  %v10958_v42 = vpack.c.bf16 %v15141_v32, %v15140_v30  ;;  %v15144_v47 = vand.u32 4294901760, %v10738_v59  ;;  %v15145_v50 = vand.u32 4294901760, %v10747_v6 }
  0x63   :  { %v10964_v54 = vpack.c.bf16 %v15143_v44, %v15142_v28  ;;  %9043 = vmatpush3.bf16.msra.mxu0 %v9042_v1  ;;  %v15146_v45 = vand.u32 4294901760, %v10753_v21  ;;  %v15147_v40 = vand.u32 4294901760, %v10764_v55  ;;  %v15148_v38 = vand.u32 4294901760, %v10768_v7  ;;  %717 = vmatmul.mubr.f32.vlgmr.msra.gmra.mrb[0].mxu1 %v10872_v46  ;;  %v15158_v44 = vld [vmem:[#allocation18_spill] sm:$0xff] }
  0x64   :  { %v10971_v62 = vpack.c.bf16 %v15145_v50, %v15144_v47  ;;  %v15149_v58 = vand.u32 4294901760, %v10777_v0  ;;  %9045 = vmatprep.subr.bf16.mxu0 %v9044_v63  ;;  %v9048_v1 = vpack.c.bf16 %v10719_v20, %v10707_v4  ;;  %v15150_v35 = vand.u32 4294901760, %v10783_v15  ;;  %9071 = vmatpush3.bf16.msra.mxu1 %v10649_v23 }
  0x65   :  { %v10977_v39 = vpack.c.bf16 %v15147_v40, %v15146_v45  ;;  %v15151_v36 = vand.u32 4294901760, %v10794_v12  ;;  %v15152_v29 = vand.u32 4294901760, %v10813_v48  ;;  %v15153_v30 = vand.u32 4294901760, %v10824_v41  ;;  %959 = vmatprep.mubr.f32.mxu1 %v476_v51  ;;  %9073 = vmatprep.subr.bf16.mxu1 %v10653_v25  ;;  %v90_v40 = vld [vmem:[#allocation5 + $0x190] sm:$0xff] }
  0x66   :  { %v10983_v61 = vpack.c.bf16 %v15149_v58, %v15148_v38  ;;  %v9050_v4 = vpack.c.bf16 %v10734_v53, %v10723_v26  ;;  %v9052_v20 = vpack.c.bf16 %v10747_v6, %v10738_v59  ;;  %v9054_v63 = vpack.c.bf16 %v10764_v55, %v10753_v21  ;;  %v15155_v21 = vld [vmem:[#allocation13_spill] sm:$0xff]  ;;  %v15156_v55 = vld [vmem:[#allocation14_spill] sm:$0xff] }
  0x67   :  { %v10991_v24 = vpack.c.bf16 %v15151_v36, %v15150_v35  ;;  %v10997_v32 = vpack.c.bf16 %v15153_v30, %v15152_v29  ;;  %9047 = vmatpush3.bf16.msra.mxu0 %v9046_v5  ;;  %v9056_v51 = vpack.c.bf16 %v10777_v0, %v10768_v7  ;;  %v9058_v26 = vpack.c.bf16 %v10794_v12, %v10783_v15  ;;  %v15154_v7 = vld [vmem:[#allocation12_spill] sm:$0xff]  ;;  %v72_v12 = vld [vmem:[#allocation5 + $0x100] sm:$0xff]  ;;  %v15159_v38 = vld [vmem:[#allocation17_spill] sm:$0xff] }
  0x68   :  { %9049 = vmatprep.subr.bf16.mxu0 %v9048_v1  ;;  %9075 = vmatpush3.bf16.msra.mxu1 %v10661_v31  ;;  %v9060_v53 = vpack.c.bf16 %v10807_v37, %v10798_v57  ;;  %v9062_v59 = vpack.c.bf16 %v10824_v41, %v10813_v48  ;;  %v9064_v6 = vpack.c.bf16 %v10839_v2, %v10828_v16  ;;  %v88_v48 = vld [vmem:[#allocation5 + $0x180] sm:$0xff]  ;;  %v89_v0 = vld [vmem:[#allocation5 + $0x188] sm:$0xff]  ;;  %v1241_v50 = vand.u32 4294901760, %v72_v12  ;;  %v75_v1 = vld [vmem:[#allocation5 + $0x118] sm:$0xff] }
  0x69   :  { %9077 = vmatprep.subr.bf16.mxu1 %v10675_v43  ;;  %v9066_v15 = vpack.c.bf16 %v10876_v11, %v10845_v33  ;;  %v73_v41 = vld [vmem:[#allocation5 + $0x108] sm:$0xff]  ;;  %v1289_v28 = vand.u32 4294901760, %v88_v48  ;;  %v1292_v47 = vand.u32 4294901760, %v89_v0  ;;  %v92_v36 = vld [vmem:[#allocation5 + $0x1a0] sm:$0xff]  ;;  %v15160_v30 = vand.u32 4294901760, %v10883_v8 }
  0x6a   :  { %v15157_v5 = vld [vmem:[#allocation15_spill] sm:$0xff]  ;;  %v1244_v45 = vand.u32 4294901760, %v73_v41 }
  0x6b   :  { %9051 = vmatpush3.bf16.msra.mxu0 %v9050_v4  ;;  %v11037_v58 = vsub.f32 %v88_v48, %v1289_v28  ;;  %v93_v29 = vld [vmem:[#allocation5 + $0x1a8] sm:$0xff]  ;;  %v11042_v4 = vsub.f32 %v89_v0, %v1292_v47  ;;  %v94_v0 = vld [vmem:[#allocation5 + $0x1b0] sm:$0xff] }
  0x6c   :  { %9053 = vmatprep.subr.bf16.mxu0 %v9052_v20  ;;  %9079 = vmatpush3.bf16.msra.mxu1 %v10683_v49  ;;  %v11044_v20 = vsub.f32 %v72_v12, %v1241_v50  ;;  %v11074_v48 = vpack.c.bf16 %v1244_v45, %v1241_v50 }
  0x6d   :  { %9081 = vmatprep.subr.bf16.mxu1 %v10705_v3 }
  0x6e   :  { %15165 = vst [vmem:[#allocation12_spill] sm:$0xff] %v11074_v48  ;;  %v14739_v11 = vand.u32 4294901760, %v11044_v20 }
  0x6f   :  { %9055 = vmatpush3.bf16.msra.mxu0 %v9054_v63  ;;  %v15162_v63 = vand.u32 4294901760, %v10807_v37  ;;  %v14745_v37 = vand.u32 4294901760, %v11037_v58 }
  0x70   :  { %9057 = vmatprep.subr.bf16.mxu0 %v9056_v51  ;;  %9083 = vmatpush3.bf16.msra.mxu1 %v10721_v22  ;;  %v15163_v51 = vand.u32 4294901760, %v10828_v16  ;;  %v1304_v16 = vand.u32 4294901760, %v93_v29 }
  0x71   :  { %9085 = vmatprep.subr.bf16.mxu1 %v10736_v56 }
  0x73   :  { %9059 = vmatpush3.bf16.msra.mxu0 %v9058_v26  ;;  %v15164_v26 = vand.u32 4294901760, %v10839_v2  ;;  %v76_v2 = vld [vmem:[#allocation5 + $0x120] sm:$0xff] }
  0x74   :  { %9061 = vmatprep.subr.bf16.mxu0 %v9060_v53  ;;  %9087 = vmatpush3.bf16.msra.mxu1 %v10751_v13 }
  0x75   :  { %9089 = vmatprep.subr.bf16.mxu1 %v10766_v60 }
  0x77   :  { %9063 = vmatpush3.bf16.msra.mxu0 %v9062_v59  ;;  %v1250_v59 = vand.u32 4294901760, %v75_v1 }
  0x78   :  { %9065 = vmatprep.subr.bf16.mxu0 %v9064_v6  ;;  %9091 = vmatpush3.bf16.msra.mxu1 %v15154_v7  ;;  %v77_v6 = vld [vmem:[#allocation5 + $0x128] sm:$0xff] }
  0x79   :  { %9093 = vmatprep.subr.bf16.mxu1 %v15155_v21 }
  0x7b   :  { %9067 = vmatpush3.bf16.msra.mxu0 %v9066_v15  ;;  %v11072_v15 = vpack.c.bf16 %v1292_v47, %v1289_v28  ;;  %v1256_v28 = vand.u32 4294901760, %v77_v6  ;;  %v11092_v47 = vsub.f32 %v75_v1, %v1250_v59 }
  0x7c   :  { %9101 = vmatprep.subr.bf16.mxu0 %v9100_v14  ;;  %9095 = vmatpush3.bf16.msra.mxu1 %v15156_v55  ;;  %v91_v14 = vld [vmem:[#allocation5 + $0x198] sm:$0xff] }
  0x7d   :  { %9097 = vmatprep.subr.bf16.mxu1 %v15157_v5  ;;  %v1298_v35 = vand.u32 4294901760, %v91_v14 }
  0x7e   :  { %855 = vmatmul.mubr.f32.vlgmr.msra.gmra.mrb[2].mxu0 %v10883_v8  ;;  %v11059_v8 = vpack.c.bf16 %v15164_v26, %v15163_v51 }
  0x7f   :  { %9103 = vmatpush3.bf16.msra.mxu0 %v9102_v52  ;;  %1129 = vmatprep.mubr.f32.mxu0 %v15158_v44  ;;  %v74_v52 = vld [vmem:[#allocation5 + $0x110] sm:$0xff] }
  0x80   :  { %9105 = vmatprep.subr.bf16.mxu0 %v9104_v19  ;;  %9099 = vmatpush3.bf16.msra.mxu1 %v15159_v38  ;;  %v1295_v19 = vand.u32 4294901760, %v90_v40  ;;  %v1247_v53 = vand.u32 4294901760, %v74_v52 }
  0x81   :  { %9133 = vmatprep.subr.bf16.mxu1 %v10645_v17  ;;  %v15161_v17 = vand.u32 4294901760, %v10798_v57  ;;  %v1301_v57 = vand.u32 4294901760, %v92_v36 }
  0x82   :  { %v11080_v33 = vpack.c.bf16 %v1298_v35, %v1295_v19  ;;  %v11088_v12 = vsub.f32 %v74_v52, %v1247_v53  ;;  %v15166_v52 = vld [vmem:[#allocation11_spill] sm:$0xff] }
  0x83   :  { %9107 = vmatpush3.bf16.msra.mxu0 %v10940_v10  ;;  %963 = vmatmul.mubr.f32.vlgmr.msra.gmra.mrb[2].mxu1 %v15160_v30  ;;  %v11046_v10 = vsub.f32 %v73_v41, %v1244_v45  ;;  %v1253_v41 = vand.u32 4294901760, %v76_v2  ;;  %v11094_v50 = vpack.c.bf16 %v1304_v16, %v1301_v57  ;;  %v1468_v45 = vsub.f32 %v11037_v58, %v14745_v37  ;;  %v82_v37 = vld [vmem:[#allocation5 + $0x150] sm:$0xff] }
  0x84   :  { %9109 = vmatprep.subr.bf16.mxu0 %v10946_v18  ;;  %9135 = vmatpush3.bf16.msra.mxu1 %v10649_v23  ;;  %v11053_v18 = vpack.c.bf16 %v15162_v63, %v15161_v17  ;;  %v11068_v23 = vpack.c.bf16 %v598_v9, %v591_v34  ;;  %v14740_v34 = vand.u32 4294901760, %v11042_v4  ;;  %v11115_v30 = vsub.f32 %v93_v29, %v1304_v16  ;;  %v15168_v63 = vld [vmem:[#allocation16_spill] sm:$0xff] }
  0x85   :  { %1233 = vmatprep.mubr.f32.mxu1 %v15158_v44  ;;  %9137 = vmatprep.subr.bf16.mxu1 %v10653_v25  ;;  %v11078_v25 = vsub.f32 %v91_v14, %v1298_v35  ;;  %v14734_v9 = vand.u32 4294901760, %v11046_v10  ;;  %v95_v44 = vld [vmem:[#allocation5 + $0x1b8] sm:$0xff]  ;;  %v11113_v35 = vsub.f32 %v92_v36, %v1301_v57  ;;  %v11117_v17 = vpack.c.bf16 %v1256_v28, %v1253_v41 }
  0x86   :  { %v11124_v26 = vsub.f32 %v76_v2, %v1253_v41  ;;  %v14736_v36 = vand.u32 4294901760, %v11088_v12  ;;  %v14738_v29 = vand.u32 4294901760, %v11092_v47  ;;  %v1469_v57 = vand.u32 4294901760, %v1468_v45 }
  0x87   :  { %9111 = vmatpush3.bf16.msra.mxu0 %v10952_v27  ;;  %v11076_v27 = vsub.f32 %v90_v40, %v1295_v19  ;;  %v14735_v14 = vand.u32 4294901760, %v11078_v25  ;;  %v14733_v19 = vsub.s32 3, %v15166_v52  ;;  %v1363_v1 = vsub.f32 %v11046_v10, %v14734_v9  ;;  %15167 = vst [vmem:[#allocation13_spill] sm:$0xff] %v11117_v17 }
  0x88   :  { %9113 = vmatprep.subr.bf16.mxu0 %v10958_v42  ;;  %9139 = vmatpush3.bf16.msra.mxu1 %v10661_v31  ;;  %v11086_v42 = vpack.c.bf16 %v1250_v59, %v1247_v53  ;;  %v1307_v31 = vand.u32 4294901760, %v94_v0  ;;  %v11126_v53 = vsub.f32 %v77_v6, %v1256_v28  ;;  %v78_v59 = vld [vmem:[#allocation5 + $0x130] sm:$0xff] }
  0x89   :  { %9141 = vmatprep.subr.bf16.mxu1 %v10675_v43  ;;  %v14737_v40 = vand.u32 4294901760, %v11076_v27  ;;  %v1475_v43 = vsub.f32 %v11042_v4, %v14740_v34  ;;  %v313_v51 = vrot.slane %v15168_v63, %v14733_v19  ;;  %v1364_v41 = vand.u32 4294901760, %v1363_v1  ;;  %v81_v34 = vld [vmem:[#allocation5 + $0x148] sm:$0xff] }
  0x8a   :  { %15169 = vst [vmem:[#allocation14_spill] sm:$0xff] %v11126_v53  ;;  %v11142_v19 = vsub.f32 %v94_v0, %v1307_v31  ;;  %v96_v0 = vld [vmem:[#allocation5 + $0x1c0] sm:$0xff] }
  0x8b   :  { %9115 = vmatpush3.bf16.msra.mxu0 %v10964_v54  ;;  %v1356_v54 = vsub.f32 %v11044_v20, %v14739_v11  ;;  %v1482_v16 = vsub.f32 %v11076_v27, %v14737_v40  ;;  %v1476_v2 = vand.u32 4294901760, %v1475_v43  ;;  %v1370_v43 = vsub.f32 %v11088_v12, %v14736_v36  ;;  %v80_v36 = vld [vmem:[#allocation5 + $0x140] sm:$0xff] }
  0x8c   :  { %9117 = vmatprep.subr.bf16.mxu0 %v10971_v62  ;;  %v1310_v62 = vand.u32 4294901760, %v95_v44  ;;  %9143 = vmatpush3.bf16.msra.mxu1 %v10683_v49  ;;  %v79_v49 = vld [vmem:[#allocation5 + $0x138] sm:$0xff]  ;;  %v14744_v40 = vand.u32 4294901760, %v11124_v26 }
  0x8d   :  { %9145 = vmatprep.subr.bf16.mxu1 %v10705_v3  ;;  %v1489_v3 = vsub.f32 %v11078_v25, %v14735_v14  ;;  %v1357_v6 = vand.u32 4294901760, %v1356_v54  ;;  %v1262_v45 = vand.u32 4294901760, %v79_v49  ;;  %v14742_v54 = vand.u32 4294901760, %v11113_v35 }
  0x8e   :  { %v11139_v28 = vpack.c.bf16 %v1310_v62, %v1307_v31  ;;  %v11149_v14 = vsub.f32 %v95_v44, %v1310_v62  ;;  %v97_v31 = vld [vmem:[#allocation5 + $0x1c8] sm:$0xff]  ;;  %v1483_v1 = vand.u32 4294901760, %v1482_v16  ;;  %v11161_v62 = vpack.c.bf16 %v1476_v2, %v1469_v57 }
  0x8f   :  { %9119 = vmatpush3.bf16.msra.mxu0 %v10977_v39  ;;  %v11137_v39 = vand.u32 4294901760, %v313_v51  ;;  %v1313_v16 = vand.u32 4294901760, %v96_v0  ;;  %v11174_v57 = vsub.f32 %v79_v49, %v1262_v45  ;;  %v1371_v2 = vand.u32 4294901760, %v1370_v43 }
  0x90   :  { %9121 = vmatprep.subr.bf16.mxu0 %v10983_v61  ;;  %15171 = vst [vmem:[#allocation18_spill] sm:$0xff] %v11139_v28  ;;  %9147 = vmatpush3.bf16.msra.mxu1 %v10721_v22  ;;  %v1259_v61 = vand.u32 4294901760, %v78_v59  ;;  %15172 = vst [vmem:[#allocation17_spill] sm:$0xff] %v11149_v14  ;;  %v1377_v22 = vsub.f32 %v11092_v47, %v14738_v29  ;;  %v14743_v29 = vand.u32 4294901760, %v11126_v53 }
  0x91   :  { %15170 = vst [vmem:[#allocation15_spill] sm:$0xff] %v11137_v39  ;;  %v11145_v9 = vsub.f32 %v313_v51, %v11137_v39  ;;  %9149 = vmatprep.subr.bf16.mxu1 %v10736_v56  ;;  %v14741_v56 = vand.u32 4294901760, %v11115_v30  ;;  %v11163_v51 = vpack.c.bf16 %v1364_v41, %v1357_v6  ;;  %15175 = vst [vmem:[#allocation20_spill] sm:$0xff] %v11174_v57 }
  0x92   :  { %v11168_v11 = vpack.c.bf16 %v1262_v45, %v1259_v61  ;;  %v1378_v6 = vand.u32 4294901760, %v1377_v22  ;;  %v1496_v41 = vsub.f32 %v11113_v35, %v14742_v54  ;;  %v1384_v49 = vsub.f32 %v11124_v26, %v14744_v40  ;;  %v99_v45 = vld [vmem:[#allocation5 + $0x1d8] sm:$0xff] }
  0x93   :  { %9123 = vmatpush3.bf16.msra.mxu0 %v10991_v24  ;;  %v1490_v24 = vand.u32 4294901760, %v1489_v3  ;;  %v14746_v44 = vand.u32 4294901760, %v11145_v9  ;;  %v1316_v3 = vand.u32 4294901760, %v97_v31  ;;  %v1268_v54 = vand.u32 4294901760, %v81_v34 }
  0x94   :  { %9125 = vmatprep.subr.bf16.mxu0 %v11053_v18  ;;  %9151 = vmatpush3.bf16.msra.mxu1 %v10751_v13  ;;  %15173 = vst [vmem:[#allocation16_spill] sm:$0xff] %v11168_v11  ;;  %v11170_v18 = vsub.f32 %v78_v59, %v1259_v61  ;;  %v1503_v59 = vsub.f32 %v11115_v30, %v14741_v56  ;;  %v1497_v40 = vand.u32 4294901760, %v1496_v41  ;;  %v1385_v43 = vand.u32 4294901760, %v1384_v49 }
  0x95   :  { %9153 = vmatprep.subr.bf16.mxu1 %v10766_v60  ;;  %v11180_v13 = vpack.c.bf16 %v1490_v24, %v1483_v1  ;;  %v1339_v60 = vsub.f32 %v11145_v9, %v14746_v44  ;;  %v1391_v61 = vsub.f32 %v11126_v53, %v14743_v29  ;;  %v11197_v1 = vpack.c.bf16 %v1316_v3, %v1313_v16 }
  0x96   :  { %15174 = vst [vmem:[#allocation19_spill] sm:$0xff] %v11170_v18  ;;  %v11199_v24 = vsub.f32 %v96_v0, %v1313_v16  ;;  %v11201_v56 = vsub.f32 %v97_v31, %v1316_v3  ;;  %v11205_v29 = vpack.c.bf16 %v1378_v6, %v1371_v2  ;;  %v14751_v44 = vand.u32 4294901760, %v11170_v18  ;;  %v83_v31 = vld [vmem:[#allocation5 + $0x158] sm:$0xff] }
  0x97   :  { %9127 = vmatpush3.bf16.msra.mxu0 %v10997_v32  ;;  %v1265_v32 = vand.u32 4294901760, %v80_v36  ;;  %v1322_v16 = vand.u32 4294901760, %v99_v45  ;;  %v1340_v3 = vand.u32 4294901760, %v1339_v60  ;;  %v1392_v53 = vand.u32 4294901760, %v1391_v61 }
  0x98   :  { %9129 = vmatprep.subr.bf16.mxu0 %v11059_v8  ;;  %v98_v8 = vld [vmem:[#allocation5 + $0x1d0] sm:$0xff]  ;;  %9155 = vmatpush3.bf16.msra.mxu1 %v15154_v7  ;;  %v1504_v7 = vand.u32 4294901760, %v1503_v59  ;;  %v15177_v2 = vand.u32 4294901760, %v11149_v14  ;;  %v11222_v22 = vsub.f32 %v81_v34, %v1268_v54  ;;  %v1271_v60 = vand.u32 4294901760, %v82_v37 }
  0x99   :  { %9157 = vmatprep.subr.bf16.mxu1 %v15155_v21  ;;  %v1319_v0 = vand.u32 4294901760, %v98_v8  ;;  %v11218_v41 = vpack.c.bf16 %v1268_v54, %v1265_v32  ;;  %v11220_v59 = vsub.f32 %v80_v36, %v1265_v32  ;;  %v1274_v49 = vand.u32 4294901760, %v83_v31  ;;  %v11234_v36 = vld [vmem:[#allocation5 + $0x1e8] sm:$0xff] }
  0x9a   :  { %v1517_v6 = vsub.f32 %v11149_v14, %v15177_v2  ;;  %15179 = vst [vmem:[#allocation22_spill] sm:$0xff] %v11222_v22  ;;  %v1398_v61 = vsub.f32 %v11170_v18, %v14751_v44  ;;  %v11232_v2 = vld [vmem:[#allocation5 + $0x1e0] sm:$0xff]  ;;  %v9204_v54 = vpack.c.bf16 %v1504_v7, %v1497_v40  ;;  %v11243_v44 = vpack.c.bf16 %v1392_v53, %v1385_v43 }
  0x9b   :  { %9131 = vmatpush3.bf16.msra.mxu0 %v11068_v23  ;;  %v15176_v23 = vand.u32 4294901760, %v11142_v19  ;;  %15178 = vst [vmem:[#allocation21_spill] sm:$0xff] %v11220_v59  ;;  %v11238_v32 = vpack.c.bf16 %v1322_v16, %v1319_v0  ;;  %v11245_v18 = vsub.f32 %v99_v45, %v1322_v16  ;;  %v11248_v14 = vsub.f32 %v82_v37, %v1271_v60  ;;  %v11252_v7 = vld [vmem:[#allocation5 + $0x160] sm:$0xff] }
  0x9c   :  { %9165 = vmatprep.subr.bf16.mxu0 %v11072_v15  ;;  %9159 = vmatpush3.bf16.msra.mxu1 %v15156_v55  ;;  %v14759_v34 = vand.u32 4294901760, %v11232_v2  ;;  %v14760_v40 = vand.u32 4294901760, %v11234_v36  ;;  %v11257_v53 = vpack.c.bf16 %v1274_v49, %v1271_v60  ;;  %v1399_v45 = vand.u32 4294901760, %v1398_v61 }
  0x9d   :  { %v1510_v21 = vsub.f32 %v11142_v19, %v15176_v23  ;;  %9161 = vmatprep.subr.bf16.mxu1 %v15157_v5  ;;  %v15180_v23 = vand.u32 4294901760, %v11174_v57  ;;  %15181 = vst [vmem:[#allocation23_spill] sm:$0xff] %v11238_v32  ;;  %v11240_v5 = vsub.f32 %v98_v8, %v1319_v0  ;;  %15183 = vst [vmem:[#allocation25_spill] sm:$0xff] %v11245_v18  ;;  %v11262_v0 = vld [vmem:[#allocation5 + $0x168] sm:$0xff]  ;;  %v11302_v8 = vld [vmem:[#allocation5 + $0x178] sm:$0xff] }
  0x9e   :  { %1131 = vmatmul.mubr.f32.vlgmr.msra.gmra.mrb[4].mxu0 %v10872_v46  ;;  %v11289_v60 = vsub.f32 %v11234_v36, %v14760_v40  ;;  %v11300_v40 = vld [vmem:[#allocation5 + $0x170] sm:$0xff] }
  0x9f   :  { %9167 = vmatpush3.bf16.msra.mxu0 %v11074_v48  ;;  %v1405_v55 = vsub.f32 %v11174_v57, %v15180_v23  ;;  %15182 = vst [vmem:[#allocation24_spill] sm:$0xff] %v11240_v5  ;;  %v14758_v48 = vand.u32 4294901760, %v11201_v56  ;;  %1341 = vmatprep.mubr.f32.mxu0 %v1340_v3  ;;  %v1511_v23 = vand.u32 4294901760, %v1510_v21  ;;  %v1518_v57 = vand.u32 4294901760, %v1517_v6  ;;  %v11270_v21 = vld [vmem:[#allocation5 + $0x1f0] sm:$0xff]  ;;  %v11272_v6 = vld [vmem:[#allocation5 + $0x1f8] sm:$0xff] }
  0xa0   :  { %9169 = vmatprep.subr.bf16.mxu0 %v11080_v33  ;;  %9163 = vmatpush3.bf16.msra.mxu1 %v15159_v38  ;;  %v15184_v38 = vand.u32 4294901760, %v11199_v24  ;;  %v14762_v3 = vand.u32 4294901760, %v11220_v59 }
  0xa1   :  { %9197 = vmatprep.subr.bf16.mxu1 %v11161_v62  ;;  %v1406_v43 = vand.u32 4294901760, %v1405_v55  ;;  %v1531_v16 = vsub.f32 %v11201_v56, %v14758_v48  ;;  %v9208_v61 = vpack.c.bf16 %v1518_v57, %v1511_v23  ;;  %v11276_v55 = vsub.f32 %v83_v31, %v1274_v49 }
  0xa2   :  { %v1524_v37 = vsub.f32 %v11199_v24, %v15184_v38  ;;  %v1277_v38 = vand.u32 4294901760, %v11252_v7  ;;  %v11284_v48 = vsub.f32 %v11232_v2, %v14759_v34  ;;  %v15185_v57 = vsub.s32 2, %v15166_v52 }
  0xa3   :  { %9171 = vmatpush3.bf16.msra.mxu0 %v11086_v42  ;;  %1235 = vmatmul.mubr.f32.vlgmr.msra.gmra.mrb[4].mxu1 %v10872_v46  ;;  %v1280_v46 = vand.u32 4294901760, %v11262_v0  ;;  %v1532_v62 = vand.u32 4294901760, %v1531_v16  ;;  %v15188_v34 = vand.u32 4294901760, %v11245_v18  ;;  %v15190_v52 = vand.u32 4294901760, %v11272_v6 }
  0xa4   :  { %9173 = vmatprep.subr.bf16.mxu0 %v11094_v50  ;;  %9199 = vmatpush3.bf16.msra.mxu1 %v11163_v51  ;;  %v309_v31 = vrot.slane %v15168_v63, %v15185_v57  ;;  %v9210_v51 = vpack.c.bf16 %v1406_v43, %v1399_v45  ;;  %v1525_v49 = vand.u32 4294901760, %v1524_v37  ;;  %v1412_v63 = vsub.f32 %v11220_v59, %v14762_v3 }
  0xa5   :  { %1577 = vmatprep.mubr.f32.mxu1 %v11137_v39  ;;  %9201 = vmatprep.subr.bf16.mxu1 %v11180_v13  ;;  %v15186_v57 = vand.u32 4294901760, %v11222_v22  ;;  %v15187_v45 = vand.u32 4294901760, %v11240_v5  ;;  %v11315_v37 = vsub.f32 %v11252_v7, %v1277_v38  ;;  %v1545_v23 = vsub.f32 %v11245_v18, %v15188_v34 }
  0xa6   :  { %v11324_v3 = vsub.f32 %v11262_v0, %v1280_v46  ;;  %v11328_v39 = vand.u32 4294901760, %v309_v31  ;;  %v15189_v34 = vand.u32 4294901760, %v11270_v21  ;;  %v14779_v0 = vand.u32 4294901760, %v11284_v48 }
  0xa7   :  { %9175 = vmatpush3.bf16.msra.mxu0 %v11117_v17  ;;  %v1419_v13 = vsub.f32 %v11222_v22, %v15186_v57  ;;  %v1538_v43 = vsub.f32 %v11240_v5, %v15187_v45  ;;  %v1283_v57 = vand.u32 4294901760, %v11300_v40  ;;  %v1286_v45 = vand.u32 4294901760, %v11302_v8 }
  0xa8   :  { %9177 = vmatprep.subr.bf16.mxu0 %v11139_v28  ;;  %9203 = vmatpush3.bf16.msra.mxu1 %v11205_v29  ;;  %v11334_v7 = vsub.f32 %v11270_v21, %v15189_v34  ;;  %v11339_v29 = vsub.f32 %v11272_v6, %v15190_v52  ;;  %v9212_v28 = vpack.c.bf16 %v1532_v62, %v1525_v49  ;;  %v1413_v17 = vand.u32 4294901760, %v1412_v63 }
  0xa9   :  { %9205 = vmatprep.subr.bf16.mxu1 %v9204_v54  ;;  %v1539_v54 = vand.u32 4294901760, %v1538_v43  ;;  %v1546_v18 = vand.u32 4294901760, %v1545_v23  ;;  %v15191_v5 = vand.u32 4294901760, %v11248_v14  ;;  %v15192_v22 = vand.u32 4294901760, %v11276_v55 }
  0xaa   :  { %v11353_v16 = vsub.f32 %v11300_v40, %v1283_v57  ;;  %v11356_v62 = vsub.f32 %v11302_v8, %v1286_v45  ;;  %v11359_v49 = vsub.f32 %v309_v31, %v11328_v39  ;;  %v15194_v31 = vand.u32 4294901760, %v11232_v2 }
  0xab   :  { %9179 = vmatpush3.bf16.msra.mxu0 %v11168_v11  ;;  %v1420_v11 = vand.u32 4294901760, %v1419_v13  ;;  %v1426_v34 = vsub.f32 %v11248_v14, %v15191_v5  ;;  %v1433_v52 = vsub.f32 %v11276_v55, %v15192_v22  ;;  %v1552_v22 = vsub.f32 %v11284_v48, %v14779_v0 }
  0xac   :  { %9181 = vmatprep.subr.bf16.mxu0 %v11197_v1  ;;  %9207 = vmatpush3.bf16.msra.mxu1 %v11243_v44  ;;  %v15193_v44 = vand.u32 4294901760, %v11289_v60  ;;  %v15195_v63 = vand.u32 4294901760, %v11234_v36  ;;  %v9216_v0 = vpack.c.bf16 %v1546_v18, %v1539_v54  ;;  %v1344_v8 = vand.u32 4294901760, %v11359_v49 }
  0xad   :  { %9209 = vmatprep.subr.bf16.mxu1 %v9208_v61  ;;  %v11378_v61 = vpack.c.bf16 %v1280_v46, %v1277_v38  ;;  %v9214_v43 = vpack.c.bf16 %v1420_v11, %v1413_v17  ;;  %v1427_v23 = vand.u32 4294901760, %v1426_v34  ;;  %v1434_v59 = vand.u32 4294901760, %v1433_v52 }
  0xae   :  { %v1559_v5 = vsub.f32 %v11289_v60, %v15193_v44  ;;  %v11376_v13 = vpack.c.bf16 %v15195_v63, %v15194_v31  ;;  %v15196_v44 = vand.u32 4294901760, %v11315_v37  ;;  %v1453_v36 = vand.u32 4294901760, %v11353_v16 }
  0xaf   :  { %9183 = vmatpush3.bf16.msra.mxu0 %v11218_v41  ;;  %v1460_v38 = vand.u32 4294901760, %v11356_v62  ;;  %v1553_v11 = vand.u32 4294901760, %v1552_v22  ;;  %v15198_v18 = vand.u32 4294901760, %v11334_v7  ;;  %v15201_v34 = vand.u32 4294901760, %v11272_v6 }
  0xb0   :  { %9185 = vmatprep.subr.bf16.mxu0 %v11238_v32  ;;  %v1440_v40 = vsub.f32 %v11315_v37, %v15196_v44  ;;  %9211 = vmatpush3.bf16.msra.mxu1 %v9210_v51  ;;  %v15197_v32 = vand.u32 4294901760, %v11324_v3  ;;  %v1560_v17 = vand.u32 4294901760, %v1559_v5  ;;  %v15199_v51 = vand.u32 4294901760, %v11339_v29 }
  0xb1   :  { %9213 = vmatprep.subr.bf16.mxu1 %v9212_v28  ;;  %v1566_v46 = vsub.f32 %v11334_v7, %v15198_v18  ;;  %v9218_v31 = vpack.c.bf16 %v1434_v59, %v1427_v23  ;;  %v1345_v22 = vsub.f32 %v11359_v49, %v1344_v8  ;;  %v1454_v63 = vsub.f32 %v11353_v16, %v1453_v36 }
  0xb2   :  { %v1447_v2 = vsub.f32 %v11324_v3, %v15197_v32  ;;  %v1573_v54 = vsub.f32 %v11339_v29, %v15199_v51  ;;  %v15200_v32 = vand.u32 4294901760, %v11270_v21  ;;  %v1441_v28 = vand.u32 4294901760, %v1440_v40 }
  0xb3   :  { %9187 = vmatpush3.bf16.msra.mxu0 %v11257_v53  ;;  %v1461_v21 = vsub.f32 %v11356_v62, %v1460_v38  ;;  %v11413_v6 = vpack.c.bf16 %v1286_v45, %v1283_v57  ;;  %v9220_v59 = vpack.c.bf16 %v1560_v17, %v1553_v11  ;;  %v1567_v23 = vand.u32 4294901760, %v1566_v46 }
  0xb4   :  { %9189 = vmatprep.subr.bf16.mxu0 %v11376_v13  ;;  %v11401_v52 = vpack.c.bf16 %v15201_v34, %v15200_v32  ;;  %9215 = vmatpush3.bf16.msra.mxu1 %v9214_v43  ;;  %v1448_v5 = vand.u32 4294901760, %v1447_v2  ;;  %v1574_v40 = vand.u32 4294901760, %v1573_v54  ;;  %v9228_v43 = vpack.c.bf16 %v11042_v4, %v11037_v58  ;;  %v15202_v54 = vld [vmem:[#allocation14_spill] sm:$0xff]  ;;  %v15203_v34 = vld [vmem:[#allocation17_spill] sm:$0xff] }
  0xb5   :  { %9217 = vmatprep.subr.bf16.mxu1 %v9216_v0  ;;  %v1346_v44 = vand.u32 4294901760, %v1345_v22  ;;  %v1455_v18 = vand.u32 4294901760, %v1454_v63  ;;  %v1462_v51 = vand.u32 4294901760, %v1461_v21  ;;  %v9230_v57 = vpack.c.bf16 %v11046_v10, %v11044_v20  ;;  %v15207_v63 = vld [vmem:[#allocation20_spill] sm:$0xff] }
  0xb6   :  { %v9222_v2 = vpack.c.bf16 %v1448_v5, %v1441_v28  ;;  %v9224_v45 = vpack.c.bf16 %v1574_v40, %v1567_v23  ;;  %v9232_v0 = vpack.c.bf16 %v11078_v25, %v11076_v27  ;;  %v9234_v17 = vpack.c.bf16 %v11092_v47, %v11088_v12  ;;  %v15204_v28 = vld [vmem:[#allocation12_spill] sm:$0xff]  ;;  %v15206_v5 = vld [vmem:[#allocation19_spill] sm:$0xff]  ;;  %v15208_v23 = vld [vmem:[#allocation21_spill] sm:$0xff] }
  0xb7   :  { %9191 = vmatpush3.bf16.msra.mxu0 %v11378_v61  ;;  %v9226_v11 = vpack.c.bf16 %v1462_v51, %v1455_v18  ;;  %v9236_v46 = vpack.c.bf16 %v11115_v30, %v11113_v35  ;;  %v9238_v32 = vpack.c.bf16 %v15202_v54, %v11124_v26  ;;  %v15205_v22 = vand.u32 4294901760, %v11145_v9  ;;  %v15209_v40 = vld [vmem:[#allocation22_spill] sm:$0xff]  ;;  %v15212_v18 = vld [vmem:[#allocation13_spill] sm:$0xff] }
  0xb8   :  { %9193 = vmatprep.subr.bf16.mxu0 %v11401_v52  ;;  %9219 = vmatpush3.bf16.msra.mxu1 %v9218_v31  ;;  %v9240_v31 = vpack.c.bf16 %v15203_v34, %v11142_v19  ;;  %v9242_v21 = vpack.c.bf16 %v15207_v63, %v15206_v5  ;;  %v15213_v51 = vld [vmem:[#allocation18_spill] sm:$0xff] }
  0xb9   :  { %9221 = vmatprep.subr.bf16.mxu1 %v9220_v59  ;;  %v9244_v59 = vpack.c.bf16 %v11201_v56, %v11199_v24 }
  0xbb   :  { %9195 = vmatpush3.bf16.msra.mxu0 %v11413_v6 }
  0xbc   :  { %9229 = vmatprep.subr.bf16.mxu0 %v9228_v43  ;;  %9223 = vmatpush3.bf16.msra.mxu1 %v9222_v2  ;;  %v9246_v43 = vpack.c.bf16 %v15209_v40, %v15208_v23 }
  0xbd   :  { %9225 = vmatprep.subr.bf16.mxu1 %v9224_v45  ;;  %v9252_v45 = vpack.c.bf16 %v11289_v60, %v11284_v48 }
  0xbe   :  { %1347 = vmatmul.mubr.f32.vlgmr.msra.gmra.mrb[6].mxu0 %v1346_v44  ;;  %v15211_v44 = vld [vmem:[#allocation25_spill] sm:$0xff] }
  0xbf   :  { %9231 = vmatpush3.bf16.msra.mxu0 %v9230_v57  ;;  %1714 = vmatprep.mubr.f32.mxu0 %v11145_v9  ;;  %v15210_v9 = vld [vmem:[#allocation24_spill] sm:$0xff]  ;;  %v9250_v57 = vpack.c.bf16 %v11276_v55, %v11248_v14 }
  0xc0   :  { %9233 = vmatprep.subr.bf16.mxu0 %v9232_v0  ;;  %9227 = vmatpush3.bf16.msra.mxu1 %v9226_v11  ;;  %v9248_v2 = vpack.c.bf16 %v15211_v44, %v15210_v9  ;;  %v15214_v0 = vld [vmem:[#allocation16_spill] sm:$0xff]  ;;  %v9254_v11 = vpack.c.bf16 %v11324_v3, %v11315_v37 }
  0xc1   :  { %9261 = vmatprep.subr.bf16.mxu1 %v11072_v15 }
  0xc3   :  { %9235 = vmatpush3.bf16.msra.mxu0 %v9234_v17  ;;  %1579 = vmatmul.mubr.f32.vlgmr.msra.gmra.mrb[6].mxu1 %v11328_v39  ;;  %v9256_v17 = vpack.c.bf16 %v11339_v29, %v11334_v7 }
  0xc4   :  { %9237 = vmatprep.subr.bf16.mxu0 %v9236_v46  ;;  %9263 = vmatpush3.bf16.msra.mxu1 %v15204_v28  ;;  %v15215_v46 = vld [vmem:[#allocation23_spill] sm:$0xff] }
  0xc5   :  { %1821 = vmatprep.mubr.f32.mxu1 %v15205_v22  ;;  %9265 = vmatprep.subr.bf16.mxu1 %v11080_v33  ;;  %v15217_v22 = vand.u32 4294901760, %v11042_v4  ;;  %v15222_v4 = vand.u32 4294901760, %v11088_v12  ;;  %v15228_v12 = vand.u32 4294901760, %v15202_v54  ;;  %v15233_v54 = vand.u32 4294901760, %v11199_v24 }
  0xc7   :  { %9239 = vmatpush3.bf16.msra.mxu0 %v9238_v32  ;;  %v9258_v32 = vpack.c.bf16 %v11356_v62, %v11353_v16 }
  0xc8   :  { %9241 = vmatprep.subr.bf16.mxu0 %v9240_v31  ;;  %9267 = vmatpush3.bf16.msra.mxu1 %v11086_v42  ;;  %v15216_v31 = vand.u32 4294901760, %v11037_v58  ;;  %v120_v58 = vld [vmem:[#allocation5 + $0x280] sm:$0xff] }
  0xc9   :  { %9269 = vmatprep.subr.bf16.mxu1 %v11094_v50 }
  0xcb   :  { %9243 = vmatpush3.bf16.msra.mxu0 %v9242_v21  ;;  %v9292_v21 = vpack.c.bf16 %v15217_v22, %v15216_v31  ;;  %v104_v31 = vld [vmem:[#allocation5 + $0x200] sm:$0xff]  ;;  %v15225_v22 = vand.u32 4294901760, %v11115_v30  ;;  %v123_v30 = vld [vmem:[#allocation5 + $0x298] sm:$0xff] }
  0xcc   :  { %9245 = vmatprep.subr.bf16.mxu0 %v9244_v59  ;;  %9271 = vmatpush3.bf16.msra.mxu1 %v15212_v18  ;;  %v15218_v59 = vand.u32 4294901760, %v11044_v20  ;;  %v15223_v20 = vand.u32 4294901760, %v11092_v47 }
  0xcd   :  { %9273 = vmatprep.subr.bf16.mxu1 %v15213_v51 }
  0xcf   :  { %9247 = vmatpush3.bf16.msra.mxu0 %v9246_v43  ;;  %v15219_v43 = vand.u32 4294901760, %v11046_v10  ;;  %v9298_v10 = vpack.c.bf16 %v15223_v20, %v15222_v4  ;;  %v2103_v4 = vand.u32 4294901760, %v104_v31  ;;  %v122_v20 = vld [vmem:[#allocation5 + $0x290] sm:$0xff] }
  0xd0   :  { %9249 = vmatprep.subr.bf16.mxu0 %v9248_v2  ;;  %9275 = vmatpush3.bf16.msra.mxu1 %v15214_v0 }
  0xd1   :  { %9277 = vmatprep.subr.bf16.mxu1 %v11197_v1  ;;  %v9294_v2 = vpack.c.bf16 %v15219_v43, %v15218_v59  ;;  %v15226_v59 = vld [vmem:[#allocation15_spill] sm:$0xff] }
  0xd3   :  { %9251 = vmatpush3.bf16.msra.mxu0 %v9250_v57  ;;  %v15220_v57 = vand.u32 4294901760, %v11076_v27  ;;  %v105_v27 = vld [vmem:[#allocation5 + $0x208] sm:$0xff] }
  0xd4   :  { %9253 = vmatprep.subr.bf16.mxu0 %v9252_v45  ;;  %9279 = vmatpush3.bf16.msra.mxu1 %v11218_v41  ;;  %v15221_v45 = vand.u32 4294901760, %v11078_v25  ;;  %v15224_v25 = vand.u32 4294901760, %v11113_v35  ;;  %v2106_v35 = vand.u32 4294901760, %v105_v27 }
  0xd5   :  { %9281 = vmatprep.subr.bf16.mxu1 %v15215_v46 }
  0xd6   :  { %v11573_v62 = vpack.c.bf16 %v2106_v35, %v2103_v4 }
  0xd7   :  { %9255 = vmatpush3.bf16.msra.mxu0 %v9254_v11  ;;  %v9296_v11 = vpack.c.bf16 %v15221_v45, %v15220_v57  ;;  %v15229_v57 = vand.u32 4294901760, %v11142_v19  ;;  %v15230_v45 = vand.u32 4294901760, %v15203_v34  ;;  %v106_v34 = vld [vmem:[#allocation5 + $0x210] sm:$0xff] }
  0xd8   :  { %9257 = vmatprep.subr.bf16.mxu0 %v9256_v17  ;;  %9283 = vmatpush3.bf16.msra.mxu1 %v11257_v53  ;;  %v121_v17 = vld [vmem:[#allocation5 + $0x288] sm:$0xff] }
  0xd9   :  { %9285 = vmatprep.subr.bf16.mxu1 %v11376_v13  ;;  %v2154_v43 = vand.u32 4294901760, %v121_v17 }
  0xdb   :  { %9259 = vmatpush3.bf16.msra.mxu0 %v9258_v32  ;;  %v2151_v32 = vand.u32 4294901760, %v120_v58  ;;  %v11522_v24 = vsub.f32 %v121_v17, %v2154_v43  ;;  %v2157_v17 = vand.u32 4294901760, %v122_v20 }
  0xdc   :  { %9293 = vmatprep.subr.bf16.mxu0 %v9292_v21  ;;  %9287 = vmatpush3.bf16.msra.mxu1 %v11378_v61  ;;  %v9300_v21 = vpack.c.bf16 %v15225_v22, %v15224_v25  ;;  %v15231_v25 = vand.u32 4294901760, %v15206_v5  ;;  %v15232_v22 = vand.u32 4294901760, %v15207_v63  ;;  %v15238_v5 = vand.u32 4294901760, %v15211_v44 }
  0xdd   :  { %9289 = vmatprep.subr.bf16.mxu1 %v11401_v52  ;;  %v15243_v44 = vand.u32 4294901760, %v11289_v60  ;;  %v15246_v60 = vand.u32 4294901760, %v11334_v7  ;;  %v14788_v7 = vand.u32 4294901760, %v11522_v24 }
  0xde   :  { %1717 = vmatmul.mubr.f32.vlgmr.msra.gmra.mrb[8].mxu0 %v11359_v49  ;;  %v15244_v49 = vand.u32 4294901760, %v11315_v37 }
  0xdf   :  { %9295 = vmatpush3.bf16.msra.mxu0 %v9294_v2  ;;  %1991 = vmatprep.mubr.f32.mxu0 %v15226_v59  ;;  %v15227_v2 = vand.u32 4294901760, %v11124_v26  ;;  %v9306_v26 = vpack.c.bf16 %v15232_v22, %v15231_v25  ;;  %v15239_v25 = vld [vmem:[#allocation11_spill] sm:$0xff] }
  0xe0   :  { %9297 = vmatprep.subr.bf16.mxu0 %v9296_v11  ;;  %9291 = vmatpush3.bf16.msra.mxu1 %v11413_v6  ;;  %v9304_v11 = vpack.c.bf16 %v15230_v45, %v15229_v57  ;;  %v15235_v57 = vand.u32 4294901760, %v15208_v23  ;;  %v15240_v23 = vand.u32 4294901760, %v11248_v14 }
  0xe1   :  { %v9302_v47 = vpack.c.bf16 %v15228_v12, %v15227_v2  ;;  %9325 = vmatprep.subr.bf16.mxu1 %v11072_v15  ;;  %v15234_v2 = vand.u32 4294901760, %v11201_v56  ;;  %v11508_v12 = vsub.f32 %v120_v58, %v2151_v32  ;;  %v15237_v15 = vand.u32 4294901760, %v15210_v9  ;;  %v107_v56 = vld [vmem:[#allocation5 + $0x218] sm:$0xff] }
  0xe2   :  { %v14782_v58 = vsub.s32 5, %v15239_v25  ;;  %v15242_v9 = vand.u32 4294901760, %v11284_v48  ;;  %v2109_v48 = vand.u32 4294901760, %v106_v34  ;;  %v2112_v37 = vand.u32 4294901760, %v107_v56 }
  0xe3   :  { %9299 = vmatpush3.bf16.msra.mxu0 %v9298_v10  ;;  %v9308_v19 = vpack.c.bf16 %v15234_v2, %v15233_v54  ;;  %v15236_v10 = vand.u32 4294901760, %v15209_v40  ;;  %v11520_v63 = vpack.c.bf16 %v15238_v5, %v15237_v15  ;;  %1825 = vmatmul.mubr.f32.vlgmr.msra.gmra.mrb[8].mxu1 %v1344_v8  ;;  %v15241_v40 = vand.u32 4294901760, %v11276_v55  ;;  %v124_v2 = vld [vmem:[#allocation5 + $0x2a0] sm:$0xff]  ;;  %v11568_v15 = vld [vmem:[#allocation2] sm:$0xff] }
  0xe4   :  { %9301 = vmatprep.subr.bf16.mxu0 %v9300_v21  ;;  %v11537_v22 = vpack.c.bf16 %v15243_v44, %v15242_v9  ;;  %v2160_v54 = vand.u32 4294901760, %v123_v30  ;;  %9327 = vmatpush3.bf16.msra.mxu1 %v15204_v28  ;;  %v15245_v8 = vand.u32 4294901760, %v11324_v3  ;;  %v11546_v55 = vsub.f32 %v104_v31, %v2103_v4  ;;  %v125_v31 = vld [vmem:[#allocation5 + $0x2a8] sm:$0xff]  ;;  %15248 = vst [vmem:[#allocation14_spill] sm:$0xff] %v11568_v15  ;;  %v127_v9 = vld [vmem:[#allocation5 + $0x2b8] sm:$0xff] }
  0xe5   :  { %v11514_v45 = vpack.c.bf16 %v15236_v10, %v15235_v57  ;;  %v11531_v21 = vpack.c.bf16 %v15241_v40, %v15240_v23  ;;  %v11548_v57 = vsub.f32 %v105_v27, %v2106_v35  ;;  %2095 = vmatprep.mubr.f32.mxu1 %v15226_v59  ;;  %9329 = vmatprep.subr.bf16.mxu1 %v11080_v33  ;;  %v15247_v28 = vand.u32 4294901760, %v11339_v29  ;;  %v109_v29 = vld [vmem:[#allocation5 + $0x228] sm:$0xff]  ;;  %v126_v40 = vld [vmem:[#allocation5 + $0x2b0] sm:$0xff] }
  0xe6   :  { %v11544_v14 = vpack.c.bf16 %v15245_v8, %v15244_v49  ;;  %v11562_v3 = vpack.c.bf16 %v1460_v38, %v1453_v36  ;;  %v14790_v27 = vand.u32 4294901760, %v11508_v12  ;;  %v11565_v59 = vpack.c.bf16 %v2154_v43, %v2151_v32 }
  0xe7   :  { %9303 = vmatpush3.bf16.msra.mxu0 %v9302_v47  ;;  %v11556_v10 = vpack.c.bf16 %v15247_v28, %v15246_v60  ;;  %v2163_v33 = vand.u32 4294901760, %v124_v2  ;;  %v108_v47 = vld [vmem:[#allocation5 + $0x220] sm:$0xff]  ;;  %v321_v16 = vrot.slane %v11568_v15, %v14782_v58  ;;  %v11575_v36 = vpack.c.bf16 %v2160_v54, %v2157_v17  ;;  %v111_v28 = vld [vmem:[#allocation5 + $0x238] sm:$0xff] }
  0xe8   :  { %9305 = vmatprep.subr.bf16.mxu0 %v9304_v11  ;;  %v11577_v38 = vsub.f32 %v122_v20, %v2157_v17  ;;  %v11579_v11 = vsub.f32 %v123_v30, %v2160_v54  ;;  %9331 = vmatpush3.bf16.msra.mxu1 %v11086_v42  ;;  %v11582_v32 = vsub.f32 %v106_v34, %v2109_v48  ;;  %v2166_v43 = vand.u32 4294901760, %v125_v31 }
  0xe9   :  { %15249 = vst [vmem:[#allocation17_spill] sm:$0xff] %v11575_v36  ;;  %v14787_v5 = vand.u32 4294901760, %v11546_v55  ;;  %v14783_v23 = vand.u32 4294901760, %v11548_v57  ;;  %9333 = vmatprep.subr.bf16.mxu1 %v11094_v50  ;;  %v11587_v4 = vsub.f32 %v107_v56, %v2112_v37  ;;  %v2330_v35 = vsub.f32 %v11508_v12, %v14790_v27 }
  0xea   :  { %v2115_v20 = vand.u32 4294901760, %v108_v47  ;;  %v2118_v42 = vand.u32 4294901760, %v109_v29  ;;  %v11592_v30 = vpack.c.bf16 %v2112_v37, %v2109_v48  ;;  %v11594_v34 = vsub.f32 %v124_v2, %v2163_v33 }
  0xeb   :  { %9307 = vmatpush3.bf16.msra.mxu0 %v9306_v26  ;;  %v2337_v44 = vsub.f32 %v11522_v24, %v14788_v7  ;;  %v11599_v26 = vand.u32 4294901760, %v321_v16  ;;  %v2169_v50 = vand.u32 4294901760, %v126_v40  ;;  %v2172_v56 = vand.u32 4294901760, %v127_v9 }
  0xec   :  { %9309 = vmatprep.subr.bf16.mxu0 %v9308_v19  ;;  %15250 = vst [vmem:[#allocation12_spill] sm:$0xff] %v11592_v30  ;;  %v14785_v17 = vand.u32 4294901760, %v11577_v38  ;;  %v14784_v54 = vand.u32 4294901760, %v11579_v11  ;;  %9335 = vmatpush3.bf16.msra.mxu1 %v15212_v18  ;;  %v11604_v49 = vpack.c.bf16 %v2166_v43, %v2163_v33  ;;  %v11606_v19 = vsub.f32 %v125_v31, %v2166_v43  ;;  %v110_v18 = vld [vmem:[#allocation5 + $0x230] sm:$0xff] }
  0xed   :  { %15251 = vst [vmem:[#allocation19_spill] sm:$0xff] %v11599_v26  ;;  %v2218_v2 = vsub.f32 %v11546_v55, %v14787_v5  ;;  %v2225_v8 = vsub.f32 %v11548_v57, %v14783_v23  ;;  %9337 = vmatprep.subr.bf16.mxu1 %v15213_v51  ;;  %v2331_v48 = vand.u32 4294901760, %v2330_v35  ;;  %v11616_v60 = vpack.c.bf16 %v2118_v42, %v2115_v20 }
  0xee   :  { %15252 = vst [vmem:[#allocation20_spill] sm:$0xff] %v11604_v49  ;;  %v14786_v37 = vand.u32 4294901760, %v11582_v32  ;;  %v14789_v31 = vand.u32 4294901760, %v11587_v4  ;;  %v2338_v33 = vand.u32 4294901760, %v2337_v44  ;;  %v11621_v43 = vsub.f32 %v108_v47, %v2115_v20  ;;  %v129_v44 = vld [vmem:[#allocation5 + $0x2c8] sm:$0xff] }
  0xef   :  { %9311 = vmatpush3.bf16.msra.mxu0 %v11514_v45  ;;  %15253 = vst [vmem:[#allocation21_spill] sm:$0xff] %v11616_v60  ;;  %v11623_v58 = vsub.f32 %v109_v29, %v2118_v42  ;;  %v11626_v45 = vsub.f32 %v321_v16, %v11599_v26  ;;  %v11628_v51 = vpack.c.bf16 %v2172_v56, %v2169_v50  ;;  %v2219_v47 = vand.u32 4294901760, %v2218_v2  ;;  %v128_v16 = vld [vmem:[#allocation5 + $0x2c0] sm:$0xff] }
  0xf0   :  { %9313 = vmatprep.subr.bf16.mxu0 %v11520_v63  ;;  %v11630_v35 = vsub.f32 %v126_v40, %v2169_v50  ;;  %v2344_v23 = vsub.f32 %v11577_v38, %v14785_v17  ;;  %v2351_v63 = vsub.f32 %v11579_v11, %v14784_v54  ;;  %9339 = vmatpush3.bf16.msra.mxu1 %v15214_v0  ;;  %v2226_v29 = vand.u32 4294901760, %v2225_v8 }
  0xf1   :  { %15254 = vst [vmem:[#allocation22_spill] sm:$0xff] %v11623_v58  ;;  %15255 = vst [vmem:[#allocation24_spill] sm:$0xff] %v11628_v51  ;;  %v2121_v20 = vand.u32 4294901760, %v110_v18  ;;  %v2124_v42 = vand.u32 4294901760, %v111_v28  ;;  %9341 = vmatprep.subr.bf16.mxu1 %v11197_v1  ;;  %v2232_v40 = vsub.f32 %v11582_v32, %v14786_v37  ;;  %v2239_v50 = vsub.f32 %v11587_v4, %v14789_v31 }
  0xf2   :  { %v14793_v0 = vand.u32 4294901760, %v11594_v34  ;;  %v11650_v8 = vsub.f32 %v127_v9, %v2172_v56  ;;  %v14791_v1 = vand.u32 4294901760, %v11623_v58  ;;  %v14794_v54 = vand.u32 4294901760, %v11626_v45  ;;  %v112_v9 = vld [vmem:[#allocation5 + $0x240] sm:$0xff] }
  0xf3   :  { %9315 = vmatpush3.bf16.msra.mxu0 %v11531_v21  ;;  %v14792_v21 = vand.u32 4294901760, %v11621_v43  ;;  %v2345_v17 = vand.u32 4294901760, %v2344_v23  ;;  %v2352_v37 = vand.u32 4294901760, %v2351_v63  ;;  %v2175_v5 = vand.u32 4294901760, %v128_v16 }
  0xf4   :  { %9317 = vmatprep.subr.bf16.mxu0 %v11537_v22  ;;  %v2178_v7 = vand.u32 4294901760, %v129_v44  ;;  %9343 = vmatpush3.bf16.msra.mxu1 %v11218_v41  ;;  %v11656_v31 = vpack.c.bf16 %v2338_v33, %v2331_v48  ;;  %v11658_v27 = vpack.c.bf16 %v2226_v29, %v2219_v47  ;;  %v11660_v2 = vpack.c.bf16 %v2124_v42, %v2121_v20  ;;  %v113_v33 = vld [vmem:[#allocation5 + $0x248] sm:$0xff]  ;;  %v130_v47 = vld [vmem:[#allocation5 + $0x2d0] sm:$0xff] }
  0xf5   :  { %v11662_v22 = vsub.f32 %v110_v18, %v2121_v20  ;;  %9345 = vmatprep.subr.bf16.mxu1 %v15215_v46  ;;  %v2233_v56 = vand.u32 4294901760, %v2232_v40  ;;  %v2240_v23 = vand.u32 4294901760, %v2239_v50  ;;  %v2358_v63 = vsub.f32 %v11594_v34, %v14793_v0 }
  0xf6   :  { %15256 = vst [vmem:[#allocation25_spill] sm:$0xff] %v11660_v2  ;;  %v15257_v41 = vand.u32 4294901760, %v11606_v19  ;;  %v11673_v18 = vsub.f32 %v111_v28, %v2124_v42  ;;  %v2253_v46 = vsub.f32 %v11623_v58, %v14791_v1  ;;  %v2201_v29 = vsub.f32 %v11626_v45, %v14794_v54  ;;  %v131_v28 = vld [vmem:[#allocation5 + $0x2d8] sm:$0xff]  ;;  %v114_v58 = vld [vmem:[#allocation5 + $0x250] sm:$0xff] }
  0xf7   :  { %9319 = vmatpush3.bf16.msra.mxu0 %v11544_v14  ;;  %v2246_v14 = vsub.f32 %v11621_v43, %v14792_v21  ;;  %v11684_v20 = vpack.c.bf16 %v2352_v37, %v2345_v17  ;;  %v11686_v40 = vpack.c.bf16 %v2178_v7, %v2175_v5  ;;  %v11690_v50 = vsub.f32 %v128_v16, %v2175_v5 }
  0xf8   :  { %v2365_v48 = vsub.f32 %v11606_v19, %v15257_v41  ;;  %9321 = vmatprep.subr.bf16.mxu0 %v11556_v10  ;;  %v2127_v10 = vand.u32 4294901760, %v112_v9  ;;  %9347 = vmatpush3.bf16.msra.mxu1 %v11257_v53  ;;  %v11692_v41 = vsub.f32 %v129_v44, %v2178_v7  ;;  %v2130_v1 = vand.u32 4294901760, %v113_v33  ;;  %v115_v7 = vld [vmem:[#allocation5 + $0x258] sm:$0xff] }
  0xf9   :  { %9349 = vmatprep.subr.bf16.mxu1 %v11376_v13  ;;  %v11697_v17 = vpack.c.bf16 %v2240_v23, %v2233_v56  ;;  %v2359_v37 = vand.u32 4294901760, %v2358_v63  ;;  %v2181_v54 = vand.u32 4294901760, %v130_v47  ;;  %v2247_v53 = vand.u32 4294901760, %v2246_v14 }
  0xfa   :  { %15258 = vst [vmem:[#allocation13_spill] sm:$0xff] %v11692_v41  ;;  %v2366_v0 = vand.u32 4294901760, %v2365_v48  ;;  %v2254_v5 = vand.u32 4294901760, %v2253_v46  ;;  %v2184_v16 = vand.u32 4294901760, %v131_v28  ;;  %v2202_v44 = vand.u32 4294901760, %v2201_v29  ;;  %v11716_v46 = vld [vmem:[#allocation5 + $0x2e0] sm:$0xff] }
  0xfb   :  { %9323 = vmatpush3.bf16.msra.mxu0 %v11562_v3  ;;  %v11700_v42 = vsub.f32 %v112_v9, %v2127_v10  ;;  %v15260_v21 = vand.u32 4294901760, %v11630_v35  ;;  %v11709_v23 = vpack.c.bf16 %v2130_v1, %v2127_v10  ;;  %v11711_v63 = vsub.f32 %v113_v33, %v2130_v1  ;;  %v11724_v10 = vld [vmem:[#allocation5 + $0x2e8] sm:$0xff] }
  0xfc   :  { %9357 = vmatprep.subr.bf16.mxu0 %v11565_v59  ;;  %9351 = vmatpush3.bf16.msra.mxu1 %v11378_v61  ;;  %v15262_v48 = vand.u32 4294901760, %v11650_v8  ;;  %v2133_v14 = vand.u32 4294901760, %v114_v58  ;;  %v11722_v29 = vsub.f32 %v130_v47, %v2181_v54  ;;  %v2136_v61 = vand.u32 4294901760, %v115_v7 }
  0xfd   :  { %15259 = vst [vmem:[#allocation18_spill] sm:$0xff] %v11700_v42  ;;  %v2372_v3 = vsub.f32 %v11630_v35, %v15260_v21  ;;  %15261 = vst [vmem:[#allocation16_spill] sm:$0xff] %v11711_v63  ;;  %9353 = vmatprep.subr.bf16.mxu1 %v11401_v52  ;;  %v11720_v21 = vpack.c.bf16 %v2366_v0, %v2359_v37  ;;  %v11728_v33 = vpack.c.bf16 %v2254_v5, %v2247_v53  ;;  %v11735_v52 = vld [vmem:[#allocation5 + $0x260] sm:$0xff] }
  0xfe   :  { %1993 = vmatmul.mubr.f32.vlgmr.msra.gmra.mrb[10].mxu0 %v11328_v39  ;;  %v2379_v9 = vsub.f32 %v11650_v8, %v15262_v48  ;;  %15263 = vst [vmem:[#allocation23_spill] sm:$0xff] %v11722_v29  ;;  %v11730_v48 = vpack.c.bf16 %v2184_v16, %v2181_v54  ;;  %v11732_v56 = vsub.f32 %v131_v28, %v2184_v16  ;;  %v14799_v13 = vand.u32 4294901760, %v11692_v41 }
  0xff   :  { %9359 = vmatpush3.bf16.msra.mxu0 %v11573_v62  ;;  %2203 = vmatprep.mubr.f32.mxu0 %v2202_v44  ;;  %v2373_v0 = vand.u32 4294901760, %v2372_v3  ;;  %v15266_v47 = vand.u32 4294901760, %v11662_v22  ;;  %v15267_v1 = vand.u32 4294901760, %v11673_v18  ;;  %v14802_v53 = vand.u32 4294901760, %v11716_v46 }
 0x100   :  { %9361 = vmatprep.subr.bf16.mxu0 %v11575_v36  ;;  %15264 = vst [vmem:[#allocation15_spill] sm:$0xff] %v11730_v48  ;;  %15265 = vst [vmem:[#allocation26_spill] sm:$0xff] %v11732_v56  ;;  %9355 = vmatpush3.bf16.msra.mxu1 %v11413_v6  ;;  %v2380_v54 = vand.u32 4294901760, %v2379_v9  ;;  %v11745_v28 = vsub.f32 %v114_v58, %v2133_v14  ;;  %v11751_v44 = vpack.c.bf16 %v2136_v61, %v2133_v14  ;;  %v11758_v6 = vld [vmem:[#allocation5 + $0x268] sm:$0xff] }
 0x101   :  { %v2260_v37 = vsub.f32 %v11662_v22, %v15266_v47  ;;  %v2267_v36 = vsub.f32 %v11673_v18, %v15267_v1  ;;  %9389 = vmatprep.subr.bf16.mxu1 %v11656_v31  ;;  %v11753_v3 = vsub.f32 %v115_v7, %v2136_v61  ;;  %v15268_v1 = vand.u32 4294901760, %v11690_v50  ;;  %v11767_v7 = vld [vmem:[#allocation5 + $0x2f0] sm:$0xff]  ;;  %v11769_v61 = vld [vmem:[#allocation5 + $0x2f8] sm:$0xff] }
 0x102   :  { %v2393_v9 = vsub.f32 %v11692_v41, %v14799_v13  ;;  %v11776_v5 = vsub.f32 %v11716_v46, %v14802_v53  ;;  %v9400_v14 = vpack.c.bf16 %v2380_v54, %v2373_v0  ;;  %v15269_v31 = vand.u32 4294901760, %v11724_v10  ;;  %v11799_v53 = vld [vmem:[#allocation5 + $0x270] sm:$0xff]  ;;  %v11801_v13 = vld [vmem:[#allocation5 + $0x278] sm:$0xff] }
 0x103   :  { %9363 = vmatpush3.bf16.msra.mxu0 %v11592_v30  ;;  %v2386_v47 = vsub.f32 %v11690_v50, %v15268_v1  ;;  %2097 = vmatmul.mubr.f32.vlgmr.msra.gmra.mrb[10].mxu1 %v11328_v39  ;;  %v2261_v16 = vand.u32 4294901760, %v2260_v37  ;;  %v2268_v58 = vand.u32 4294901760, %v2267_v36  ;;  %v2142_v1 = vand.u32 4294901760, %v11758_v6 }
 0x104   :  { %9365 = vmatprep.subr.bf16.mxu0 %v11604_v49  ;;  %9391 = vmatpush3.bf16.msra.mxu1 %v11658_v27  ;;  %v11783_v49 = vsub.f32 %v11724_v10, %v15269_v31  ;;  %v15270_v39 = vsub.s32 4, %v15239_v25  ;;  %v15271_v27 = vand.u32 4294901760, %v11735_v52  ;;  %v15274_v25 = vand.u32 4294901760, %v11722_v29 }
 0x105   :  { %2439 = vmatprep.mubr.f32.mxu1 %v11599_v26  ;;  %9393 = vmatprep.subr.bf16.mxu1 %v11684_v20  ;;  %v2387_v37 = vand.u32 4294901760, %v2386_v47  ;;  %v15273_v47 = vand.u32 4294901760, %v11711_v63  ;;  %v9402_v31 = vpack.c.bf16 %v2268_v58, %v2261_v16  ;;  %v15275_v26 = vand.u32 4294901760, %v11732_v56 }
 0x106   :  { %v317_v36 = vrot.slane %v11568_v15, %v15270_v39  ;;  %v11795_v0 = vsub.f32 %v11735_v52, %v15271_v27  ;;  %v2394_v39 = vand.u32 4294901760, %v2393_v9  ;;  %v15272_v15 = vand.u32 4294901760, %v11700_v42 }
 0x107   :  { %9367 = vmatpush3.bf16.msra.mxu0 %v11616_v60  ;;  %v2281_v27 = vsub.f32 %v11711_v63, %v15273_v47  ;;  %v2400_v54 = vsub.f32 %v11722_v29, %v15274_v25  ;;  %v2407_v60 = vsub.f32 %v11732_v56, %v15275_v26  ;;  %v2145_v47 = vand.u32 4294901760, %v11799_v53 }
 0x108   :  { %9369 = vmatprep.subr.bf16.mxu0 %v11628_v51  ;;  %v2274_v20 = vsub.f32 %v11700_v42, %v15272_v15  ;;  %9395 = vmatpush3.bf16.msra.mxu1 %v11697_v17  ;;  %v11820_v15 = vsub.f32 %v11758_v6, %v2142_v1  ;;  %v2148_v63 = vand.u32 4294901760, %v11801_v13  ;;  %v11824_v42 = vand.u32 4294901760, %v317_v36 }
 0x109   :  { %9397 = vmatprep.subr.bf16.mxu1 %v11720_v21  ;;  %v15277_v25 = vand.u32 4294901760, %v11767_v7  ;;  %v15278_v17 = vand.u32 4294901760, %v11769_v61  ;;  %v14825_v6 = vand.u32 4294901760, %v11776_v5  ;;  %v9404_v9 = vpack.c.bf16 %v2394_v39, %v2387_v37 }
 0x10a   :  { %15276 = vst [vmem:[#allocation27_spill] sm:$0xff] %v11824_v42  ;;  %v2275_v51 = vand.u32 4294901760, %v2274_v20  ;;  %v2401_v21 = vand.u32 4294901760, %v2400_v54  ;;  %v2408_v56 = vand.u32 4294901760, %v2407_v60  ;;  %v15279_v29 = vand.u32 4294901760, %v11745_v28 }
 0x10b   :  { %9371 = vmatpush3.bf16.msra.mxu0 %v11660_v2  ;;  %v11831_v26 = vsub.f32 %v11767_v7, %v15277_v25  ;;  %v11836_v16 = vsub.f32 %v11769_v61, %v15278_v17  ;;  %v2282_v2 = vand.u32 4294901760, %v2281_v27  ;;  %v15280_v30 = vand.u32 4294901760, %v11753_v3 }
 0x10c   :  { %9373 = vmatprep.subr.bf16.mxu0 %v11686_v40  ;;  %v2288_v25 = vsub.f32 %v11745_v28, %v15279_v29  ;;  %9399 = vmatpush3.bf16.msra.mxu1 %v11728_v33  ;;  %v11850_v58 = vsub.f32 %v11799_v53, %v2145_v47  ;;  %v11853_v37 = vsub.f32 %v11801_v13, %v2148_v63  ;;  %v15281_v29 = vand.u32 4294901760, %v11783_v49 }
 0x10d   :  { %v2295_v17 = vsub.f32 %v11753_v3, %v15280_v30  ;;  %v11856_v60 = vsub.f32 %v317_v36, %v11824_v42  ;;  %9401 = vmatprep.subr.bf16.mxu1 %v9400_v14  ;;  %v2414_v30 = vsub.f32 %v11776_v5, %v14825_v6  ;;  %v15282_v36 = vand.u32 4294901760, %v11716_v46 }
 0x10e   :  { %v2421_v33 = vsub.f32 %v11783_v49, %v15281_v29  ;;  %v15283_v39 = vand.u32 4294901760, %v11724_v10  ;;  %v15284_v14 = vand.u32 4294901760, %v11735_v52  ;;  %v9406_v6 = vpack.c.bf16 %v2282_v2, %v2275_v51 }
 0x10f   :  { %9375 = vmatpush3.bf16.msra.mxu0 %v11709_v23  ;;  %v9408_v54 = vpack.c.bf16 %v2408_v56, %v2401_v21  ;;  %v2289_v41 = vand.u32 4294901760, %v2288_v25  ;;  %v2296_v29 = vand.u32 4294901760, %v2295_v17  ;;  %v15285_v53 = vand.u32 4294901760, %v11795_v0 }
 0x110   :  { %9377 = vmatprep.subr.bf16.mxu0 %v11730_v48  ;;  %v11873_v20 = vpack.c.bf16 %v15283_v39, %v15282_v36  ;;  %v11877_v27 = vpack.c.bf16 %v2142_v1, %v15284_v14  ;;  %9403 = vmatpush3.bf16.msra.mxu1 %v9402_v31  ;;  %v14830_v48 = vand.u32 4294901760, %v11856_v60  ;;  %v15286_v46 = vand.u32 4294901760, %v11820_v15 }
 0x111   :  { %v2302_v13 = vsub.f32 %v11795_v0, %v15285_v53  ;;  %v14829_v36 = vand.u32 4294901760, %v11850_v58  ;;  %v14828_v52 = vand.u32 4294901760, %v11853_v37  ;;  %9405 = vmatprep.subr.bf16.mxu1 %v9404_v9  ;;  %v2415_v51 = vand.u32 4294901760, %v2414_v30 }
 0x112   :  { %v2309_v10 = vsub.f32 %v11820_v15, %v15286_v46  ;;  %v2422_v2 = vand.u32 4294901760, %v2421_v33  ;;  %v15287_v56 = vand.u32 4294901760, %v11831_v26  ;;  %v15288_v31 = vand.u32 4294901760, %v11836_v16 }
 0x113   :  { %9379 = vmatpush3.bf16.msra.mxu0 %v11751_v44  ;;  %v15289_v25 = vand.u32 4294901760, %v11767_v7  ;;  %v15290_v17 = vand.u32 4294901760, %v11769_v61  ;;  %v9410_v39 = vpack.c.bf16 %v2296_v29, %v2289_v41  ;;  %v2303_v9 = vand.u32 4294901760, %v2302_v13 }
 0x114   :  { %v2428_v1 = vsub.f32 %v11831_v26, %v15287_v56  ;;  %v2435_v21 = vsub.f32 %v11836_v16, %v15288_v31  ;;  %9381 = vmatprep.subr.bf16.mxu0 %v11873_v20  ;;  %9407 = vmatpush3.bf16.msra.mxu1 %v9406_v6  ;;  %v2207_v30 = vsub.f32 %v11856_v60, %v14830_v48  ;;  %v2310_v33 = vand.u32 4294901760, %v2309_v10 }
 0x115   :  { %v11900_v53 = vpack.c.bf16 %v15290_v17, %v15289_v25  ;;  %v2316_v14 = vsub.f32 %v11850_v58, %v14829_v36  ;;  %v2323_v7 = vsub.f32 %v11853_v37, %v14828_v52  ;;  %9409 = vmatprep.subr.bf16.mxu1 %v9408_v54  ;;  %v11912_v61 = vpack.c.bf16 %v2148_v63, %v2145_v47 }
 0x116   :  { %v9412_v41 = vpack.c.bf16 %v2422_v2, %v2415_v51  ;;  %v2429_v6 = vand.u32 4294901760, %v2428_v1  ;;  %v2436_v13 = vand.u32 4294901760, %v2435_v21  ;;  %v9420_v29 = vpack.c.bf16 %v11522_v24, %v11508_v12  ;;  %v15292_v21 = vld [vmem:[#allocation22_spill] sm:$0xff] }
 0x117   :  { %15291 = vst [vmem:[#allocation28_spill] sm:$0xff] %v11900_v53  ;;  %9383 = vmatpush3.bf16.msra.mxu0 %v11877_v27  ;;  %v2208_v46 = vand.u32 4294901760, %v2207_v30  ;;  %v9414_v10 = vpack.c.bf16 %v2310_v33, %v2303_v9  ;;  %v2317_v56 = vand.u32 4294901760, %v2316_v14  ;;  %v2324_v31 = vand.u32 4294901760, %v2323_v7  ;;  %v15294_v9 = vld [vmem:[#allocation17_spill] sm:$0xff]  ;;  %v15296_v7 = vld [vmem:[#allocation12_spill] sm:$0xff] }
 0x118   :  { %9385 = vmatprep.subr.bf16.mxu0 %v11900_v53  ;;  %9411 = vmatpush3.bf16.msra.mxu1 %v9410_v39  ;;  %v9422_v63 = vpack.c.bf16 %v11548_v57, %v11546_v55  ;;  %v9416_v47 = vpack.c.bf16 %v2436_v13, %v2429_v6  ;;  %v9424_v54 = vpack.c.bf16 %v11579_v11, %v11577_v38  ;;  %v15293_v39 = vand.u32 4294901760, %v11626_v45  ;;  %v15295_v33 = vld [vmem:[#allocation13_spill] sm:$0xff]  ;;  %v15298_v6 = vld [vmem:[#allocation18_spill] sm:$0xff]  ;;  %v15299_v13 = vld [vmem:[#allocation16_spill] sm:$0xff] }
 0x119   :  { %9413 = vmatprep.subr.bf16.mxu1 %v9412_v41  ;;  %v9418_v51 = vpack.c.bf16 %v2324_v31, %v2317_v56  ;;  %v9426_v2 = vpack.c.bf16 %v11587_v4, %v11582_v32  ;;  %v9428_v1 = vpack.c.bf16 %v11606_v19, %v11594_v34  ;;  %v9430_v25 = vpack.c.bf16 %v15292_v21, %v11621_v43  ;;  %v15297_v41 = vld [vmem:[#allocation20_spill] sm:$0xff]  ;;  %v15302_v56 = vld [vmem:[#allocation21_spill] sm:$0xff] }
 0x11a   :  { %v9432_v17 = vpack.c.bf16 %v11650_v8, %v11630_v35  ;;  %v9434_v30 = vpack.c.bf16 %v11673_v18, %v11662_v22  ;;  %v9436_v14 = vpack.c.bf16 %v15295_v33, %v11690_v50  ;;  %v15303_v31 = vld [vmem:[#allocation24_spill] sm:$0xff]  ;;  %v15309_v36 = vand.u32 4294901760, %v11548_v57 }
 0x11b   :  { %9387 = vmatpush3.bf16.msra.mxu0 %v11912_v61  ;;  %v15312_v57 = vand.u32 4294901760, %v11582_v32  ;;  %v15318_v32 = vand.u32 4294901760, %v15292_v21 }
 0x11c   :  { %9421 = vmatprep.subr.bf16.mxu0 %v9420_v29  ;;  %9415 = vmatpush3.bf16.msra.mxu1 %v9414_v10  ;;  %v9438_v29 = vpack.c.bf16 %v15299_v13, %v15298_v6 }
 0x11d   :  { %9417 = vmatprep.subr.bf16.mxu1 %v9416_v47  ;;  %v9444_v47 = vpack.c.bf16 %v11783_v49, %v11776_v5 }
 0x11e   :  { %2209 = vmatmul.mubr.f32.vlgmr.msra.gmra.mrb[12].mxu0 %v2208_v46  ;;  %v15301_v46 = vld [vmem:[#allocation26_spill] sm:$0xff] }
 0x11f   :  { %9423 = vmatpush3.bf16.msra.mxu0 %v9422_v63  ;;  %2576 = vmatprep.mubr.f32.mxu0 %v11626_v45  ;;  %v15300_v45 = vld [vmem:[#allocation23_spill] sm:$0xff]  ;;  %v9442_v63 = vpack.c.bf16 %v11753_v3, %v11745_v28 }
 0x120   :  { %9425 = vmatprep.subr.bf16.mxu0 %v9424_v54  ;;  %9419 = vmatpush3.bf16.msra.mxu1 %v9418_v51  ;;  %v9440_v10 = vpack.c.bf16 %v15301_v46, %v15300_v45  ;;  %v15304_v51 = vld [vmem:[#allocation25_spill] sm:$0xff] }
 0x121   :  { %9453 = vmatprep.subr.bf16.mxu1 %v11565_v59 }
 0x123   :  { %9427 = vmatpush3.bf16.msra.mxu0 %v9426_v2  ;;  %2441 = vmatmul.mubr.f32.vlgmr.msra.gmra.mrb[12].mxu1 %v11824_v42 }
 0x124   :  { %9429 = vmatprep.subr.bf16.mxu0 %v9428_v1  ;;  %9455 = vmatpush3.bf16.msra.mxu1 %v11573_v62  ;;  %v9446_v1 = vpack.c.bf16 %v11820_v15, %v11795_v0 }
 0x125   :  { %2683 = vmatprep.mubr.f32.mxu1 %v15293_v39  ;;  %9457 = vmatprep.subr.bf16.mxu1 %v15294_v9  ;;  %v15305_v39 = vld [vmem:[#allocation15_spill] sm:$0xff] }
 0x127   :  { %9431 = vmatpush3.bf16.msra.mxu0 %v9430_v25 }
 0x128   :  { %9433 = vmatprep.subr.bf16.mxu0 %v9432_v17  ;;  %9459 = vmatpush3.bf16.msra.mxu1 %v15296_v7  ;;  %v9448_v17 = vpack.c.bf16 %v11836_v16, %v11831_v26 }
 0x129   :  { %9461 = vmatprep.subr.bf16.mxu1 %v15297_v41 }
 0x12b   :  { %9435 = vmatpush3.bf16.msra.mxu0 %v9434_v30  ;;  %v9450_v30 = vpack.c.bf16 %v11853_v37, %v11850_v58 }
 0x12c   :  { %9437 = vmatprep.subr.bf16.mxu0 %v9436_v14  ;;  %9463 = vmatpush3.bf16.msra.mxu1 %v15302_v56 }
 0x12d   :  { %9465 = vmatprep.subr.bf16.mxu1 %v15303_v31 }
 0x12f   :  { %9439 = vmatpush3.bf16.msra.mxu0 %v9438_v29  ;;  %v15306_v29 = vand.u32 4294901760, %v11508_v12 }
 0x130   :  { %9441 = vmatprep.subr.bf16.mxu0 %v9440_v10  ;;  %9467 = vmatpush3.bf16.msra.mxu1 %v15304_v51  ;;  %v15307_v10 = vand.u32 4294901760, %v11522_v24  ;;  %v15310_v24 = vand.u32 4294901760, %v11577_v38 }
 0x131   :  { %v7324_v54 = vpop.f32.mrb[0].mxu0  ;;  %9469 = vmatprep.subr.bf16.mxu1 %v11686_v40 }
 0x132   :  { %v7325_v2 = vpop.f32.mrb[1].mxu0 }
 0x133   :  { %9443 = vmatpush3.bf16.msra.mxu0 %v9442_v63  ;;  %v7326_v25 = vadd.f32 %v7325_v2, %v7324_v54  ;;  %v9484_v63 = vpack.c.bf16 %v15307_v10, %v15306_v29  ;;  %v152_v54 = vld [vmem:[#allocation5 + $0x380] sm:$0xff]  ;;  %v15311_v29 = vand.u32 4294901760, %v11579_v11 }
 0x134   :  { %9445 = vmatprep.subr.bf16.mxu0 %v9444_v47  ;;  %9471 = vmatpush3.bf16.msra.mxu1 %v11709_v23  ;;  %v153_v47 = vld [vmem:[#allocation5 + $0x388] sm:$0xff]  ;;  %v136_v10 = vld [vmem:[#allocation5 + $0x300] sm:$0xff] }
 0x135   :  { %9473 = vmatprep.subr.bf16.mxu1 %v15305_v39  ;;  %v3016_v42 = vand.u32 4294901760, %v153_v47  ;;  %v2965_v11 = vand.u32 4294901760, %v136_v10 }
 0x136   :  { %v7359_v14 = vpop.f32.mrb[0].mxu1 }
 0x137   :  { %9447 = vmatpush3.bf16.msra.mxu0 %v9446_v1  ;;  %v7360_v2 = vpop.f32.mrb[1].mxu1  ;;  %v15308_v1 = vand.u32 4294901760, %v11546_v55  ;;  %v154_v55 = vld [vmem:[#allocation5 + $0x390] sm:$0xff]  ;;  %v11988_v38 = vsub.f32 %v153_v47, %v3016_v42  ;;  %v15320_v47 = vand.u32 4294901760, %v11650_v8 }
 0x138   :  { %9449 = vmatprep.subr.bf16.mxu0 %v9448_v17  ;;  %v7361_v52 = vadd.f32 %v7360_v2, %v7359_v14  ;;  %9475 = vmatpush3.bf16.msra.mxu1 %v11751_v44  ;;  %v3013_v17 = vand.u32 4294901760, %v152_v54  ;;  %v9488_v14 = vpack.c.bf16 %v15311_v29, %v15310_v24  ;;  %v15314_v2 = vand.u32 4294901760, %v11594_v34 }
 0x139   :  { %9477 = vmatprep.subr.bf16.mxu1 %v11873_v20  ;;  %v9486_v48 = vpack.c.bf16 %v15309_v36, %v15308_v1  ;;  %v15313_v36 = vand.u32 4294901760, %v11587_v4  ;;  %v15315_v1 = vand.u32 4294901760, %v11606_v19  ;;  %v15317_v29 = vand.u32 4294901760, %v11621_v43 }
 0x13a   :  { %v11973_v12 = vadd.f32 %v7361_v52, %v7326_v25  ;;  %v11986_v25 = vsub.f32 %v152_v54, %v3013_v17  ;;  %v15319_v54 = vand.u32 4294901760, %v11630_v35  ;;  %v15321_v34 = vand.u32 4294901760, %v11662_v22 }
 0x13b   :  { %9451 = vmatpush3.bf16.msra.mxu0 %v9450_v30  ;;  %v137_v30 = vld [vmem:[#allocation5 + $0x308] sm:$0xff]  ;;  %v9490_v52 = vpack.c.bf16 %v15313_v36, %v15312_v57  ;;  %v9492_v24 = vpack.c.bf16 %v15315_v1, %v15314_v2  ;;  %v9494_v4 = vpack.c.bf16 %v15318_v32, %v15317_v29  ;;  %v15322_v19 = vand.u32 4294901760, %v11673_v18 }
 0x13c   :  { %9485 = vmatprep.subr.bf16.mxu0 %v9484_v63  ;;  %9479 = vmatpush3.bf16.msra.mxu1 %v11877_v27  ;;  %v155_v63 = vld [vmem:[#allocation5 + $0x398] sm:$0xff]  ;;  %v9496_v57 = vpack.c.bf16 %v15320_v47, %v15319_v54  ;;  %v2968_v36 = vand.u32 4294901760, %v137_v30  ;;  %v15323_v2 = vand.u32 4294901760, %v11690_v50  ;;  %v15324_v43 = vand.u32 4294901760, %v15295_v33  ;;  %v138_v33 = vld [vmem:[#allocation5 + $0x310] sm:$0xff] }
 0x13d   :  { %9481 = vmatprep.subr.bf16.mxu1 %v11900_v53  ;;  %v3019_v53 = vand.u32 4294901760, %v154_v55  ;;  %v15325_v1 = vand.u32 4294901760, %v15298_v6  ;;  %v15326_v35 = vand.u32 4294901760, %v15299_v13  ;;  %v3022_v29 = vand.u32 4294901760, %v155_v63  ;;  %v139_v54 = vld [vmem:[#allocation5 + $0x318] sm:$0xff] }
 0x13e   :  { %2579 = vmatmul.mubr.f32.vlgmr.msra.gmra.mrb[14].mxu0 %v11856_v60  ;;  %v9500_v21 = vpack.c.bf16 %v15324_v43, %v15323_v2  ;;  %v15327_v22 = vand.u32 4294901760, %v15300_v45  ;;  %v15328_v18 = vand.u32 4294901760, %v15301_v46  ;;  %v12025_v50 = vsub.f32 %v136_v10, %v2965_v11  ;;  %v15335_v43 = vld [vmem:[#allocation11_spill] sm:$0xff] }
 0x13f   :  { %9487 = vmatpush3.bf16.msra.mxu0 %v9486_v48  ;;  %v15316_v48 = vld [vmem:[#allocation19_spill] sm:$0xff]  ;;  %v12016_v8 = vpack.c.bf16 %v15326_v35, %v15325_v1  ;;  %v14842_v6 = vand.u32 4294901760, %v11986_v25  ;;  %v14839_v13 = vand.u32 4294901760, %v11988_v38  ;;  %v15329_v47 = vand.u32 4294901760, %v11745_v28 }
 0x140   :  { %9489 = vmatprep.subr.bf16.mxu0 %v9488_v14  ;;  %2853 = vmatprep.mubr.f32.mxu0 %v15316_v48  ;;  %v9498_v14 = vpack.c.bf16 %v15322_v19, %v15321_v34  ;;  %v12023_v32 = vpack.c.bf16 %v15328_v18, %v15327_v22  ;;  %v15331_v45 = vand.u32 4294901760, %v11776_v5  ;;  %v15332_v46 = vand.u32 4294901760, %v11783_v49  ;;  %v156_v18 = vld [vmem:[#allocation5 + $0x3a0] sm:$0xff] }
 0x141   :  { %9483 = vmatpush3.bf16.msra.mxu1 %v11912_v61  ;;  %v15333_v10 = vand.u32 4294901760, %v11795_v0  ;;  %v15334_v19 = vand.u32 4294901760, %v11820_v15  ;;  %v15336_v28 = vand.u32 4294901760, %v11856_v60  ;;  %v15338_v1 = vand.u32 4294901760, %v11836_v16 }
 0x142   :  { %9517 = vmatprep.subr.bf16.mxu1 %v11565_v59  ;;  %v12039_v34 = vpack.c.bf16 %v15332_v46, %v15331_v45  ;;  %v15339_v49 = vand.u32 4294901760, %v11850_v58  ;;  %v15340_v35 = vand.u32 4294901760, %v11853_v37  ;;  %v12062_v15 = vsub.f32 %v137_v30, %v2968_v36  ;;  %v140_v58 = vld [vmem:[#allocation5 + $0x320] sm:$0xff]  ;;  %v141_v37 = vld [vmem:[#allocation5 + $0x328] sm:$0xff] }
 0x143   :  { %9491 = vmatpush3.bf16.msra.mxu0 %v9490_v52  ;;  %v15330_v52 = vand.u32 4294901760, %v11753_v3  ;;  %v12045_v2 = vpack.c.bf16 %v15334_v19, %v15333_v10  ;;  %v15337_v3 = vand.u32 4294901760, %v11831_v26  ;;  %v12064_v22 = vsub.f32 %v154_v55, %v3019_v53  ;;  %v159_v10 = vld [vmem:[#allocation5 + $0x3b8] sm:$0xff] }
 0x144   :  { %9493 = vmatprep.subr.bf16.mxu0 %v9492_v24  ;;  %v14834_v24 = vsub.s32 7, %v15335_v43  ;;  %2687 = vmatmul.mubr.f32.vlgmr.msra.gmra.mrb[14].mxu1 %v15336_v28  ;;  %v12060_v0 = vpack.c.bf16 %v15340_v35, %v15339_v49  ;;  %v12067_v60 = vpack.c.bf16 %v3016_v42, %v3013_v17  ;;  %v12069_v26 = vsub.f32 %v155_v63, %v3022_v29 }
 0x145   :  { %v12033_v59 = vpack.c.bf16 %v15330_v52, %v15329_v47  ;;  %v12054_v5 = vpack.c.bf16 %v15338_v1, %v15337_v3  ;;  %v157_v47 = vld [vmem:[#allocation5 + $0x3a8] sm:$0xff]  ;;  %9519 = vmatpush3.bf16.msra.mxu1 %v11573_v62  ;;  %v2971_v16 = vand.u32 4294901760, %v138_v33  ;;  %v2974_v52 = vand.u32 4294901760, %v139_v54  ;;  %2957 = vmatprep.mubr.f32.mxu1 %v15316_v48 }
 0x146   :  { %9521 = vmatprep.subr.bf16.mxu1 %v15294_v9  ;;  %v12073_v30 = vpack.c.bf16 %v2968_v36, %v2965_v11  ;;  %v3192_v55 = vsub.f32 %v11986_v25, %v14842_v6  ;;  %v3199_v62 = vsub.f32 %v11988_v38, %v14839_v13  ;;  %v14838_v42 = vand.u32 4294901760, %v12025_v50  ;;  %v15342_v9 = vld [vmem:[#allocation14_spill] sm:$0xff] }
 0x147   :  { %9495 = vmatpush3.bf16.msra.mxu0 %v9494_v4  ;;  %v12082_v17 = vpack.c.bf16 %v3022_v29, %v3019_v53  ;;  %v3025_v63 = vand.u32 4294901760, %v156_v18  ;;  %v3028_v48 = vand.u32 4294901760, %v157_v47  ;;  %v158_v4 = vld [vmem:[#allocation5 + $0x3b0] sm:$0xff]  ;;  %v329_v11 = vrot.slane %v15342_v9, %v14834_v24 }
 0x148   :  { %15341 = vst [vmem:[#allocation22_spill] sm:$0xff] %v12073_v30  ;;  %9497 = vmatprep.subr.bf16.mxu0 %v9496_v57  ;;  %v2977_v36 = vand.u32 4294901760, %v140_v58  ;;  %v2980_v45 = vand.u32 4294901760, %v141_v37  ;;  %v14837_v46 = vand.u32 4294901760, %v12062_v15  ;;  %v14835_v19 = vand.u32 4294901760, %v12064_v22 }
 0x149   :  { %9523 = vmatpush3.bf16.msra.mxu1 %v15296_v7  ;;  %v12090_v28 = vpack.c.bf16 %v2974_v52, %v2971_v16  ;;  %v12092_v53 = vsub.f32 %v138_v33, %v2971_v16  ;;  %v12094_v57 = vsub.f32 %v139_v54, %v2974_v52  ;;  %v14836_v29 = vand.u32 4294901760, %v12069_v26 }
 0x14a   :  { %9525 = vmatprep.subr.bf16.mxu1 %v15297_v41  ;;  %v3193_v3 = vand.u32 4294901760, %v3192_v55  ;;  %v3200_v1 = vand.u32 4294901760, %v3199_v62  ;;  %v3080_v49 = vsub.f32 %v12025_v50, %v14838_v42  ;;  %v3031_v35 = vand.u32 4294901760, %v158_v4  ;;  %v143_v55 = vld [vmem:[#allocation5 + $0x338] sm:$0xff]  ;;  %v161_v42 = vld [vmem:[#allocation5 + $0x3c8] sm:$0xff] }
 0x14b   :  { %9499 = vmatpush3.bf16.msra.mxu0 %v9498_v14  ;;  %v12101_v7 = vpack.c.bf16 %v3028_v48, %v3025_v63  ;;  %v12103_v9 = vsub.f32 %v156_v18, %v3025_v63  ;;  %v3034_v33 = vand.u32 4294901760, %v159_v10  ;;  %v12105_v54 = vand.u32 4294901760, %v329_v11 }
 0x14c   :  { %9501 = vmatprep.subr.bf16.mxu0 %v9500_v21  ;;  %v12107_v16 = vsub.f32 %v157_v47, %v3028_v48  ;;  %v12109_v14 = vpack.c.bf16 %v2980_v45, %v2977_v36  ;;  %v3087_v41 = vsub.f32 %v12062_v15, %v14837_v46  ;;  %v3206_v52 = vsub.f32 %v12064_v22, %v14835_v19  ;;  %v142_v21 = vld [vmem:[#allocation5 + $0x330] sm:$0xff]  ;;  %v160_v46 = vld [vmem:[#allocation5 + $0x3c0] sm:$0xff] }
 0x14d   :  { %15343 = vst [vmem:[#allocation17_spill] sm:$0xff] %v12105_v54  ;;  %9527 = vmatpush3.bf16.msra.mxu1 %v15302_v56  ;;  %v12118_v18 = vsub.f32 %v140_v58, %v2977_v36  ;;  %v3213_v47 = vsub.f32 %v12069_v26, %v14836_v29  ;;  %v14841_v62 = vand.u32 4294901760, %v12092_v53  ;;  %v14840_v63 = vand.u32 4294901760, %v12094_v57 }
 0x14e   :  { %15344 = vst [vmem:[#allocation13_spill] sm:$0xff] %v12109_v14  ;;  %9529 = vmatprep.subr.bf16.mxu1 %v15303_v31  ;;  %v12127_v48 = vpack.c.bf16 %v3200_v1, %v3193_v3  ;;  %v12129_v24 = vsub.f32 %v141_v37, %v2980_v45  ;;  %v3081_v19 = vand.u32 4294901760, %v3080_v49  ;;  %v12131_v56 = vsub.f32 %v158_v4, %v3031_v35 }
 0x14f   :  { %9503 = vmatpush3.bf16.msra.mxu0 %v12016_v8  ;;  %v12134_v58 = vpack.c.bf16 %v3034_v33, %v3031_v35  ;;  %v2983_v36 = vand.u32 4294901760, %v142_v21  ;;  %v2986_v29 = vand.u32 4294901760, %v143_v55  ;;  %v12137_v13 = vsub.f32 %v329_v11, %v12105_v54 }
 0x150   :  { %15345 = vst [vmem:[#allocation12_spill] sm:$0xff] %v12129_v24  ;;  %9505 = vmatprep.subr.bf16.mxu0 %v12023_v32  ;;  %v3088_v31 = vand.u32 4294901760, %v3087_v41  ;;  %v12139_v3 = vsub.f32 %v159_v10, %v3034_v33  ;;  %v3207_v37 = vand.u32 4294901760, %v3206_v52  ;;  %v14846_v45 = vand.u32 4294901760, %v12103_v9 }
 0x151   :  { %15346 = vst [vmem:[#allocation20_spill] sm:$0xff] %v12134_v58  ;;  %v7394_v8 = vpop.f32.mrb[2].mxu0  ;;  %9531 = vmatpush3.bf16.msra.mxu1 %v15304_v51  ;;  %v3214_v32 = vand.u32 4294901760, %v3213_v47  ;;  %v3094_v1 = vsub.f32 %v12092_v53, %v14841_v62  ;;  %v3101_v11 = vsub.f32 %v12094_v57, %v14840_v63  ;;  %v14844_v49 = vand.u32 4294901760, %v12107_v16  ;;  %v144_v62 = vld [vmem:[#allocation5 + $0x340] sm:$0xff] }
 0x152   :  { %v7395_v4 = vpop.f32.mrb[3].mxu0  ;;  %9533 = vmatprep.subr.bf16.mxu1 %v11686_v40  ;;  %v3037_v10 = vand.u32 4294901760, %v160_v46  ;;  %v3040_v33 = vand.u32 4294901760, %v161_v42  ;;  %v14843_v51 = vand.u32 4294901760, %v12118_v18  ;;  %v12154_v41 = vpack.c.bf16 %v2986_v29, %v2983_v36 }
 0x153   :  { %v7396_v35 = vadd.f32 %v7395_v4, %v7394_v8  ;;  %9507 = vmatpush3.bf16.msra.mxu0 %v12033_v59  ;;  %v12156_v52 = vsub.f32 %v142_v21, %v2983_v36  ;;  %v14845_v47 = vand.u32 4294901760, %v12129_v24  ;;  %v14847_v63 = vand.u32 4294901760, %v12137_v13 }
 0x154   :  { %9509 = vmatprep.subr.bf16.mxu0 %v12039_v34  ;;  %15347 = vst [vmem:[#allocation18_spill] sm:$0xff] %v12154_v41  ;;  %v12161_v4 = vpack.c.bf16 %v3088_v31, %v3081_v19  ;;  %v12163_v59 = vsub.f32 %v143_v55, %v2986_v29  ;;  %v3220_v40 = vsub.f32 %v12103_v9, %v14846_v45  ;;  %v3095_v21 = vand.u32 4294901760, %v3094_v1  ;;  %v162_v55 = vld [vmem:[#allocation5 + $0x3d0] sm:$0xff] }
 0x155   :  { %15348 = vst [vmem:[#allocation16_spill] sm:$0xff] %v12156_v52  ;;  %v857_v8 = vadd.f32 %v7396_v35, %v11973_v12  ;;  %9535 = vmatpush3.bf16.msra.mxu1 %v11709_v23  ;;  %v12169_v34 = vpack.c.bf16 %v3214_v32, %v3207_v37  ;;  %v3102_v36 = vand.u32 4294901760, %v3101_v11  ;;  %v3227_v6 = vsub.f32 %v12107_v16, %v14844_v49  ;;  %v145_v12 = vld [vmem:[#allocation5 + $0x348] sm:$0xff] }
 0x156   :  { %9537 = vmatprep.subr.bf16.mxu1 %v15305_v39  ;;  %v12176_v19 = vpack.c.bf16 %v3040_v33, %v3037_v10  ;;  %v12178_v29 = vsub.f32 %v160_v46, %v3037_v10  ;;  %v3108_v23 = vsub.f32 %v12118_v18, %v14843_v51  ;;  %v7429_v31 = vpop.f32.mrb[2].mxu1  ;;  %v12184_v37 = vsub.f32 %v161_v42, %v3040_v33  ;;  %v163_v39 = vld [vmem:[#allocation5 + $0x3d8] sm:$0xff]  ;;  %v15354_v10 = vld [vmem:[#allocation27_spill] sm:$0xff] }
 0x157   :  { %9511 = vmatpush3.bf16.msra.mxu0 %v12045_v2  ;;  %v2989_v32 = vand.u32 4294901760, %v144_v62  ;;  %v3115_v2 = vsub.f32 %v12129_v24, %v14845_v47  ;;  %v3063_v46 = vsub.f32 %v12137_v13, %v14847_v63  ;;  %v7430_v1 = vpop.f32.mrb[3].mxu1  ;;  %v3221_v11 = vand.u32 4294901760, %v3220_v40  ;;  %v147_v40 = vld [vmem:[#allocation5 + $0x358] sm:$0xff] }
 0x158   :  { %15349 = vst [vmem:[#allocation23_spill] sm:$0xff] %v12176_v19  ;;  %9513 = vmatprep.subr.bf16.mxu0 %v12054_v5  ;;  %v2992_v35 = vand.u32 4294901760, %v145_v12  ;;  %v146_v5 = vld [vmem:[#allocation5 + $0x350] sm:$0xff]  ;;  %v7431_v42 = vadd.f32 %v7430_v1, %v7429_v31  ;;  %v12195_v33 = vpack.c.bf16 %v3102_v36, %v3095_v21  ;;  %v3228_v49 = vand.u32 4294901760, %v3227_v6 }
 0x159   :  { %9539 = vmatpush3.bf16.msra.mxu1 %v11751_v44  ;;  %v3043_v47 = vand.u32 4294901760, %v162_v55  ;;  %v3109_v45 = vand.u32 4294901760, %v3108_v23  ;;  %v3046_v63 = vand.u32 4294901760, %v163_v39  ;;  %v14852_v24 = vand.u32 4294901760, %v12156_v52 }
 0x15a   :  { %9541 = vmatprep.subr.bf16.mxu1 %v11873_v20  ;;  %v12201_v51 = vadd.f32 %v7431_v42, %v857_v8  ;;  %v3116_v44 = vand.u32 4294901760, %v3115_v2  ;;  %v2995_v21 = vand.u32 4294901760, %v146_v5  ;;  %v3064_v36 = vand.u32 4294901760, %v3063_v46  ;;  %v15357_v42 = vld [vmem:[#allocation28_spill] sm:$0xff] }
 0x15b   :  { %9515 = vmatpush3.bf16.msra.mxu0 %v12060_v0  ;;  %v12204_v6 = vpack.c.bf16 %v2992_v35, %v2989_v32  ;;  %v12206_v31 = vsub.f32 %v144_v62, %v2989_v32  ;;  %v15352_v20 = vand.u32 4294901760, %v12131_v56  ;;  %v15353_v23 = vand.u32 4294901760, %v12139_v3  ;;  %v12222_v32 = vld [vmem:[#allocation5 + $0x3e0] sm:$0xff] }
 0x15c   :  { %9549 = vmatprep.subr.bf16.mxu0 %v12067_v60  ;;  %v12216_v8 = vpack.c.bf16 %v3228_v49, %v3221_v11  ;;  %v12218_v2 = vsub.f32 %v145_v12, %v2992_v35  ;;  %v12220_v46 = vsub.f32 %v162_v55, %v3043_v47  ;;  %v2998_v62 = vand.u32 4294901760, %v147_v40  ;;  %v12234_v12 = vld [vmem:[#allocation5 + $0x3e8] sm:$0xff] }
 0x15d   :  { %15350 = vst [vmem:[#allocation26_spill] sm:$0xff] %v12204_v6  ;;  %15351 = vst [vmem:[#allocation21_spill] sm:$0xff] %v12206_v31  ;;  %v3234_v0 = vsub.f32 %v12131_v56, %v15352_v20  ;;  %v3241_v1 = vsub.f32 %v12139_v3, %v15353_v23  ;;  %9543 = vmatpush3.bf16.msra.mxu1 %v11877_v27  ;;  %v12226_v20 = vpack.c.bf16 %v3046_v63, %v3043_v47  ;;  %v12243_v47 = vld [vmem:[#allocation5 + $0x360] sm:$0xff] }
 0x15e   :  { %2855 = vmatmul.mubr.f32.vlgmr.msra.gmra.mrb[16].mxu0 %v15354_v10  ;;  %15355 = vst [vmem:[#allocation24_spill] sm:$0xff] %v12218_v2  ;;  %15356 = vst [vmem:[#allocation25_spill] sm:$0xff] %v12220_v46  ;;  %9545 = vmatprep.subr.bf16.mxu1 %v15357_v42  ;;  %v3122_v23 = vsub.f32 %v12156_v52, %v14852_v24  ;;  %v15359_v27 = vand.u32 4294901760, %v12163_v59  ;;  %v12237_v55 = vpack.c.bf16 %v3116_v44, %v3109_v45  ;;  %v12265_v45 = vld [vmem:[#allocation5 + $0x3f8] sm:$0xff] }
 0x15f   :  { %9551 = vmatpush3.bf16.msra.mxu0 %v12073_v30  ;;  %15358 = vst [vmem:[#allocation15_spill] sm:$0xff] %v12226_v20  ;;  %v12239_v11 = vsub.f32 %v163_v39, %v3046_v63  ;;  %v12241_v35 = vsub.f32 %v146_v5, %v2995_v21  ;;  %3065 = vmatprep.mubr.f32.mxu0 %v3064_v36  ;;  %v3235_v42 = vand.u32 4294901760, %v3234_v0  ;;  %v3242_v30 = vand.u32 4294901760, %v3241_v1  ;;  %v12252_v39 = vld [vmem:[#allocation5 + $0x368] sm:$0xff]  ;;  %v12263_v63 = vld [vmem:[#allocation5 + $0x3f0] sm:$0xff] }
 0x160   :  { %v3129_v49 = vsub.f32 %v12163_v59, %v15359_v27  ;;  %9553 = vmatprep.subr.bf16.mxu0 %v12082_v17  ;;  %v14855_v24 = vand.u32 4294901760, %v12222_v32  ;;  %v14856_v52 = vand.u32 4294901760, %v12178_v29  ;;  %v12248_v27 = vpack.c.bf16 %v2998_v62, %v2995_v21  ;;  %v12300_v21 = vld [vmem:[#allocation5 + $0x370] sm:$0xff] }
 0x161   :  { %15360 = vst [vmem:[#allocation19_spill] sm:$0xff] %v12239_v11  ;;  %9547 = vmatpush3.bf16.msra.mxu1 %v11912_v61  ;;  %v12257_v44 = vsub.f32 %v147_v40, %v2998_v62  ;;  %v3123_v36 = vand.u32 4294901760, %v3122_v23  ;;  %v14858_v61 = vand.u32 4294901760, %v12243_v47  ;;  %v9592_v40 = vpack.c.bf16 %v3242_v30, %v3235_v42  ;;  %v10516_v42 = vld [vmem:[#allocation2] sm:$0xff] }
 0x162   :  { %9581 = vmatprep.subr.bf16.mxu1 %v12127_v48  ;;  %v3130_v0 = vand.u32 4294901760, %v3129_v49  ;;  %v12273_v62 = vsub.f32 %v12222_v32, %v14855_v24  ;;  %v3248_v23 = vsub.f32 %v12178_v29, %v14856_v52  ;;  %v3004_v49 = vand.u32 4294901760, %v12252_v39 }
 0x163   :  { %9555 = vmatpush3.bf16.msra.mxu0 %v12090_v28  ;;  %15361 = vst [vmem:[#allocation14_spill] sm:$0xff] %v12257_v44  ;;  %v15362_v5 = vand.u32 4294901760, %v12234_v12  ;;  %v15364_v30 = vand.u32 4294901760, %v12184_v37  ;;  %v15365_v24 = vsub.s32 6, %v15335_v43  ;;  %v12302_v43 = vld [vmem:[#allocation5 + $0x378] sm:$0xff] }
 0x164   :  { %9557 = vmatprep.subr.bf16.mxu0 %v12101_v7  ;;  %2959 = vmatmul.mubr.f32.vlgmr.msra.gmra.mrb[16].mxu1 %v15354_v10 }
 0x165   :  { %9583 = vmatpush3.bf16.msra.mxu1 %v12161_v4  ;;  %v12283_v48 = vsub.f32 %v12234_v12, %v15362_v5  ;;  %v3255_v10 = vsub.f32 %v12184_v37, %v15364_v30  ;;  %v325_v1 = vrot.slane %v10516_v42, %v15365_v24  ;;  %3301 = vmatprep.mubr.f32.mxu1 %v12105_v54  ;;  %v15366_v24 = vand.u32 4294901760, %v12206_v31 }
 0x166   :  { %9585 = vmatprep.subr.bf16.mxu1 %v12169_v34  ;;  %v9594_v4 = vpack.c.bf16 %v3130_v0, %v3123_v36  ;;  %v12296_v5 = vsub.f32 %v12243_v47, %v14858_v61  ;;  %v15367_v36 = vand.u32 4294901760, %v12218_v2  ;;  %v15368_v42 = vand.u32 4294901760, %v12220_v46 }
 0x167   :  { %15363 = vst [vmem:[#allocation27_spill] sm:$0xff] %v12283_v48  ;;  %9559 = vmatpush3.bf16.msra.mxu0 %v12109_v14  ;;  %v3136_v34 = vsub.f32 %v12206_v31, %v15366_v24  ;;  %v15369_v30 = vand.u32 4294901760, %v12239_v11  ;;  %v3249_v54 = vand.u32 4294901760, %v3248_v23  ;;  %v12318_v14 = vsub.f32 %v12252_v39, %v3004_v49 }
 0x168   :  { %9561 = vmatprep.subr.bf16.mxu0 %v12134_v58  ;;  %v3143_v0 = vsub.f32 %v12218_v2, %v15367_v36  ;;  %v3262_v61 = vsub.f32 %v12220_v46, %v15368_v42  ;;  %v12325_v31 = vand.u32 4294901760, %v325_v1  ;;  %v3256_v39 = vand.u32 4294901760, %v3255_v10 }
 0x169   :  { %v3269_v52 = vsub.f32 %v12239_v11, %v15369_v30  ;;  %9587 = vmatpush3.bf16.msra.mxu1 %v12195_v33  ;;  %v15371_v23 = vand.u32 4294901760, %v12263_v63  ;;  %v15372_v33 = vand.u32 4294901760, %v12265_v45  ;;  %v3137_v42 = vand.u32 4294901760, %v3136_v34 }
 0x16a   :  { %15370 = vst [vmem:[#allocation28_spill] sm:$0xff] %v12325_v31  ;;  %9589 = vmatprep.subr.bf16.mxu1 %v12216_v8  ;;  %v3144_v24 = vand.u32 4294901760, %v3143_v0  ;;  %v3263_v58 = vand.u32 4294901760, %v3262_v61  ;;  %v15373_v8 = vand.u32 4294901760, %v12241_v35  ;;  %v15375_v2 = vand.u32 4294901760, %v12300_v21 }
 0x16b   :  { %9563 = vmatpush3.bf16.msra.mxu0 %v12154_v41  ;;  %v12333_v30 = vsub.f32 %v12263_v63, %v15371_v23  ;;  %v12338_v36 = vsub.f32 %v12265_v45, %v15372_v33  ;;  %v3270_v41 = vand.u32 4294901760, %v3269_v52  ;;  %v15374_v23 = vand.u32 4294901760, %v12257_v44 }
 0x16c   :  { %9565 = vmatprep.subr.bf16.mxu0 %v12176_v19  ;;  %v3150_v10 = vsub.f32 %v12241_v35, %v15373_v8  ;;  %v12354_v34 = vsub.f32 %v12300_v21, %v15375_v2  ;;  %v15376_v52 = vand.u32 4294901760, %v12302_v43  ;;  %v12362_v0 = vsub.f32 %v325_v1, %v12325_v31 }
 0x16d   :  { %v3157_v11 = vsub.f32 %v12257_v44, %v15374_v23  ;;  %9591 = vmatpush3.bf16.msra.mxu1 %v12237_v55  ;;  %v15377_v8 = vand.u32 4294901760, %v12273_v62  ;;  %v9596_v55 = vpack.c.bf16 %v3256_v39, %v3249_v54  ;;  %v15378_v33 = vand.u32 4294901760, %v12283_v48 }
 0x16e   :  { %v12359_v61 = vsub.f32 %v12302_v43, %v15376_v52  ;;  %9593 = vmatprep.subr.bf16.mxu1 %v9592_v40  ;;  %v15379_v1 = vand.u32 4294901760, %v12222_v32  ;;  %v15380_v19 = vand.u32 4294901760, %v12234_v12  ;;  %v9598_v54 = vpack.c.bf16 %v3144_v24, %v3137_v42 }
 0x16f   :  { %v3276_v23 = vsub.f32 %v12273_v62, %v15377_v8  ;;  %9567 = vmatpush3.bf16.msra.mxu0 %v12204_v6  ;;  %v3283_v2 = vsub.f32 %v12283_v48, %v15378_v33  ;;  %v15382_v8 = vand.u32 4294901760, %v12243_v47  ;;  %v9600_v39 = vpack.c.bf16 %v3270_v41, %v3263_v58 }
 0x170   :  { %9569 = vmatprep.subr.bf16.mxu0 %v12226_v20  ;;  %v12378_v44 = vpack.c.bf16 %v15380_v19, %v15379_v1  ;;  %v3151_v33 = vand.u32 4294901760, %v3150_v10  ;;  %v3158_v48 = vand.u32 4294901760, %v3157_v11  ;;  %v15383_v46 = vand.u32 4294901760, %v12296_v5 }
 0x171   :  { %v12382_v40 = vpack.c.bf16 %v3004_v49, %v15382_v8  ;;  %v7464_v6 = vpop.f32.mrb[4].mxu0  ;;  %v15384_v20 = vand.u32 4294901760, %v12318_v14  ;;  %9595 = vmatpush3.bf16.msra.mxu1 %v9594_v4  ;;  %v14887_v19 = vand.u32 4294901760, %v12362_v0  ;;  %v3277_v47 = vand.u32 4294901760, %v3276_v23 }
 0x172   :  { %15381 = vst [vmem:[#allocation29_spill] sm:$0xff] %v12378_v44  ;;  %v3164_v52 = vsub.f32 %v12296_v5, %v15383_v46  ;;  %v7465_v12 = vpop.f32.mrb[5].mxu0  ;;  %v14886_v49 = vand.u32 4294901760, %v12354_v34  ;;  %v14885_v58 = vand.u32 4294901760, %v12359_v61  ;;  %9597 = vmatprep.subr.bf16.mxu1 %v9596_v55  ;;  %v3284_v11 = vand.u32 4294901760, %v3283_v2 }
 0x173   :  { %v3171_v32 = vsub.f32 %v12318_v14, %v15384_v20  ;;  %v7466_v41 = vadd.f32 %v7465_v12, %v7464_v6  ;;  %9571 = vmatpush3.bf16.msra.mxu0 %v12248_v27  ;;  %v15385_v46 = vand.u32 4294901760, %v12333_v30  ;;  %v15386_v20 = vand.u32 4294901760, %v12338_v36 }
 0x174   :  { %9573 = vmatprep.subr.bf16.mxu0 %v12378_v44  ;;  %v15387_v42 = vand.u32 4294901760, %v12263_v63  ;;  %v15388_v10 = vand.u32 4294901760, %v12265_v45  ;;  %v3165_v55 = vand.u32 4294901760, %v3164_v52  ;;  %v9602_v1 = vpack.c.bf16 %v3158_v48, %v3151_v33 }
 0x175   :  { %v3290_v24 = vsub.f32 %v12333_v30, %v15385_v46  ;;  %v3297_v4 = vsub.f32 %v12338_v36, %v15386_v20  ;;  %v1133_v6 = vadd.f32 %v7466_v41, %v12201_v51  ;;  %v3172_v2 = vand.u32 4294901760, %v3171_v32  ;;  %9599 = vmatpush3.bf16.msra.mxu1 %v9598_v54 }
 0x176   :  { %v12405_v23 = vpack.c.bf16 %v15388_v10, %v15387_v42  ;;  %v3069_v8 = vsub.f32 %v12362_v0, %v14887_v19  ;;  %v3178_v12 = vsub.f32 %v12354_v34, %v14886_v49  ;;  %v3185_v45 = vsub.f32 %v12359_v61, %v14885_v58  ;;  %9601 = vmatprep.subr.bf16.mxu1 %v9600_v39  ;;  %v7499_v32 = vpop.f32.mrb[4].mxu1  ;;  %v12479_v49 = vld [vmem:[#allocation5 + $0x488] sm:$0xff] }
 0x177   :  { %9575 = vmatpush3.bf16.msra.mxu0 %v12382_v40  ;;  %v15389_v51 = vand.u32 4294901760, %v12300_v21  ;;  %v15390_v63 = vand.u32 4294901760, %v12302_v43  ;;  %v9604_v52 = vpack.c.bf16 %v3284_v11, %v3277_v47  ;;  %v3291_v54 = vand.u32 4294901760, %v3290_v24  ;;  %v7500_v46 = vpop.f32.mrb[5].mxu1 }
 0x178   :  { %v3298_v33 = vand.u32 4294901760, %v3297_v4  ;;  %9577 = vmatprep.subr.bf16.mxu0 %v12405_v23  ;;  %v9612_v41 = vpack.c.bf16 %v11988_v38, %v11986_v25  ;;  %v9606_v20 = vpack.c.bf16 %v3172_v2, %v3165_v55  ;;  %v7501_v42 = vadd.f32 %v7500_v46, %v7499_v32 }
 0x179   :  { %v12422_v48 = vpack.c.bf16 %v15390_v63, %v15389_v51  ;;  %9603 = vmatpush3.bf16.msra.mxu1 %v9602_v1  ;;  %v3070_v39 = vand.u32 4294901760, %v3069_v8  ;;  %v3179_v10 = vand.u32 4294901760, %v3178_v12  ;;  %v3186_v21 = vand.u32 4294901760, %v3185_v45  ;;  %v15392_v12 = vld [vmem:[#allocation22_spill] sm:$0xff]  ;;  %v15394_v51 = vld [vmem:[#allocation16_spill] sm:$0xff] }
 0x17a   :  { %9605 = vmatprep.subr.bf16.mxu1 %v9604_v52  ;;  %v9614_v43 = vpack.c.bf16 %v12062_v15, %v12025_v50  ;;  %v9608_v47 = vpack.c.bf16 %v3298_v33, %v3291_v54  ;;  %v1237_v11 = vadd.f32 %v7501_v42, %v1133_v6  ;;  %v9616_v24 = vpack.c.bf16 %v12069_v26, %v12064_v22  ;;  %v15391_v6 = vld [vmem:[#allocation12_spill] sm:$0xff]  ;;  %v15395_v54 = vld [vmem:[#allocation21_spill] sm:$0xff] }
 0x17b   :  { %9579 = vmatpush3.bf16.msra.mxu0 %v12422_v48  ;;  %v9610_v4 = vpack.c.bf16 %v3186_v21, %v3179_v10  ;;  %v9618_v55 = vpack.c.bf16 %v12094_v57, %v12092_v53  ;;  %v9620_v2 = vpack.c.bf16 %v12107_v16, %v12103_v9  ;;  %v9622_v1 = vpack.c.bf16 %v15391_v6, %v12118_v18  ;;  %v15396_v33 = vld [vmem:[#allocation24_spill] sm:$0xff]  ;;  %v15402_v21 = vld [vmem:[#allocation27_spill] sm:$0xff] }
 0x17c   :  { %9613 = vmatprep.subr.bf16.mxu0 %v9612_v41  ;;  %v9624_v8 = vpack.c.bf16 %v12139_v3, %v12131_v56  ;;  %v15393_v45 = vand.u32 4294901760, %v12137_v13  ;;  %v9626_v63 = vpack.c.bf16 %v12163_v59, %v15394_v51  ;;  %v9628_v52 = vpack.c.bf16 %v12184_v37, %v12178_v29  ;;  %v15398_v41 = vld [vmem:[#allocation19_spill] sm:$0xff]  ;;  %v15400_v42 = vld [vmem:[#allocation20_spill] sm:$0xff] }
 0x17d   :  { %9607 = vmatpush3.bf16.msra.mxu1 %v9606_v20  ;;  %v9630_v32 = vpack.c.bf16 %v15396_v33, %v15395_v54  ;;  %v15399_v20 = vld [vmem:[#allocation13_spill] sm:$0xff] }
 0x17e   :  { %3071 = vmatmul.mubr.f32.vlgmr.msra.gmra.mrb[18].mxu0 %v3070_v39  ;;  %9609 = vmatprep.subr.bf16.mxu1 %v9608_v47  ;;  %v15401_v39 = vld [vmem:[#allocation14_spill] sm:$0xff] }
 0x17f   :  { %9615 = vmatpush3.bf16.msra.mxu0 %v9614_v43  ;;  %3438 = vmatprep.mubr.f32.mxu0 %v12137_v13  ;;  %v15397_v13 = vld [vmem:[#allocation25_spill] sm:$0xff]  ;;  %v9634_v10 = vpack.c.bf16 %v15401_v39, %v12241_v35  ;;  %v9636_v43 = vpack.c.bf16 %v15402_v21, %v12273_v62 }
 0x180   :  { %9617 = vmatprep.subr.bf16.mxu0 %v9616_v24  ;;  %v9632_v46 = vpack.c.bf16 %v15398_v41, %v15397_v13 }
 0x181   :  { %9611 = vmatpush3.bf16.msra.mxu1 %v9610_v4  ;;  %v15403_v4 = vld [vmem:[#allocation18_spill] sm:$0xff] }
 0x182   :  { %9645 = vmatprep.subr.bf16.mxu1 %v12067_v60 }
 0x183   :  { %9619 = vmatpush3.bf16.msra.mxu0 %v9618_v55 }
 0x184   :  { %9621 = vmatprep.subr.bf16.mxu0 %v9620_v2  ;;  %3303 = vmatmul.mubr.f32.vlgmr.msra.gmra.mrb[18].mxu1 %v12325_v31  ;;  %v15404_v2 = vld [vmem:[#allocation23_spill] sm:$0xff]  ;;  %v3878_v31 = vand.u32 4294901760, %v12479_v49 }
 0x185   :  { %9647 = vmatpush3.bf16.msra.mxu1 %v15392_v12  ;;  %3545 = vmatprep.mubr.f32.mxu1 %v15393_v45 }
 0x186   :  { %9649 = vmatprep.subr.bf16.mxu1 %v12082_v17 }
 0x187   :  { %9623 = vmatpush3.bf16.msra.mxu0 %v9622_v1  ;;  %v9638_v1 = vpack.c.bf16 %v12318_v14, %v12296_v5 }
 0x188   :  { %9625 = vmatprep.subr.bf16.mxu0 %v9624_v8  ;;  %v9640_v8 = vpack.c.bf16 %v12338_v36, %v12333_v30 }
 0x189   :  { %9651 = vmatpush3.bf16.msra.mxu1 %v12090_v28 }
 0x18a   :  { %9653 = vmatprep.subr.bf16.mxu1 %v12101_v7 }
 0x18b   :  { %9627 = vmatpush3.bf16.msra.mxu0 %v9626_v63  ;;  %v15405_v63 = vld [vmem:[#allocation26_spill] sm:$0xff] }
 0x18c   :  { %9629 = vmatprep.subr.bf16.mxu0 %v9628_v52  ;;  %v15406_v52 = vld [vmem:[#allocation15_spill] sm:$0xff] }
 0x18d   :  { %9655 = vmatpush3.bf16.msra.mxu1 %v15399_v20 }
 0x18e   :  { %9657 = vmatprep.subr.bf16.mxu1 %v15400_v42 }
 0x18f   :  { %9631 = vmatpush3.bf16.msra.mxu0 %v9630_v32  ;;  %v9642_v32 = vpack.c.bf16 %v12359_v61, %v12354_v34 }
 0x190   :  { %9633 = vmatprep.subr.bf16.mxu0 %v9632_v46 }
 0x191   :  { %v7534_v47 = vpop.f32.mrb[6].mxu0  ;;  %9659 = vmatpush3.bf16.msra.mxu1 %v15403_v4 }
 0x192   :  { %v7535_v24 = vpop.f32.mrb[7].mxu0  ;;  %9661 = vmatprep.subr.bf16.mxu1 %v15404_v2 }
 0x193   :  { %v7536_v55 = vadd.f32 %v7535_v24, %v7534_v47  ;;  %9635 = vmatpush3.bf16.msra.mxu0 %v9634_v10  ;;  %v15407_v10 = vand.u32 4294901760, %v11986_v25  ;;  %v15408_v47 = vand.u32 4294901760, %v11988_v38  ;;  %v15409_v25 = vand.u32 4294901760, %v12025_v50 }
 0x194   :  { %9637 = vmatprep.subr.bf16.mxu0 %v9636_v43  ;;  %v12477_v43 = vld [vmem:[#allocation5 + $0x480] sm:$0xff]  ;;  %v15410_v38 = vand.u32 4294901760, %v12062_v15  ;;  %v15413_v50 = vand.u32 4294901760, %v12092_v53  ;;  %v15414_v15 = vand.u32 4294901760, %v12094_v57  ;;  %v15418_v53 = vand.u32 4294901760, %v12118_v18 }
 0x195   :  { %v1349_v45 = vadd.f32 %v7536_v55, %v1237_v11  ;;  %9663 = vmatpush3.bf16.msra.mxu1 %v15405_v63  ;;  %v9676_v24 = vpack.c.bf16 %v15408_v47, %v15407_v10  ;;  %v12482_v55 = vld [vmem:[#allocation5 + $0x400] sm:$0xff]  ;;  %v3875_v10 = vand.u32 4294901760, %v12477_v43  ;;  %v15419_v57 = vand.u32 4294901760, %v15391_v6 }
 0x196   :  { %9665 = vmatprep.subr.bf16.mxu1 %v15406_v52  ;;  %v7569_v46 = vpop.f32.mrb[6].mxu1  ;;  %v15423_v18 = vand.u32 4294901760, %v12163_v59  ;;  %v15424_v6 = vand.u32 4294901760, %v12178_v29  ;;  %v15428_v59 = vand.u32 4294901760, %v15397_v13  ;;  %v15434_v13 = vand.u32 4294901760, %v12296_v5 }
 0x197   :  { %9639 = vmatpush3.bf16.msra.mxu0 %v9638_v1  ;;  %v7570_v58 = vpop.f32.mrb[7].mxu1  ;;  %v12484_v1 = vld [vmem:[#allocation5 + $0x408] sm:$0xff]  ;;  %v15439_v5 = vand.u32 4294901760, %v12338_v36 }
 0x198   :  { %9641 = vmatprep.subr.bf16.mxu0 %v9640_v8  ;;  %v7571_v11 = vadd.f32 %v7570_v58, %v7569_v46  ;;  %v9678_v8 = vpack.c.bf16 %v15410_v38, %v15409_v25  ;;  %v15411_v58 = vand.u32 4294901760, %v12064_v22  ;;  %v15412_v46 = vand.u32 4294901760, %v12069_v26  ;;  %v15417_v38 = vld [vmem:[#allocation17_spill] sm:$0xff] }
 0x199   :  { %9667 = vmatpush3.bf16.msra.mxu1 %v12248_v27  ;;  %v9682_v22 = vpack.c.bf16 %v15414_v15, %v15413_v50  ;;  %v12509_v26 = vsub.f32 %v12477_v43, %v3875_v10  ;;  %v15422_v50 = vand.u32 4294901760, %v15394_v51  ;;  %v15429_v51 = vand.u32 4294901760, %v15398_v41 }
 0x19a   :  { %9669 = vmatprep.subr.bf16.mxu1 %v12378_v44  ;;  %v12492_v47 = vadd.f32 %v7571_v11, %v1349_v45  ;;  %v9680_v19 = vpack.c.bf16 %v15412_v46, %v15411_v58  ;;  %v3830_v44 = vand.u32 4294901760, %v12484_v1  ;;  %v186_v45 = vld [vmem:[#allocation5 + $0x490] sm:$0xff]  ;;  %v15416_v11 = vand.u32 4294901760, %v12107_v16  ;;  %v187_v58 = vld [vmem:[#allocation5 + $0x498] sm:$0xff] }
 0x19b   :  { %9643 = vmatpush3.bf16.msra.mxu0 %v9642_v32  ;;  %v3827_v32 = vand.u32 4294901760, %v12482_v55  ;;  %v9686_v46 = vpack.c.bf16 %v15419_v57, %v15418_v53  ;;  %v15421_v16 = vand.u32 4294901760, %v12139_v3  ;;  %v9690_v15 = vpack.c.bf16 %v15423_v18, %v15422_v50  ;;  %v171_v53 = vld [vmem:[#allocation5 + $0x418] sm:$0xff] }
 0x19c   :  { %9677 = vmatprep.subr.bf16.mxu0 %v9676_v24  ;;  %v15415_v24 = vand.u32 4294901760, %v12103_v9  ;;  %v15420_v9 = vand.u32 4294901760, %v12131_v56  ;;  %v15426_v56 = vand.u32 4294901760, %v15395_v54  ;;  %v15427_v3 = vand.u32 4294901760, %v15396_v33 }
 0x19d   :  { %9671 = vmatpush3.bf16.msra.mxu1 %v12382_v40  ;;  %v12524_v43 = vsub.f32 %v12482_v55, %v3827_v32  ;;  %v15425_v55 = vand.u32 4294901760, %v12184_v37  ;;  %v12553_v29 = vpack.c.bf16 %v15429_v51, %v15428_v59  ;;  %v3884_v37 = vand.u32 4294901760, %v187_v58 }
 0x19e   :  { %3441 = vmatmul.mubr.f32.vlgmr.msra.gmra.mrb[20].mxu0 %v12362_v0  ;;  %9673 = vmatprep.subr.bf16.mxu1 %v12405_v23  ;;  %v9684_v25 = vpack.c.bf16 %v15416_v11, %v15415_v24  ;;  %v3881_v11 = vand.u32 4294901760, %v186_v45  ;;  %v12547_v57 = vpack.c.bf16 %v15427_v3, %v15426_v56  ;;  %v15432_v54 = vand.u32 4294901760, %v12273_v62  ;;  %v12579_v3 = vld [vmem:[#allocation2 + $0x8] sm:$0xff] }
 0x19f   :  { %9679 = vmatpush3.bf16.msra.mxu0 %v9678_v8  ;;  %3715 = vmatprep.mubr.f32.mxu0 %v15417_v38  ;;  %v12517_v8 = vsub.f32 %v12479_v49, %v3878_v31  ;;  %v9688_v49 = vpack.c.bf16 %v15421_v16, %v15420_v9  ;;  %v9692_v24 = vpack.c.bf16 %v15425_v55, %v15424_v6  ;;  %v14895_v9 = vand.u32 4294901760, %v12509_v26  ;;  %v188_v6 = vld [vmem:[#allocation5 + $0x4a0] sm:$0xff] }
 0x1a0   :  { %9681 = vmatprep.subr.bf16.mxu0 %v9680_v19  ;;  %v12527_v19 = vsub.f32 %v12484_v1, %v3830_v44  ;;  %v170_v1 = vld [vmem:[#allocation5 + $0x410] sm:$0xff]  ;;  %v15433_v33 = vand.u32 4294901760, %v15402_v21  ;;  %v15435_v41 = vand.u32 4294901760, %v12318_v14  ;;  %v3836_v56 = vand.u32 4294901760, %v171_v53  ;;  %15437 = vst [vmem:[#allocation12_spill] sm:$0xff] %v12579_v3 }
 0x1a1   :  { %9675 = vmatpush3.bf16.msra.mxu1 %v12422_v48  ;;  %v3833_v55 = vand.u32 4294901760, %v170_v1  ;;  %v14892_v62 = vand.u32 4294901760, %v12524_v43  ;;  %v15438_v14 = vand.u32 4294901760, %v12333_v30  ;;  %v15440_v51 = vand.u32 4294901760, %v12354_v34  ;;  %v172_v34 = vld [vmem:[#allocation5 + $0x420] sm:$0xff] }
 0x1a2   :  { %9709 = vmatprep.subr.bf16.mxu1 %v12067_v60  ;;  %v15431_v60 = vand.u32 4294901760, %v15401_v39  ;;  %v12566_v50 = vpack.c.bf16 %v15433_v33, %v15432_v54  ;;  %v12572_v18 = vpack.c.bf16 %v15435_v41, %v15434_v13  ;;  %v15436_v39 = vand.u32 4294901760, %v12362_v0  ;;  %v173_v33 = vld [vmem:[#allocation5 + $0x428] sm:$0xff] }
 0x1a3   :  { %9683 = vmatpush3.bf16.msra.mxu0 %v9682_v22  ;;  %v15430_v22 = vand.u32 4294901760, %v12241_v35  ;;  %v14893_v35 = vand.u32 4294901760, %v12517_v8  ;;  %v14891_v21 = vand.u32 4294901760, %v12527_v19  ;;  %v12586_v59 = vpack.c.bf16 %v15439_v5, %v15438_v14 }
 0x1a4   :  { %9685 = vmatprep.subr.bf16.mxu0 %v9684_v25  ;;  %v189_v25 = vld [vmem:[#allocation5 + $0x4a8] sm:$0xff]  ;;  %3549 = vmatmul.mubr.f32.vlgmr.msra.gmra.mrb[20].mxu1 %v15436_v39  ;;  %v15441_v0 = vand.u32 4294901760, %v12359_v61  ;;  %v3887_v30 = vand.u32 4294901760, %v188_v6  ;;  %v4054_v36 = vsub.f32 %v12509_v26, %v14895_v9  ;;  %v12603_v61 = vpack.c.bf16 %v3878_v31, %v3875_v10 }
 0x1a5   :  { %v12560_v16 = vpack.c.bf16 %v15431_v60, %v15430_v22  ;;  %9711 = vmatpush3.bf16.msra.mxu1 %v15392_v12  ;;  %v12594_v60 = vsub.f32 %v186_v45, %v3881_v11  ;;  %3819 = vmatprep.mubr.f32.mxu1 %v15417_v38  ;;  %v12598_v12 = vsub.f32 %v187_v58, %v3884_v37  ;;  %v3890_v54 = vand.u32 4294901760, %v189_v25 }
 0x1a6   :  { %v12592_v22 = vpack.c.bf16 %v15441_v0, %v15440_v51  ;;  %9713 = vmatprep.subr.bf16.mxu1 %v12082_v17  ;;  %v12605_v45 = vpack.c.bf16 %v3830_v44, %v3827_v32  ;;  %v4061_v38 = vsub.f32 %v12517_v8, %v14893_v35  ;;  %v15442_v17 = vld [vmem:[#allocation11_spill] sm:$0xff]  ;;  %v12613_v13 = vpack.c.bf16 %v3884_v37, %v3881_v11  ;;  %v190_v11 = vld [vmem:[#allocation5 + $0x4b0] sm:$0xff]  ;;  %v191_v37 = vld [vmem:[#allocation5 + $0x4b8] sm:$0xff] }
 0x1a7   :  { %9687 = vmatpush3.bf16.msra.mxu0 %v9686_v46  ;;  %v15443_v58 = vsub.s32 1, %v15442_v17  ;;  %v12615_v41 = vpack.c.bf16 %v3836_v56, %v3833_v55  ;;  %v3949_v31 = vsub.f32 %v12527_v19, %v14891_v21  ;;  %v12624_v44 = vsub.f32 %v170_v1, %v3833_v55 }
 0x1a8   :  { %9689 = vmatprep.subr.bf16.mxu0 %v9688_v49  ;;  %v3942_v49 = vsub.f32 %v12524_v43, %v14892_v62  ;;  %v12626_v10 = vsub.f32 %v171_v53, %v3836_v56  ;;  %v3839_v32 = vand.u32 4294901760, %v172_v34  ;;  %v3842_v39 = vand.u32 4294901760, %v173_v33  ;;  %v175_v62 = vld [vmem:[#allocation5 + $0x438] sm:$0xff] }
 0x1a9   :  { %v337_v46 = vrot.slane %v12579_v3, %v15443_v58  ;;  %9715 = vmatpush3.bf16.msra.mxu1 %v12090_v28  ;;  %v12629_v14 = vpack.c.bf16 %v3890_v54, %v3887_v30  ;;  %v4055_v5 = vand.u32 4294901760, %v4054_v36  ;;  %v14894_v51 = vand.u32 4294901760, %v12594_v60 }
 0x1aa   :  { %9717 = vmatprep.subr.bf16.mxu1 %v12101_v7  ;;  %v14898_v0 = vand.u32 4294901760, %v12598_v12  ;;  %v12633_v28 = vsub.f32 %v188_v6, %v3887_v30  ;;  %v12635_v1 = vsub.f32 %v189_v25, %v3890_v54  ;;  %v4062_v53 = vand.u32 4294901760, %v4061_v38  ;;  %v174_v7 = vld [vmem:[#allocation5 + $0x430] sm:$0xff]  ;;  %v192_v25 = vld [vmem:[#allocation5 + $0x4c0] sm:$0xff] }
 0x1ab   :  { %9691 = vmatpush3.bf16.msra.mxu0 %v9690_v15  ;;  %v12637_v55 = vand.u32 4294901760, %v337_v46  ;;  %v3943_v56 = vand.u32 4294901760, %v3942_v49  ;;  %v3950_v58 = vand.u32 4294901760, %v3949_v31  ;;  %v3893_v15 = vand.u32 4294901760, %v190_v11  ;;  %v193_v31 = vld [vmem:[#allocation5 + $0x4c8] sm:$0xff] }
 0x1ac   :  { %9693 = vmatprep.subr.bf16.mxu0 %v9692_v24  ;;  %v3896_v21 = vand.u32 4294901760, %v191_v37  ;;  %v12640_v36 = vpack.c.bf16 %v3842_v39, %v3839_v32  ;;  %v12642_v35 = vsub.f32 %v172_v34, %v3839_v32  ;;  %v14896_v24 = vand.u32 4294901760, %v12624_v44 }
 0x1ad   :  { %15444 = vst [vmem:[#allocation22_spill] sm:$0xff] %v12637_v55  ;;  %9719 = vmatpush3.bf16.msra.mxu1 %v15399_v20  ;;  %v14897_v6 = vand.u32 4294901760, %v12626_v10  ;;  %v12648_v30 = vsub.f32 %v173_v33, %v3842_v39  ;;  %v4068_v54 = vsub.f32 %v12594_v60, %v14894_v51  ;;  %v4075_v20 = vsub.f32 %v12598_v12, %v14898_v0 }
 0x1ae   :  { %15445 = vst [vmem:[#allocation16_spill] sm:$0xff] %v12640_v36  ;;  %15446 = vst [vmem:[#allocation21_spill] sm:$0xff] %v12642_v35  ;;  %9721 = vmatprep.subr.bf16.mxu1 %v15400_v42  ;;  %v12657_v34 = vpack.c.bf16 %v4062_v53, %v4055_v5  ;;  %v3845_v38 = vand.u32 4294901760, %v174_v7  ;;  %v3848_v49 = vand.u32 4294901760, %v175_v62  ;;  %v12662_v33 = vpack.c.bf16 %v3950_v58, %v3943_v56 }
 0x1af   :  { %9695 = vmatpush3.bf16.msra.mxu0 %v12547_v57  ;;  %15447 = vst [vmem:[#allocation24_spill] sm:$0xff] %v12648_v30  ;;  %v12660_v57 = vsub.f32 %v337_v46, %v12637_v55  ;;  %v12664_v32 = vpack.c.bf16 %v3896_v21, %v3893_v15  ;;  %v12666_v39 = vsub.f32 %v190_v11, %v3893_v15  ;;  %v3899_v51 = vand.u32 4294901760, %v192_v25 }
 0x1b0   :  { %9697 = vmatprep.subr.bf16.mxu0 %v12553_v29  ;;  %v3956_v29 = vsub.f32 %v12624_v44, %v14896_v24  ;;  %v3963_v46 = vsub.f32 %v12626_v10, %v14897_v6  ;;  %v14901_v5 = vand.u32 4294901760, %v12633_v28  ;;  %v4069_v11 = vand.u32 4294901760, %v4068_v54 }
 0x1b1   :  { %15448 = vst [vmem:[#allocation25_spill] sm:$0xff] %v12660_v57  ;;  %v7604_v42 = vpop.f32.mrb[8].mxu0  ;;  %15449 = vst [vmem:[#allocation19_spill] sm:$0xff] %v12664_v32  ;;  %9723 = vmatpush3.bf16.msra.mxu1 %v15403_v4  ;;  %v4076_v58 = vand.u32 4294901760, %v4075_v20  ;;  %v3902_v4 = vand.u32 4294901760, %v193_v31  ;;  %v12680_v15 = vsub.f32 %v191_v37, %v3896_v21  ;;  %v14900_v24 = vand.u32 4294901760, %v12642_v35 }
 0x1b2   :  { %v7605_v9 = vpop.f32.mrb[9].mxu0  ;;  %9725 = vmatprep.subr.bf16.mxu1 %v15404_v2  ;;  %v14899_v6 = vand.u32 4294901760, %v12648_v30  ;;  %v14902_v0 = vand.u32 4294901760, %v12660_v57  ;;  %v12690_v2 = vsub.f32 %v175_v62, %v3848_v49  ;;  %v3957_v54 = vand.u32 4294901760, %v3956_v29 }
 0x1b3   :  { %v7606_v56 = vadd.f32 %v7605_v9, %v7604_v42  ;;  %9699 = vmatpush3.bf16.msra.mxu0 %v12560_v16  ;;  %v12686_v9 = vpack.c.bf16 %v3848_v49, %v3845_v38  ;;  %v12688_v16 = vsub.f32 %v174_v7, %v3845_v38  ;;  %v4082_v21 = vsub.f32 %v12633_v28, %v14901_v5  ;;  %v176_v42 = vld [vmem:[#allocation5 + $0x440] sm:$0xff] }
 0x1b4   :  { %9701 = vmatprep.subr.bf16.mxu0 %v12566_v50  ;;  %15452 = vst [vmem:[#allocation14_spill] sm:$0xff] %v12690_v2  ;;  %v3964_v50 = vand.u32 4294901760, %v3963_v46  ;;  %v15453_v37 = vand.u32 4294901760, %v12635_v1  ;;  %v12701_v62 = vpack.c.bf16 %v4076_v58, %v4069_v11  ;;  %v12703_v7 = vpack.c.bf16 %v3902_v4, %v3899_v51  ;;  %v195_v46 = vld [vmem:[#allocation5 + $0x4d8] sm:$0xff] }
 0x1b5   :  { %v1719_v53 = vadd.f32 %v7606_v56, %v12492_v47  ;;  %15450 = vst [vmem:[#allocation13_spill] sm:$0xff] %v12686_v9  ;;  %15451 = vst [vmem:[#allocation20_spill] sm:$0xff] %v12688_v16  ;;  %9727 = vmatpush3.bf16.msra.mxu1 %v15405_v63  ;;  %v177_v47 = vld [vmem:[#allocation5 + $0x448] sm:$0xff]  ;;  %v12705_v63 = vsub.f32 %v192_v25, %v3899_v51  ;;  %v12708_v49 = vsub.f32 %v193_v31, %v3902_v4 }
 0x1b6   :  { %v4089_v20 = vsub.f32 %v12635_v1, %v15453_v37  ;;  %9729 = vmatprep.subr.bf16.mxu1 %v15406_v52  ;;  %15454 = vst [vmem:[#allocation27_spill] sm:$0xff] %v12703_v7  ;;  %v7639_v38 = vpop.f32.mrb[8].mxu1  ;;  %v3970_v29 = vsub.f32 %v12642_v35, %v14900_v24  ;;  %v194_v52 = vld [vmem:[#allocation5 + $0x4d0] sm:$0xff]  ;;  %v3925_v51 = vsub.f32 %v12660_v57, %v14902_v0  ;;  %v3851_v56 = vand.u32 4294901760, %v176_v42  ;;  %v179_v35 = vld [vmem:[#allocation5 + $0x458] sm:$0xff] }
 0x1b7   :  { %9703 = vmatpush3.bf16.msra.mxu0 %v12572_v18  ;;  %v3977_v18 = vsub.f32 %v12648_v30, %v14899_v6  ;;  %v7640_v25 = vpop.f32.mrb[9].mxu1  ;;  %v3854_v11 = vand.u32 4294901760, %v177_v47  ;;  %v12722_v4 = vpack.c.bf16 %v3964_v50, %v3957_v54  ;;  %v4083_v37 = vand.u32 4294901760, %v4082_v21  ;;  %v15455_v24 = vld [vmem:[#allocation29_spill] sm:$0xff] }
 0x1b8   :  { %9705 = vmatprep.subr.bf16.mxu0 %v12586_v59  ;;  %v7641_v58 = vadd.f32 %v7640_v25, %v7639_v38  ;;  %v4090_v6 = vand.u32 4294901760, %v4089_v20  ;;  %v3905_v5 = vand.u32 4294901760, %v194_v52  ;;  %v3908_v0 = vand.u32 4294901760, %v195_v46  ;;  %v178_v30 = vld [vmem:[#allocation5 + $0x450] sm:$0xff] }
 0x1b9   :  { %9731 = vmatpush3.bf16.msra.mxu1 %v12248_v27  ;;  %v14909_v57 = vand.u32 4294901760, %v12688_v16  ;;  %v3971_v27 = vand.u32 4294901760, %v3970_v29  ;;  %v3978_v54 = vand.u32 4294901760, %v3977_v18  ;;  %v3926_v50 = vand.u32 4294901760, %v3925_v51  ;;  %v15459_v59 = vld [vmem:[#allocation28_spill] sm:$0xff] }
 0x1ba   :  { %9733 = vmatprep.subr.bf16.mxu1 %v15455_v24  ;;  %v12728_v31 = vadd.f32 %v7641_v58, %v1719_v53  ;;  %v12731_v21 = vpack.c.bf16 %v3854_v11, %v3851_v56  ;;  %v15457_v24 = vand.u32 4294901760, %v12666_v39  ;;  %v15458_v38 = vand.u32 4294901760, %v12680_v15 }
 0x1bb   :  { %9707 = vmatpush3.bf16.msra.mxu0 %v12592_v22  ;;  %v12733_v22 = vsub.f32 %v176_v42, %v3851_v56  ;;  %v12743_v53 = vpack.c.bf16 %v4090_v6, %v4083_v37  ;;  %v12745_v29 = vsub.f32 %v177_v47, %v3854_v11  ;;  %v3857_v18 = vand.u32 4294901760, %v178_v30  ;;  %v12747_v42 = vld [vmem:[#allocation5 + $0x4e0] sm:$0xff]  ;;  %v12759_v47 = vld [vmem:[#allocation5 + $0x4e8] sm:$0xff] }
 0x1bc   :  { %9741 = vmatprep.subr.bf16.mxu0 %v12603_v61  ;;  %15456 = vst [vmem:[#allocation18_spill] sm:$0xff] %v12731_v21  ;;  %v4096_v20 = vsub.f32 %v12666_v39, %v15457_v24  ;;  %v4103_v25 = vsub.f32 %v12680_v15, %v15458_v38  ;;  %v3860_v51 = vand.u32 4294901760, %v179_v35  ;;  %v12751_v56 = vsub.f32 %v194_v52, %v3905_v5 }
 0x1bd   :  { %9735 = vmatpush3.bf16.msra.mxu1 %v12382_v40  ;;  %v3984_v58 = vsub.f32 %v12688_v16, %v14909_v57  ;;  %v15461_v40 = vand.u32 4294901760, %v12690_v2  ;;  %v12762_v11 = vpack.c.bf16 %v3978_v54, %v3971_v27  ;;  %v12764_v37 = vpack.c.bf16 %v3908_v0, %v3905_v5 }
 0x1be   :  { %3717 = vmatmul.mubr.f32.vlgmr.msra.gmra.mrb[22].mxu0 %v15459_v59  ;;  %9737 = vmatprep.subr.bf16.mxu1 %v12405_v23  ;;  %15460 = vst [vmem:[#allocation23_spill] sm:$0xff] %v12751_v56  ;;  %v12766_v24 = vsub.f32 %v195_v46, %v3908_v0  ;;  %v12768_v23 = vld [vmem:[#allocation5 + $0x460] sm:$0xff]  ;;  %v4097_v52 = vand.u32 4294901760, %v4096_v20  ;;  %v4104_v38 = vand.u32 4294901760, %v4103_v25  ;;  %v14914_v57 = vand.u32 4294901760, %v12747_v42  ;;  %v12779_v46 = vld [vmem:[#allocation5 + $0x468] sm:$0xff] }
 0x1bf   :  { %9743 = vmatpush3.bf16.msra.mxu0 %v12605_v45  ;;  %v3991_v6 = vsub.f32 %v12690_v2, %v15461_v40  ;;  %15462 = vst [vmem:[#allocation26_spill] sm:$0xff] %v12764_v37  ;;  %3927 = vmatprep.mubr.f32.mxu0 %v3926_v50  ;;  %v14915_v16 = vand.u32 4294901760, %v12705_v63  ;;  %v12773_v40 = vpack.c.bf16 %v3860_v51, %v3857_v18  ;;  %v14916_v5 = vand.u32 4294901760, %v12759_v47  ;;  %v12789_v25 = vld [vmem:[#allocation5 + $0x4f0] sm:$0xff]  ;;  %v12829_v20 = vld [vmem:[#allocation5 + $0x478] sm:$0xff] }
 0x1c0   :  { %9745 = vmatprep.subr.bf16.mxu0 %v12613_v13  ;;  %15463 = vst [vmem:[#allocation15_spill] sm:$0xff] %v12766_v24  ;;  %v12775_v2 = vsub.f32 %v178_v30, %v3857_v18  ;;  %v12783_v27 = vsub.f32 %v179_v35, %v3860_v51  ;;  %v3985_v54 = vand.u32 4294901760, %v3984_v58  ;;  %v14922_v30 = vand.u32 4294901760, %v12733_v22  ;;  %v12791_v18 = vld [vmem:[#allocation5 + $0x4f8] sm:$0xff]  ;;  %v12827_v0 = vld [vmem:[#allocation5 + $0x470] sm:$0xff] }
 0x1c1   :  { %9739 = vmatpush3.bf16.msra.mxu1 %v12422_v48  ;;  %v3992_v50 = vand.u32 4294901760, %v3991_v6  ;;  %v14917_v48 = vand.u32 4294901760, %v12768_v23  ;;  %v9784_v35 = vpack.c.bf16 %v4104_v38, %v4097_v52  ;;  %v12799_v51 = vsub.f32 %v12747_v42, %v14914_v57 }
 0x1c2   :  { %9773 = vmatprep.subr.bf16.mxu1 %v12657_v34  ;;  %15464 = vst [vmem:[#allocation17_spill] sm:$0xff] %v12783_v27  ;;  %v4110_v58 = vsub.f32 %v12705_v63, %v14915_v16  ;;  %v3866_v6 = vand.u32 4294901760, %v12779_v46  ;;  %v12809_v34 = vsub.f32 %v12759_v47, %v14916_v5  ;;  %v15467_v38 = vsub.s32 0, %v15442_v17 }
 0x1c3   :  { %9747 = vmatpush3.bf16.msra.mxu0 %v12615_v41  ;;  %v12823_v16 = vsub.f32 %v12768_v23, %v14917_v48 }
 0x1c4   :  { %9749 = vmatprep.subr.bf16.mxu0 %v12629_v14  ;;  %3821 = vmatmul.mubr.f32.vlgmr.msra.gmra.mrb[22].mxu1 %v15459_v59  ;;  %15465 = vst [vmem:[#allocation29_spill] sm:$0xff] %v12809_v34  ;;  %v15466_v59 = vand.u32 4294901760, %v12708_v49  ;;  %v333_v57 = vrot.slane %v12579_v3, %v15467_v38  ;;  %v15469_v38 = vand.u32 4294901760, %v12751_v56  ;;  %v4111_v3 = vand.u32 4294901760, %v4110_v58 }
 0x1c5   :  { %9775 = vmatpush3.bf16.msra.mxu1 %v12662_v33  ;;  %4163 = vmatprep.mubr.f32.mxu1 %v12637_v55  ;;  %v9786_v33 = vpack.c.bf16 %v3992_v50, %v3985_v54  ;;  %v15468_v54 = vand.u32 4294901760, %v12745_v29  ;;  %v12845_v17 = vsub.f32 %v12779_v46, %v3866_v6  ;;  %v15472_v58 = vand.u32 4294901760, %v12789_v25 }
 0x1c6   :  { %v4117_v52 = vsub.f32 %v12708_v49, %v15466_v59  ;;  %9777 = vmatprep.subr.bf16.mxu1 %v12701_v62  ;;  %v3998_v62 = vsub.f32 %v12733_v22, %v14922_v30  ;;  %v4124_v48 = vsub.f32 %v12751_v56, %v15469_v38  ;;  %v15470_v59 = vand.u32 4294901760, %v12766_v24 }
 0x1c7   :  { %9751 = vmatpush3.bf16.msra.mxu0 %v12640_v36  ;;  %v4005_v50 = vsub.f32 %v12745_v29, %v15468_v54  ;;  %v12852_v36 = vand.u32 4294901760, %v333_v57  ;;  %v15484_v56 = vand.u32 4294901760, %v12823_v16 }
 0x1c8   :  { %9753 = vmatprep.subr.bf16.mxu0 %v12664_v32  ;;  %v4131_v5 = vsub.f32 %v12766_v24, %v15470_v59  ;;  %v4118_v46 = vand.u32 4294901760, %v4117_v52  ;;  %v12860_v59 = vsub.f32 %v12789_v25, %v15472_v58  ;;  %v3999_v38 = vand.u32 4294901760, %v3998_v62 }
 0x1c9   :  { %9779 = vmatpush3.bf16.msra.mxu1 %v12722_v4  ;;  %15471 = vst [vmem:[#allocation28_spill] sm:$0xff] %v12852_v36  ;;  %v15473_v4 = vand.u32 4294901760, %v12791_v18  ;;  %v4006_v30 = vand.u32 4294901760, %v4005_v50  ;;  %v4125_v55 = vand.u32 4294901760, %v4124_v48  ;;  %v15475_v58 = vand.u32 4294901760, %v12783_v27 }
 0x1ca   :  { %9781 = vmatprep.subr.bf16.mxu1 %v12743_v53  ;;  %v15474_v53 = vand.u32 4294901760, %v12775_v2  ;;  %v15476_v32 = vand.u32 4294901760, %v12827_v0  ;;  %v12889_v50 = vsub.f32 %v333_v57, %v12852_v36  ;;  %v15480_v57 = vand.u32 4294901760, %v12747_v42 }
 0x1cb   :  { %9755 = vmatpush3.bf16.msra.mxu0 %v12686_v9  ;;  %v12865_v54 = vsub.f32 %v12791_v18, %v15473_v4  ;;  %v4132_v9 = vand.u32 4294901760, %v4131_v5  ;;  %v4019_v24 = vsub.f32 %v12783_v27, %v15475_v58  ;;  %v15477_v5 = vand.u32 4294901760, %v12829_v20 }
 0x1cc   :  { %9757 = vmatprep.subr.bf16.mxu0 %v12703_v7  ;;  %v4012_v52 = vsub.f32 %v12775_v2, %v15474_v53  ;;  %v12881_v62 = vsub.f32 %v12827_v0, %v15476_v32  ;;  %v15478_v53 = vand.u32 4294901760, %v12799_v51  ;;  %v15479_v4 = vand.u32 4294901760, %v12809_v34 }
 0x1cd   :  { %9783 = vmatpush3.bf16.msra.mxu1 %v12762_v11  ;;  %v12886_v48 = vsub.f32 %v12829_v20, %v15477_v5  ;;  %v9788_v11 = vpack.c.bf16 %v4118_v46, %v4111_v3  ;;  %v15481_v7 = vand.u32 4294901760, %v12759_v47  ;;  %v9790_v3 = vpack.c.bf16 %v4006_v30, %v3999_v38 }
 0x1ce   :  { %v4138_v58 = vsub.f32 %v12799_v51, %v15478_v53  ;;  %9785 = vmatprep.subr.bf16.mxu1 %v9784_v35  ;;  %v4145_v32 = vsub.f32 %v12809_v34, %v15479_v4  ;;  %v15483_v53 = vand.u32 4294901760, %v12768_v23  ;;  %v9792_v46 = vpack.c.bf16 %v4132_v9, %v4125_v55 }
 0x1cf   :  { %9759 = vmatpush3.bf16.msra.mxu0 %v12731_v21  ;;  %v12905_v27 = vpack.c.bf16 %v15481_v7, %v15480_v57  ;;  %v4013_v4 = vand.u32 4294901760, %v4012_v52  ;;  %v4020_v34 = vand.u32 4294901760, %v4019_v24  ;;  %v4026_v5 = vsub.f32 %v12823_v16, %v15484_v56 }
 0x1d0   :  { %9761 = vmatprep.subr.bf16.mxu0 %v12764_v37  ;;  %v12909_v35 = vpack.c.bf16 %v3866_v6, %v15483_v53  ;;  %v15485_v37 = vand.u32 4294901760, %v12845_v17  ;;  %v14945_v7 = vand.u32 4294901760, %v12889_v50  ;;  %v4139_v23 = vand.u32 4294901760, %v4138_v58 }
 0x1d1   :  { %15482 = vst [vmem:[#allocation30_spill] sm:$0xff] %v12905_v27  ;;  %v7674_v21 = vpop.f32.mrb[10].mxu0  ;;  %9787 = vmatpush3.bf16.msra.mxu1 %v9786_v33  ;;  %v14944_v6 = vand.u32 4294901760, %v12881_v62  ;;  %v14943_v55 = vand.u32 4294901760, %v12886_v48  ;;  %v4146_v24 = vand.u32 4294901760, %v4145_v32  ;;  %v15486_v56 = vand.u32 4294901760, %v12860_v59 }
 0x1d2   :  { %v4033_v42 = vsub.f32 %v12845_v17, %v15485_v37  ;;  %v7675_v47 = vpop.f32.mrb[11].mxu0  ;;  %9789 = vmatprep.subr.bf16.mxu1 %v9788_v11  ;;  %v15487_v37 = vand.u32 4294901760, %v12865_v54  ;;  %v15488_v38 = vand.u32 4294901760, %v12789_v25  ;;  %v15489_v52 = vand.u32 4294901760, %v12791_v18 }
 0x1d3   :  { %v7676_v9 = vadd.f32 %v7675_v47, %v7674_v21  ;;  %9763 = vmatpush3.bf16.msra.mxu0 %v12773_v40  ;;  %v4152_v30 = vsub.f32 %v12860_v59, %v15486_v56  ;;  %v4027_v11 = vand.u32 4294901760, %v4026_v5  ;;  %v9794_v57 = vpack.c.bf16 %v4020_v34, %v4013_v4 }
 0x1d4   :  { %v4159_v33 = vsub.f32 %v12865_v54, %v15487_v37  ;;  %9765 = vmatprep.subr.bf16.mxu0 %v12905_v27  ;;  %v12932_v58 = vpack.c.bf16 %v15489_v52, %v15488_v38  ;;  %v4034_v32 = vand.u32 4294901760, %v4033_v42  ;;  %v3931_v53 = vsub.f32 %v12889_v50, %v14945_v7 }
 0x1d5   :  { %v1995_v21 = vadd.f32 %v7676_v9, %v12728_v31  ;;  %9791 = vmatpush3.bf16.msra.mxu1 %v9790_v3  ;;  %v4040_v47 = vsub.f32 %v12881_v62, %v14944_v6  ;;  %v4047_v25 = vsub.f32 %v12886_v48, %v14943_v55  ;;  %v15490_v31 = vand.u32 4294901760, %v12827_v0  ;;  %v13006_v6 = vld [vmem:[#allocation5 + $0x588] sm:$0xff] }
 0x1d6   :  { %9793 = vmatprep.subr.bf16.mxu1 %v9792_v46  ;;  %v15491_v18 = vand.u32 4294901760, %v12829_v20  ;;  %v9796_v5 = vpack.c.bf16 %v4146_v24, %v4139_v23  ;;  %v4153_v3 = vand.u32 4294901760, %v4152_v30  ;;  %v4160_v4 = vand.u32 4294901760, %v4159_v33  ;;  %v7709_v42 = vpop.f32.mrb[10].mxu1 }
 0x1d7   :  { %9767 = vmatpush3.bf16.msra.mxu0 %v12909_v35  ;;  %v9804_v9 = vpack.c.bf16 %v12517_v8, %v12509_v26  ;;  %v7710_v56 = vpop.f32.mrb[11].mxu1  ;;  %v9798_v37 = vpack.c.bf16 %v4034_v32, %v4027_v11  ;;  %v3932_v46 = vand.u32 4294901760, %v3931_v53  ;;  %v4041_v52 = vand.u32 4294901760, %v4040_v47  ;;  %v15494_v53 = vld [vmem:[#allocation24_spill] sm:$0xff] }
 0x1d8   :  { %v12949_v34 = vpack.c.bf16 %v15491_v18, %v15490_v31  ;;  %9769 = vmatprep.subr.bf16.mxu0 %v12932_v58  ;;  %v7711_v38 = vadd.f32 %v7710_v56, %v7709_v42  ;;  %v4048_v0 = vand.u32 4294901760, %v4047_v25  ;;  %v9806_v20 = vpack.c.bf16 %v12527_v19, %v12524_v43  ;;  %v15496_v18 = vld [vmem:[#allocation20_spill] sm:$0xff]  ;;  %v15499_v56 = vld [vmem:[#allocation15_spill] sm:$0xff] }
 0x1d9   :  { %9795 = vmatpush3.bf16.msra.mxu1 %v9794_v57  ;;  %v9800_v23 = vpack.c.bf16 %v4160_v4, %v4153_v3  ;;  %v9808_v30 = vpack.c.bf16 %v12598_v12, %v12594_v60  ;;  %v9810_v11 = vpack.c.bf16 %v12626_v10, %v12624_v44  ;;  %v9812_v32 = vpack.c.bf16 %v12635_v1, %v12633_v28  ;;  %v15492_v57 = vld [vmem:[#allocation25_spill] sm:$0xff] }
 0x1da   :  { %9797 = vmatprep.subr.bf16.mxu1 %v9796_v5  ;;  %v2099_v24 = vadd.f32 %v7711_v38, %v1995_v21  ;;  %v9802_v33 = vpack.c.bf16 %v4048_v0, %v4041_v52  ;;  %v15493_v21 = vld [vmem:[#allocation21_spill] sm:$0xff]  ;;  %v9816_v25 = vpack.c.bf16 %v12680_v15, %v12666_v39  ;;  %v15495_v31 = vand.u32 4294901760, %v15492_v57  ;;  %v15497_v5 = vld [vmem:[#allocation14_spill] sm:$0xff]  ;;  %v15500_v38 = vld [vmem:[#allocation16_spill] sm:$0xff] }
 0x1db   :  { %9771 = vmatpush3.bf16.msra.mxu0 %v12949_v34  ;;  %v9814_v47 = vpack.c.bf16 %v15494_v53, %v15493_v21  ;;  %v9818_v3 = vpack.c.bf16 %v15497_v5, %v15496_v18  ;;  %v9820_v4 = vpack.c.bf16 %v12708_v49, %v12705_v63  ;;  %v9822_v42 = vpack.c.bf16 %v12745_v29, %v12733_v22  ;;  %v15502_v52 = vld [vmem:[#allocation17_spill] sm:$0xff] }
 0x1dc   :  { %9805 = vmatprep.subr.bf16.mxu0 %v9804_v9  ;;  %v15498_v9 = vld [vmem:[#allocation23_spill] sm:$0xff]  ;;  %v9826_v0 = vpack.c.bf16 %v15502_v52, %v12775_v2 }
 0x1dd   :  { %9799 = vmatpush3.bf16.msra.mxu1 %v9798_v37  ;;  %v9824_v37 = vpack.c.bf16 %v15499_v56, %v15498_v9 }
 0x1de   :  { %3933 = vmatmul.mubr.f32.vlgmr.msra.gmra.mrb[24].mxu0 %v3932_v46  ;;  %9801 = vmatprep.subr.bf16.mxu1 %v9800_v23  ;;  %v15501_v46 = vld [vmem:[#allocation19_spill] sm:$0xff] }
 0x1df   :  { %9807 = vmatpush3.bf16.msra.mxu0 %v9806_v20  ;;  %4300 = vmatprep.mubr.f32.mxu0 %v15492_v57  ;;  %v15503_v20 = vld [vmem:[#allocation29_spill] sm:$0xff]  ;;  %v15505_v57 = vld [vmem:[#allocation27_spill] sm:$0xff] }
 0x1e0   :  { %9809 = vmatprep.subr.bf16.mxu0 %v9808_v30  ;;  %v9828_v23 = vpack.c.bf16 %v15503_v20, %v12799_v51 }
 0x1e1   :  { %9803 = vmatpush3.bf16.msra.mxu1 %v9802_v33 }
 0x1e2   :  { %9837 = vmatprep.subr.bf16.mxu1 %v12603_v61 }
 0x1e3   :  { %9811 = vmatpush3.bf16.msra.mxu0 %v9810_v11  ;;  %v15504_v11 = vld [vmem:[#allocation13_spill] sm:$0xff] }
 0x1e4   :  { %9813 = vmatprep.subr.bf16.mxu0 %v9812_v32  ;;  %4165 = vmatmul.mubr.f32.vlgmr.msra.gmra.mrb[24].mxu1 %v12852_v36  ;;  %v4740_v36 = vand.u32 4294901760, %v13006_v6 }
 0x1e5   :  { %9839 = vmatpush3.bf16.msra.mxu1 %v12605_v45  ;;  %4407 = vmatprep.mubr.f32.mxu1 %v15495_v31 }
 0x1e6   :  { %9841 = vmatprep.subr.bf16.mxu1 %v12613_v13 }
 0x1e7   :  { %9815 = vmatpush3.bf16.msra.mxu0 %v9814_v47  ;;  %v9830_v47 = vpack.c.bf16 %v12845_v17, %v12823_v16 }
 0x1e8   :  { %9817 = vmatprep.subr.bf16.mxu0 %v9816_v25  ;;  %v9832_v25 = vpack.c.bf16 %v12865_v54, %v12860_v59 }
 0x1e9   :  { %9843 = vmatpush3.bf16.msra.mxu1 %v12615_v41 }
 0x1ea   :  { %9845 = vmatprep.subr.bf16.mxu1 %v12629_v14 }
 0x1eb   :  { %9819 = vmatpush3.bf16.msra.mxu0 %v9818_v3  ;;  %v15506_v3 = vld [vmem:[#allocation18_spill] sm:$0xff] }
 0x1ec   :  { %9821 = vmatprep.subr.bf16.mxu0 %v9820_v4  ;;  %v15507_v4 = vld [vmem:[#allocation26_spill] sm:$0xff] }
 0x1ed   :  { %9847 = vmatpush3.bf16.msra.mxu1 %v15500_v38 }
 0x1ee   :  { %9849 = vmatprep.subr.bf16.mxu1 %v15501_v46 }
 0x1ef   :  { %9823 = vmatpush3.bf16.msra.mxu0 %v9822_v42  ;;  %v9834_v42 = vpack.c.bf16 %v12886_v48, %v12881_v62 }
 0x1f0   :  { %9825 = vmatprep.subr.bf16.mxu0 %v9824_v37 }
 0x1f1   :  { %v7744_v30 = vpop.f32.mrb[12].mxu0  ;;  %9851 = vmatpush3.bf16.msra.mxu1 %v15504_v11 }
 0x1f2   :  { %v7745_v33 = vpop.f32.mrb[13].mxu0  ;;  %9853 = vmatprep.subr.bf16.mxu1 %v15505_v57 }
 0x1f3   :  { %v7746_v32 = vadd.f32 %v7745_v33, %v7744_v30  ;;  %9827 = vmatpush3.bf16.msra.mxu0 %v9826_v0  ;;  %v15508_v0 = vand.u32 4294901760, %v12509_v26  ;;  %v15509_v30 = vand.u32 4294901760, %v12517_v8  ;;  %v15510_v26 = vand.u32 4294901760, %v12524_v43 }
 0x1f4   :  { %9829 = vmatprep.subr.bf16.mxu0 %v9828_v23  ;;  %v13004_v23 = vld [vmem:[#allocation5 + $0x580] sm:$0xff]  ;;  %v15511_v8 = vand.u32 4294901760, %v12527_v19  ;;  %v15514_v43 = vand.u32 4294901760, %v12624_v44  ;;  %v15515_v19 = vand.u32 4294901760, %v12626_v10  ;;  %v15519_v44 = vand.u32 4294901760, %v15493_v21 }
 0x1f5   :  { %v2211_v31 = vadd.f32 %v7746_v32, %v2099_v24  ;;  %9855 = vmatpush3.bf16.msra.mxu1 %v15506_v3  ;;  %v9868_v33 = vpack.c.bf16 %v15509_v30, %v15508_v0  ;;  %v13009_v32 = vld [vmem:[#allocation5 + $0x500] sm:$0xff]  ;;  %v4737_v0 = vand.u32 4294901760, %v13004_v23  ;;  %v15520_v10 = vand.u32 4294901760, %v15494_v53 }
 0x1f6   :  { %9857 = vmatprep.subr.bf16.mxu1 %v15507_v4  ;;  %v7779_v37 = vpop.f32.mrb[12].mxu1  ;;  %v15524_v21 = vand.u32 4294901760, %v15497_v5  ;;  %v15525_v53 = vand.u32 4294901760, %v12705_v63  ;;  %v15530_v5 = vand.u32 4294901760, %v15499_v56  ;;  %v15536_v56 = vand.u32 4294901760, %v12845_v17 }
 0x1f7   :  { %9831 = vmatpush3.bf16.msra.mxu0 %v9830_v47  ;;  %v7780_v55 = vpop.f32.mrb[13].mxu1  ;;  %v13011_v47 = vld [vmem:[#allocation5 + $0x508] sm:$0xff]  ;;  %v15539_v17 = vand.u32 4294901760, %v12865_v54 }
 0x1f8   :  { %9833 = vmatprep.subr.bf16.mxu0 %v9832_v25  ;;  %v7781_v24 = vadd.f32 %v7780_v55, %v7779_v37  ;;  %v9870_v25 = vpack.c.bf16 %v15511_v8, %v15510_v26  ;;  %v15512_v55 = vand.u32 4294901760, %v12594_v60  ;;  %v15513_v37 = vand.u32 4294901760, %v12598_v12  ;;  %v15518_v8 = vld [vmem:[#allocation22_spill] sm:$0xff] }
 0x1f9   :  { %9859 = vmatpush3.bf16.msra.mxu1 %v12773_v40  ;;  %v9874_v60 = vpack.c.bf16 %v15515_v19, %v15514_v43  ;;  %v13036_v12 = vsub.f32 %v13004_v23, %v4737_v0  ;;  %v15523_v43 = vand.u32 4294901760, %v15496_v18  ;;  %v15529_v18 = vand.u32 4294901760, %v15498_v9 }
 0x1fa   :  { %9861 = vmatprep.subr.bf16.mxu1 %v12905_v27  ;;  %v13019_v30 = vadd.f32 %v7781_v24, %v2211_v31  ;;  %v9872_v7 = vpack.c.bf16 %v15513_v37, %v15512_v55  ;;  %v4692_v27 = vand.u32 4294901760, %v13011_v47  ;;  %v218_v31 = vld [vmem:[#allocation5 + $0x590] sm:$0xff]  ;;  %v15517_v24 = vand.u32 4294901760, %v12635_v1  ;;  %v219_v55 = vld [vmem:[#allocation5 + $0x598] sm:$0xff] }
 0x1fb   :  { %9835 = vmatpush3.bf16.msra.mxu0 %v9834_v42  ;;  %v4689_v42 = vand.u32 4294901760, %v13009_v32  ;;  %v9878_v37 = vpack.c.bf16 %v15520_v10, %v15519_v44  ;;  %v15522_v1 = vand.u32 4294901760, %v12680_v15  ;;  %v9882_v19 = vpack.c.bf16 %v15524_v21, %v15523_v43  ;;  %v203_v44 = vld [vmem:[#allocation5 + $0x518] sm:$0xff] }
 0x1fc   :  { %9869 = vmatprep.subr.bf16.mxu0 %v9868_v33  ;;  %v15516_v33 = vand.u32 4294901760, %v12633_v28  ;;  %v15521_v28 = vand.u32 4294901760, %v12666_v39  ;;  %v15527_v39 = vand.u32 4294901760, %v12733_v22  ;;  %v15528_v15 = vand.u32 4294901760, %v12745_v29 }
 0x1fd   :  { %9863 = vmatpush3.bf16.msra.mxu1 %v12909_v35  ;;  %v13051_v23 = vsub.f32 %v13009_v32, %v4689_v42  ;;  %v15526_v32 = vand.u32 4294901760, %v12708_v49  ;;  %v13080_v63 = vpack.c.bf16 %v15530_v5, %v15529_v18  ;;  %v4746_v49 = vand.u32 4294901760, %v219_v55 }
 0x1fe   :  { %4303 = vmatmul.mubr.f32.vlgmr.msra.gmra.mrb[26].mxu0 %v12889_v50  ;;  %9865 = vmatprep.subr.bf16.mxu1 %v12932_v58  ;;  %v9876_v26 = vpack.c.bf16 %v15517_v24, %v15516_v33  ;;  %v4743_v24 = vand.u32 4294901760, %v218_v31  ;;  %v13074_v10 = vpack.c.bf16 %v15528_v15, %v15527_v39  ;;  %v15533_v22 = vand.u32 4294901760, %v12799_v51 }
 0x1ff   :  { %9871 = vmatpush3.bf16.msra.mxu0 %v9870_v25  ;;  %4577 = vmatprep.mubr.f32.mxu0 %v15518_v8  ;;  %v13044_v25 = vsub.f32 %v13006_v6, %v4740_v36  ;;  %v9880_v6 = vpack.c.bf16 %v15522_v1, %v15521_v28  ;;  %v9884_v33 = vpack.c.bf16 %v15526_v32, %v15525_v53  ;;  %v14956_v28 = vand.u32 4294901760, %v13036_v12  ;;  %v220_v53 = vld [vmem:[#allocation5 + $0x5a0] sm:$0xff] }
 0x200   :  { %9873 = vmatprep.subr.bf16.mxu0 %v9872_v7  ;;  %v13054_v7 = vsub.f32 %v13011_v47, %v4692_v27  ;;  %v202_v47 = vld [vmem:[#allocation5 + $0x510] sm:$0xff]  ;;  %v15534_v29 = vand.u32 4294901760, %v15503_v20  ;;  %v15535_v9 = vand.u32 4294901760, %v12823_v16  ;;  %v4698_v39 = vand.u32 4294901760, %v203_v44 }
 0x201   :  { %9867 = vmatpush3.bf16.msra.mxu1 %v12949_v34  ;;  %v4695_v32 = vand.u32 4294901760, %v202_v47  ;;  %v14950_v51 = vand.u32 4294901760, %v13051_v23  ;;  %v15538_v16 = vand.u32 4294901760, %v12860_v59  ;;  %v15540_v18 = vand.u32 4294901760, %v12881_v62  ;;  %v204_v62 = vld [vmem:[#allocation5 + $0x520] sm:$0xff] }
 0x202   :  { %9901 = vmatprep.subr.bf16.mxu1 %v12603_v61  ;;  %v15532_v61 = vand.u32 4294901760, %v15502_v52  ;;  %v13093_v43 = vpack.c.bf16 %v15534_v29, %v15533_v22  ;;  %v13099_v21 = vpack.c.bf16 %v15536_v56, %v15535_v9  ;;  %v15537_v52 = vand.u32 4294901760, %v12889_v50  ;;  %v205_v22 = vld [vmem:[#allocation5 + $0x528] sm:$0xff] }
 0x203   :  { %9875 = vmatpush3.bf16.msra.mxu0 %v9874_v60  ;;  %v15531_v60 = vand.u32 4294901760, %v12775_v2  ;;  %v14952_v2 = vand.u32 4294901760, %v13044_v25  ;;  %v14949_v20 = vand.u32 4294901760, %v13054_v7  ;;  %v13111_v15 = vpack.c.bf16 %v15539_v17, %v15538_v16 }
 0x204   :  { %9877 = vmatprep.subr.bf16.mxu0 %v9876_v26  ;;  %v221_v26 = vld [vmem:[#allocation5 + $0x5a8] sm:$0xff]  ;;  %4411 = vmatmul.mubr.f32.vlgmr.msra.gmra.mrb[26].mxu1 %v15537_v52  ;;  %v15541_v5 = vand.u32 4294901760, %v12886_v48  ;;  %v4749_v59 = vand.u32 4294901760, %v220_v53  ;;  %v4916_v54 = vsub.f32 %v13036_v12, %v14956_v28  ;;  %v13128_v48 = vpack.c.bf16 %v4740_v36, %v4737_v0 }
 0x205   :  { %v13087_v1 = vpack.c.bf16 %v15532_v61, %v15531_v60  ;;  %9903 = vmatpush3.bf16.msra.mxu1 %v12605_v45  ;;  %v13119_v60 = vsub.f32 %v218_v31, %v4743_v24  ;;  %4681 = vmatprep.mubr.f32.mxu1 %v15518_v8  ;;  %v13123_v45 = vsub.f32 %v219_v55, %v4746_v49  ;;  %v4752_v61 = vand.u32 4294901760, %v221_v26 }
 0x206   :  { %v13117_v50 = vpack.c.bf16 %v15541_v5, %v15540_v18  ;;  %9905 = vmatprep.subr.bf16.mxu1 %v12613_v13  ;;  %v13130_v31 = vpack.c.bf16 %v4692_v27, %v4689_v42  ;;  %v4923_v8 = vsub.f32 %v13044_v25, %v14952_v2  ;;  %v15542_v13 = vld [vmem:[#allocation11_spill] sm:$0xff]  ;;  %v13138_v9 = vpack.c.bf16 %v4746_v49, %v4743_v24  ;;  %v222_v24 = vld [vmem:[#allocation5 + $0x5b0] sm:$0xff]  ;;  %v223_v49 = vld [vmem:[#allocation5 + $0x5b8] sm:$0xff] }
 0x207   :  { %9879 = vmatpush3.bf16.msra.mxu0 %v9878_v37  ;;  %v15543_v55 = vsub.s32 3, %v15542_v13  ;;  %v15544_v37 = vld [vmem:[#allocation12_spill] sm:$0xff]  ;;  %v13140_v56 = vpack.c.bf16 %v4698_v39, %v4695_v32  ;;  %v4811_v36 = vsub.f32 %v13054_v7, %v14949_v20  ;;  %v13149_v27 = vsub.f32 %v202_v47, %v4695_v32  ;;  %v207_v20 = vld [vmem:[#allocation5 + $0x538] sm:$0xff] }
 0x208   :  { %9881 = vmatprep.subr.bf16.mxu0 %v9880_v6  ;;  %v4804_v6 = vsub.f32 %v13051_v23, %v14950_v51  ;;  %v13151_v0 = vsub.f32 %v203_v44, %v4698_v39  ;;  %v4701_v42 = vand.u32 4294901760, %v204_v62  ;;  %v4704_v52 = vand.u32 4294901760, %v205_v22 }
 0x209   :  { %v345_v29 = vrot.slane %v15544_v37, %v15543_v55  ;;  %9907 = vmatpush3.bf16.msra.mxu1 %v12615_v41  ;;  %v13154_v16 = vpack.c.bf16 %v4752_v61, %v4749_v59  ;;  %v4917_v17 = vand.u32 4294901760, %v4916_v54  ;;  %v14951_v18 = vand.u32 4294901760, %v13119_v60 }
 0x20a   :  { %9909 = vmatprep.subr.bf16.mxu1 %v12629_v14  ;;  %v14955_v5 = vand.u32 4294901760, %v13123_v45  ;;  %v13158_v41 = vsub.f32 %v220_v53, %v4749_v59  ;;  %v13160_v47 = vsub.f32 %v221_v26, %v4752_v61  ;;  %v4924_v44 = vand.u32 4294901760, %v4923_v8  ;;  %v206_v14 = vld [vmem:[#allocation5 + $0x530] sm:$0xff]  ;;  %v224_v26 = vld [vmem:[#allocation5 + $0x5c0] sm:$0xff] }
 0x20b   :  { %9883 = vmatpush3.bf16.msra.mxu0 %v9882_v19  ;;  %v13162_v32 = vand.u32 4294901760, %v345_v29  ;;  %v4805_v39 = vand.u32 4294901760, %v4804_v6  ;;  %v4812_v55 = vand.u32 4294901760, %v4811_v36  ;;  %v4755_v19 = vand.u32 4294901760, %v222_v24  ;;  %v225_v36 = vld [vmem:[#allocation5 + $0x5c8] sm:$0xff] }
 0x20c   :  { %9885 = vmatprep.subr.bf16.mxu0 %v9884_v33  ;;  %v4758_v37 = vand.u32 4294901760, %v223_v49  ;;  %v13165_v54 = vpack.c.bf16 %v4704_v52, %v4701_v42  ;;  %v13167_v51 = vsub.f32 %v204_v62, %v4701_v42  ;;  %v14953_v33 = vand.u32 4294901760, %v13149_v27 }
 0x20d   :  { %15545 = vst [vmem:[#allocation25_spill] sm:$0xff] %v13162_v32  ;;  %9911 = vmatpush3.bf16.msra.mxu1 %v15500_v38  ;;  %v14954_v53 = vand.u32 4294901760, %v13151_v0  ;;  %v13173_v59 = vsub.f32 %v205_v22, %v4704_v52  ;;  %v4930_v61 = vsub.f32 %v13119_v60, %v14951_v18  ;;  %v4937_v38 = vsub.f32 %v13123_v45, %v14955_v5 }
 0x20e   :  { %15546 = vst [vmem:[#allocation21_spill] sm:$0xff] %v13165_v54  ;;  %15547 = vst [vmem:[#allocation24_spill] sm:$0xff] %v13167_v51  ;;  %9913 = vmatprep.subr.bf16.mxu1 %v15501_v46  ;;  %v13182_v62 = vpack.c.bf16 %v4924_v44, %v4917_v17  ;;  %v4707_v8 = vand.u32 4294901760, %v206_v14  ;;  %v4710_v6 = vand.u32 4294901760, %v207_v20  ;;  %v13187_v22 = vpack.c.bf16 %v4812_v55, %v4805_v39 }
 0x20f   :  { %9887 = vmatpush3.bf16.msra.mxu0 %v13074_v10  ;;  %15548 = vst [vmem:[#allocation20_spill] sm:$0xff] %v13173_v59  ;;  %v13185_v10 = vsub.f32 %v345_v29, %v13162_v32  ;;  %v13189_v42 = vpack.c.bf16 %v4758_v37, %v4755_v19  ;;  %v13191_v52 = vsub.f32 %v222_v24, %v4755_v19  ;;  %v4761_v18 = vand.u32 4294901760, %v224_v26 }
 0x210   :  { %9889 = vmatprep.subr.bf16.mxu0 %v13080_v63  ;;  %v4818_v63 = vsub.f32 %v13149_v27, %v14953_v33  ;;  %v4825_v29 = vsub.f32 %v13151_v0, %v14954_v53  ;;  %v14960_v17 = vand.u32 4294901760, %v13158_v41  ;;  %v14959_v44 = vand.u32 4294901760, %v13160_v47 }
 0x211   :  { %v7814_v46 = vpop.f32.mrb[14].mxu0  ;;  %15549 = vst [vmem:[#allocation14_spill] sm:$0xff] %v13189_v42  ;;  %9915 = vmatpush3.bf16.msra.mxu1 %v15504_v11  ;;  %v4931_v24 = vand.u32 4294901760, %v4930_v61  ;;  %v4938_v55 = vand.u32 4294901760, %v4937_v38  ;;  %v4764_v11 = vand.u32 4294901760, %v225_v36  ;;  %v13205_v19 = vsub.f32 %v223_v49, %v4758_v37  ;;  %v208_v38 = vld [vmem:[#allocation5 + $0x540] sm:$0xff] }
 0x212   :  { %v7815_v2 = vpop.f32.mrb[15].mxu0  ;;  %9917 = vmatprep.subr.bf16.mxu1 %v15505_v57  ;;  %v14958_v33 = vand.u32 4294901760, %v13167_v51  ;;  %v14957_v53 = vand.u32 4294901760, %v13173_v59  ;;  %v14961_v5 = vand.u32 4294901760, %v13185_v10  ;;  %v13215_v57 = vsub.f32 %v207_v20, %v4710_v6 }
 0x213   :  { %v7816_v39 = vadd.f32 %v7815_v2, %v7814_v46  ;;  %9891 = vmatpush3.bf16.msra.mxu0 %v13087_v1  ;;  %v13211_v2 = vpack.c.bf16 %v4710_v6, %v4707_v8  ;;  %v13213_v1 = vsub.f32 %v206_v14, %v4707_v8  ;;  %v4819_v61 = vand.u32 4294901760, %v4818_v63  ;;  %v227_v63 = vld [vmem:[#allocation5 + $0x5d8] sm:$0xff] }
 0x214   :  { %9893 = vmatprep.subr.bf16.mxu0 %v13093_v43  ;;  %15552 = vst [vmem:[#allocation16_spill] sm:$0xff] %v13215_v57  ;;  %v4826_v43 = vand.u32 4294901760, %v4825_v29  ;;  %v4944_v49 = vsub.f32 %v13158_v41, %v14960_v17  ;;  %v4951_v37 = vsub.f32 %v13160_v47, %v14959_v44  ;;  %v13226_v20 = vpack.c.bf16 %v4938_v55, %v4931_v24 }
 0x215   :  { %v2581_v28 = vadd.f32 %v7816_v39, %v13019_v30  ;;  %15550 = vst [vmem:[#allocation23_spill] sm:$0xff] %v13211_v2  ;;  %15551 = vst [vmem:[#allocation15_spill] sm:$0xff] %v13213_v1  ;;  %9919 = vmatpush3.bf16.msra.mxu1 %v15506_v3  ;;  %v209_v30 = vld [vmem:[#allocation5 + $0x548] sm:$0xff]  ;;  %v13228_v14 = vpack.c.bf16 %v4764_v11, %v4761_v18  ;;  %v13230_v3 = vsub.f32 %v224_v26, %v4761_v18 }
 0x216   :  { %9921 = vmatprep.subr.bf16.mxu1 %v15507_v4  ;;  %v13233_v6 = vsub.f32 %v225_v36, %v4764_v11  ;;  %v4832_v46 = vsub.f32 %v13167_v51, %v14958_v33  ;;  %v226_v4 = vld [vmem:[#allocation5 + $0x5d0] sm:$0xff]  ;;  %v4787_v18 = vsub.f32 %v13185_v10, %v14961_v5  ;;  %v4713_v29 = vand.u32 4294901760, %v208_v38  ;;  %v15554_v33 = vld [vmem:[#allocation30_spill] sm:$0xff] }
 0x217   :  { %9895 = vmatpush3.bf16.msra.mxu0 %v13099_v21  ;;  %15553 = vst [vmem:[#allocation19_spill] sm:$0xff] %v13228_v14  ;;  %v7849_v8 = vpop.f32.mrb[14].mxu1  ;;  %v4839_v21 = vsub.f32 %v13173_v59, %v14957_v53  ;;  %v4716_v39 = vand.u32 4294901760, %v209_v30  ;;  %v13247_v55 = vpack.c.bf16 %v4826_v43, %v4819_v61  ;;  %v4945_v11 = vand.u32 4294901760, %v4944_v49  ;;  %v210_v5 = vld [vmem:[#allocation5 + $0x550] sm:$0xff]  ;;  %v211_v59 = vld [vmem:[#allocation5 + $0x558] sm:$0xff] }
 0x218   :  { %9897 = vmatprep.subr.bf16.mxu0 %v13111_v15  ;;  %v7850_v26 = vpop.f32.mrb[15].mxu1  ;;  %v4952_v53 = vand.u32 4294901760, %v4951_v37  ;;  %v4767_v44 = vand.u32 4294901760, %v226_v4  ;;  %v4770_v17 = vand.u32 4294901760, %v227_v63  ;;  %v14966_v51 = vand.u32 4294901760, %v13213_v1  ;;  %v15558_v15 = vld [vmem:[#allocation28_spill] sm:$0xff] }
 0x219   :  { %v7851_v24 = vadd.f32 %v7850_v26, %v7849_v8  ;;  %9923 = vmatpush3.bf16.msra.mxu1 %v12773_v40  ;;  %v4833_v40 = vand.u32 4294901760, %v4832_v46  ;;  %v4840_v61 = vand.u32 4294901760, %v4839_v21  ;;  %v4788_v43 = vand.u32 4294901760, %v4787_v18 }
 0x21a   :  { %9925 = vmatprep.subr.bf16.mxu1 %v15554_v33  ;;  %v13256_v49 = vpack.c.bf16 %v4716_v39, %v4713_v29  ;;  %v15556_v33 = vand.u32 4294901760, %v13191_v52  ;;  %v15557_v8 = vand.u32 4294901760, %v13205_v19  ;;  %v13270_v46 = vsub.f32 %v209_v30, %v4716_v39  ;;  %v13284_v30 = vld [vmem:[#allocation5 + $0x5e8] sm:$0xff] }
 0x21b   :  { %9899 = vmatpush3.bf16.msra.mxu0 %v13117_v50  ;;  %v13253_v36 = vadd.f32 %v7851_v24, %v2581_v28  ;;  %v13258_v50 = vsub.f32 %v208_v38, %v4713_v29  ;;  %v13268_v28 = vpack.c.bf16 %v4952_v53, %v4945_v11  ;;  %v4719_v21 = vand.u32 4294901760, %v210_v5  ;;  %v13272_v38 = vld [vmem:[#allocation5 + $0x5e0] sm:$0xff] }
 0x21c   :  { %9933 = vmatprep.subr.bf16.mxu0 %v13128_v48  ;;  %15555 = vst [vmem:[#allocation17_spill] sm:$0xff] %v13256_v49  ;;  %v4958_v37 = vsub.f32 %v13191_v52, %v15556_v33  ;;  %v4965_v26 = vsub.f32 %v13205_v19, %v15557_v8  ;;  %15559 = vst [vmem:[#allocation29_spill] sm:$0xff] %v13270_v46  ;;  %v4722_v18 = vand.u32 4294901760, %v211_v59 }
 0x21d   :  { %9927 = vmatpush3.bf16.msra.mxu1 %v12909_v35  ;;  %v13276_v29 = vsub.f32 %v226_v4, %v4767_v44  ;;  %v4846_v24 = vsub.f32 %v13213_v1, %v14966_v51  ;;  %v15561_v35 = vand.u32 4294901760, %v13215_v57  ;;  %v13287_v39 = vpack.c.bf16 %v4840_v61, %v4833_v40 }
 0x21e   :  { %4579 = vmatmul.mubr.f32.vlgmr.msra.gmra.mrb[28].mxu0 %v15558_v15  ;;  %9929 = vmatprep.subr.bf16.mxu1 %v12932_v58  ;;  %v13289_v11 = vpack.c.bf16 %v4770_v17, %v4767_v44  ;;  %v13291_v33 = vsub.f32 %v227_v63, %v4770_v17  ;;  %v13293_v58 = vld [vmem:[#allocation5 + $0x560] sm:$0xff]  ;;  %v4959_v4 = vand.u32 4294901760, %v4958_v37  ;;  %v4966_v8 = vand.u32 4294901760, %v4965_v26  ;;  %v13304_v63 = vld [vmem:[#allocation5 + $0x568] sm:$0xff]  ;;  %v13314_v26 = vld [vmem:[#allocation5 + $0x5f0] sm:$0xff] }
 0x21f   :  { %9935 = vmatpush3.bf16.msra.mxu0 %v13130_v31  ;;  %15560 = vst [vmem:[#allocation13_spill] sm:$0xff] %v13276_v29  ;;  %v4853_v53 = vsub.f32 %v13215_v57, %v15561_v35  ;;  %4789 = vmatprep.mubr.f32.mxu0 %v4788_v43  ;;  %v14971_v51 = vand.u32 4294901760, %v13272_v38  ;;  %v14972_v1 = vand.u32 4294901760, %v13230_v3  ;;  %v13298_v35 = vpack.c.bf16 %v4722_v18, %v4719_v21  ;;  %v13354_v37 = vld [vmem:[#allocation5 + $0x570] sm:$0xff] }
 0x220   :  { %9937 = vmatprep.subr.bf16.mxu0 %v13138_v9  ;;  %15562 = vst [vmem:[#allocation27_spill] sm:$0xff] %v13289_v11  ;;  %15563 = vst [vmem:[#allocation18_spill] sm:$0xff] %v13291_v33  ;;  %v13300_v57 = vsub.f32 %v210_v5, %v4719_v21  ;;  %v14973_v44 = vand.u32 4294901760, %v13284_v30  ;;  %v13308_v40 = vsub.f32 %v211_v59, %v4722_v18  ;;  %v4847_v61 = vand.u32 4294901760, %v4846_v24  ;;  %v13316_v21 = vld [vmem:[#allocation5 + $0x5f8] sm:$0xff] }
 0x221   :  { %9931 = vmatpush3.bf16.msra.mxu1 %v12949_v34  ;;  %v4854_v43 = vand.u32 4294901760, %v4853_v53  ;;  %v14974_v34 = vand.u32 4294901760, %v13293_v58  ;;  %v9976_v59 = vpack.c.bf16 %v4966_v8, %v4959_v4  ;;  %v13324_v18 = vsub.f32 %v13272_v38, %v14971_v51  ;;  %v13339_v8 = vld [vmem:[#allocation2 + $0x8] sm:$0xff] }
 0x222   :  { %9965 = vmatprep.subr.bf16.mxu1 %v13182_v62  ;;  %15564 = vst [vmem:[#allocation26_spill] sm:$0xff] %v13308_v40  ;;  %v4972_v24 = vsub.f32 %v13230_v3, %v14972_v1  ;;  %v4728_v53 = vand.u32 4294901760, %v13304_v63  ;;  %v13334_v62 = vsub.f32 %v13284_v30, %v14973_v44  ;;  %15567 = vst [vmem:[#allocation12_spill] sm:$0xff] %v13339_v8  ;;  %v15568_v51 = vsub.s32 2, %v15542_v13  ;;  %v13356_v5 = vld [vmem:[#allocation5 + $0x578] sm:$0xff] }
 0x223   :  { %9939 = vmatpush3.bf16.msra.mxu0 %v13140_v56  ;;  %v13350_v1 = vsub.f32 %v13293_v58, %v14974_v34  ;;  %v15571_v34 = vand.u32 4294901760, %v13276_v29  ;;  %v15572_v44 = vand.u32 4294901760, %v13291_v33 }
 0x224   :  { %9941 = vmatprep.subr.bf16.mxu0 %v13154_v16  ;;  %4683 = vmatmul.mubr.f32.vlgmr.msra.gmra.mrb[28].mxu1 %v15558_v15  ;;  %15565 = vst [vmem:[#allocation22_spill] sm:$0xff] %v13334_v62  ;;  %v15566_v15 = vand.u32 4294901760, %v13233_v6  ;;  %v341_v17 = vrot.slane %v13339_v8, %v15568_v51  ;;  %v15569_v51 = vand.u32 4294901760, %v13258_v50  ;;  %v4973_v13 = vand.u32 4294901760, %v4972_v24 }
 0x225   :  { %9967 = vmatpush3.bf16.msra.mxu1 %v13187_v22  ;;  %5025 = vmatprep.mubr.f32.mxu1 %v13162_v32  ;;  %v9978_v22 = vpack.c.bf16 %v4854_v43, %v4847_v61  ;;  %v15570_v61 = vand.u32 4294901760, %v13270_v46  ;;  %v4993_v8 = vsub.f32 %v13291_v33, %v15572_v44  ;;  %v13372_v32 = vsub.f32 %v13304_v63, %v4728_v53 }
 0x226   :  { %v4979_v4 = vsub.f32 %v13233_v6, %v15566_v15  ;;  %9969 = vmatprep.subr.bf16.mxu1 %v13226_v20  ;;  %v4860_v20 = vsub.f32 %v13258_v50, %v15569_v51  ;;  %v4986_v15 = vsub.f32 %v13276_v29, %v15571_v34  ;;  %v15574_v63 = vand.u32 4294901760, %v13314_v26 }
 0x227   :  { %9943 = vmatpush3.bf16.msra.mxu0 %v13165_v54  ;;  %v4867_v43 = vsub.f32 %v13270_v46, %v15570_v61  ;;  %v13379_v46 = vand.u32 4294901760, %v341_v17  ;;  %v15578_v54 = vand.u32 4294901760, %v13354_v37  ;;  %v15586_v29 = vand.u32 4294901760, %v13350_v1 }
 0x228   :  { %9945 = vmatprep.subr.bf16.mxu0 %v13189_v42  ;;  %v4980_v44 = vand.u32 4294901760, %v4979_v4  ;;  %v13387_v24 = vsub.f32 %v13314_v26, %v15574_v63  ;;  %v4861_v34 = vand.u32 4294901760, %v4860_v20  ;;  %v4987_v42 = vand.u32 4294901760, %v4986_v15 }
 0x229   :  { %9971 = vmatpush3.bf16.msra.mxu1 %v13247_v55  ;;  %15573 = vst [vmem:[#allocation30_spill] sm:$0xff] %v13379_v46  ;;  %v15575_v55 = vand.u32 4294901760, %v13316_v21  ;;  %v4868_v51 = vand.u32 4294901760, %v4867_v43  ;;  %v15577_v63 = vand.u32 4294901760, %v13308_v40  ;;  %v13408_v20 = vsub.f32 %v13354_v37, %v15578_v54 }
 0x22a   :  { %9973 = vmatprep.subr.bf16.mxu1 %v13268_v28  ;;  %v15576_v28 = vand.u32 4294901760, %v13300_v57  ;;  %v13416_v43 = vsub.f32 %v341_v17, %v13379_v46  ;;  %v15582_v17 = vand.u32 4294901760, %v13272_v38 }
 0x22b   :  { %9947 = vmatpush3.bf16.msra.mxu0 %v13211_v2  ;;  %v13392_v61 = vsub.f32 %v13316_v21, %v15575_v55  ;;  %v4994_v2 = vand.u32 4294901760, %v4993_v8  ;;  %v4881_v33 = vsub.f32 %v13308_v40, %v15577_v63  ;;  %v15579_v8 = vand.u32 4294901760, %v13356_v5 }
 0x22c   :  { %9949 = vmatprep.subr.bf16.mxu0 %v13228_v14  ;;  %v4874_v4 = vsub.f32 %v13300_v57, %v15576_v28  ;;  %v15580_v28 = vand.u32 4294901760, %v13324_v18  ;;  %v15581_v55 = vand.u32 4294901760, %v13334_v62  ;;  %v15583_v14 = vand.u32 4294901760, %v13284_v30 }
 0x22d   :  { %9975 = vmatpush3.bf16.msra.mxu1 %v13287_v39  ;;  %v13413_v15 = vsub.f32 %v13356_v5, %v15579_v8  ;;  %v9980_v39 = vpack.c.bf16 %v4980_v44, %v4973_v13  ;;  %v9982_v13 = vpack.c.bf16 %v4868_v51, %v4861_v34  ;;  %v9984_v44 = vpack.c.bf16 %v4994_v2, %v4987_v42 }
 0x22e   :  { %v5000_v63 = vsub.f32 %v13324_v18, %v15580_v28  ;;  %9977 = vmatprep.subr.bf16.mxu1 %v9976_v59  ;;  %v5007_v54 = vsub.f32 %v13334_v62, %v15581_v55  ;;  %v13432_v40 = vpack.c.bf16 %v15583_v14, %v15582_v17  ;;  %v15585_v28 = vand.u32 4294901760, %v13293_v58 }
 0x22f   :  { %9951 = vmatpush3.bf16.msra.mxu0 %v13256_v49  ;;  %v4875_v55 = vand.u32 4294901760, %v4874_v4  ;;  %v4882_v62 = vand.u32 4294901760, %v4881_v33  ;;  %v4888_v8 = vsub.f32 %v13350_v1, %v15586_v29  ;;  %v15004_v14 = vand.u32 4294901760, %v13416_v43 }
 0x230   :  { %9953 = vmatprep.subr.bf16.mxu0 %v13289_v11  ;;  %15584 = vst [vmem:[#allocation28_spill] sm:$0xff] %v13432_v40  ;;  %v13436_v59 = vpack.c.bf16 %v4728_v53, %v15585_v28  ;;  %v15587_v11 = vand.u32 4294901760, %v13372_v32  ;;  %v5001_v58 = vand.u32 4294901760, %v5000_v63  ;;  %v15003_v53 = vand.u32 4294901760, %v13408_v20 }
 0x231   :  { %v7884_v49 = vpop.f32.mrb[16].mxu0  ;;  %9979 = vmatpush3.bf16.msra.mxu1 %v9978_v22  ;;  %v15002_v42 = vand.u32 4294901760, %v13413_v15  ;;  %v5008_v33 = vand.u32 4294901760, %v5007_v54  ;;  %v15588_v29 = vand.u32 4294901760, %v13387_v24  ;;  %v15590_v34 = vand.u32 4294901760, %v13314_v26 }
 0x232   :  { %v4895_v38 = vsub.f32 %v13372_v32, %v15587_v11  ;;  %v7885_v30 = vpop.f32.mrb[17].mxu0  ;;  %9981 = vmatprep.subr.bf16.mxu1 %v9980_v39  ;;  %v15589_v11 = vand.u32 4294901760, %v13392_v61  ;;  %v15591_v4 = vand.u32 4294901760, %v13316_v21  ;;  %v4889_v39 = vand.u32 4294901760, %v4888_v8 }
 0x233   :  { %v7886_v2 = vadd.f32 %v7885_v30, %v7884_v49  ;;  %9955 = vmatpush3.bf16.msra.mxu0 %v13298_v35  ;;  %v5014_v51 = vsub.f32 %v13387_v24, %v15588_v29  ;;  %v9986_v17 = vpack.c.bf16 %v4882_v62, %v4875_v55  ;;  %v4793_v28 = vsub.f32 %v13416_v43, %v15004_v14 }
 0x234   :  { %v5021_v22 = vsub.f32 %v13392_v61, %v15589_v11  ;;  %9957 = vmatprep.subr.bf16.mxu0 %v13432_v40  ;;  %v13459_v63 = vpack.c.bf16 %v15591_v4, %v15590_v34  ;;  %v4896_v54 = vand.u32 4294901760, %v4895_v38  ;;  %v4902_v30 = vsub.f32 %v13408_v20, %v15003_v53  ;;  %v13533_v53 = vld [vmem:[#allocation5 + $0x688] sm:$0xff] }
 0x235   :  { %v2857_v49 = vadd.f32 %v7886_v2, %v13253_v36  ;;  %9983 = vmatpush3.bf16.msra.mxu1 %v9982_v13  ;;  %v4909_v26 = vsub.f32 %v13413_v15, %v15002_v42  ;;  %v15592_v36 = vand.u32 4294901760, %v13354_v37  ;;  %v15593_v21 = vand.u32 4294901760, %v13356_v5 }
 0x236   :  { %9985 = vmatprep.subr.bf16.mxu1 %v9984_v44  ;;  %v9988_v8 = vpack.c.bf16 %v5008_v33, %v5001_v58  ;;  %v5015_v13 = vand.u32 4294901760, %v5014_v51  ;;  %v5022_v55 = vand.u32 4294901760, %v5021_v22  ;;  %v9996_v2 = vpack.c.bf16 %v13044_v25, %v13036_v12 }
 0x237   :  { %9959 = vmatpush3.bf16.msra.mxu0 %v13436_v59  ;;  %v13476_v62 = vpack.c.bf16 %v15593_v21, %v15592_v36  ;;  %v7919_v38 = vpop.f32.mrb[16].mxu1  ;;  %v9990_v11 = vpack.c.bf16 %v4896_v54, %v4889_v39  ;;  %v4794_v44 = vand.u32 4294901760, %v4793_v28  ;;  %v4903_v4 = vand.u32 4294901760, %v4902_v30  ;;  %v15597_v36 = vld [vmem:[#allocation15_spill] sm:$0xff]  ;;  %v15598_v21 = vld [vmem:[#allocation16_spill] sm:$0xff] }
 0x238   :  { %9961 = vmatprep.subr.bf16.mxu0 %v13459_v63  ;;  %v7920_v29 = vpop.f32.mrb[17].mxu1  ;;  %v4910_v37 = vand.u32 4294901760, %v4909_v26  ;;  %v9998_v5 = vpack.c.bf16 %v13054_v7, %v13051_v23  ;;  %v9992_v58 = vpack.c.bf16 %v5022_v55, %v5015_v13  ;;  %v10000_v51 = vpack.c.bf16 %v13123_v45, %v13119_v60  ;;  %v15599_v55 = vld [vmem:[#allocation29_spill] sm:$0xff] }
 0x239   :  { %v7921_v34 = vadd.f32 %v7920_v29, %v7919_v38  ;;  %9987 = vmatpush3.bf16.msra.mxu1 %v9986_v17  ;;  %v10002_v39 = vpack.c.bf16 %v13151_v0, %v13149_v27  ;;  %v10004_v54 = vpack.c.bf16 %v13160_v47, %v13158_v41  ;;  %v15595_v17 = vld [vmem:[#allocation20_spill] sm:$0xff]  ;;  %v10008_v30 = vpack.c.bf16 %v13205_v19, %v13191_v52 }
 0x23a   :  { %9989 = vmatprep.subr.bf16.mxu1 %v9988_v8  ;;  %v9994_v22 = vpack.c.bf16 %v4910_v37, %v4903_v4  ;;  %v15596_v26 = vand.u32 4294901760, %v13185_v10  ;;  %v10010_v8 = vpack.c.bf16 %v15598_v21, %v15597_v36  ;;  %v10012_v13 = vpack.c.bf16 %v13233_v6, %v13230_v3  ;;  %v15605_v37 = vld [vmem:[#allocation22_spill] sm:$0xff] }
 0x23b   :  { %9963 = vmatpush3.bf16.msra.mxu0 %v13476_v62  ;;  %v2961_v33 = vadd.f32 %v7921_v34, %v2857_v49  ;;  %v15594_v49 = vld [vmem:[#allocation24_spill] sm:$0xff]  ;;  %v10014_v38 = vpack.c.bf16 %v15599_v55, %v13258_v50  ;;  %v15603_v34 = vld [vmem:[#allocation14_spill] sm:$0xff] }
 0x23c   :  { %9997 = vmatprep.subr.bf16.mxu0 %v9996_v2  ;;  %v10006_v28 = vpack.c.bf16 %v15595_v17, %v15594_v49  ;;  %v15601_v2 = vld [vmem:[#allocation18_spill] sm:$0xff] }
 0x23d   :  { %9991 = vmatpush3.bf16.msra.mxu1 %v9990_v11  ;;  %v15602_v11 = vld [vmem:[#allocation21_spill] sm:$0xff] }
 0x23e   :  { %4795 = vmatmul.mubr.f32.vlgmr.msra.gmra.mrb[30].mxu0 %v4794_v44  ;;  %9993 = vmatprep.subr.bf16.mxu1 %v9992_v58  ;;  %v15604_v44 = vld [vmem:[#allocation26_spill] sm:$0xff] }
 0x23f   :  { %9999 = vmatpush3.bf16.msra.mxu0 %v9998_v5  ;;  %5162 = vmatprep.mubr.f32.mxu0 %v13185_v10  ;;  %v15600_v10 = vld [vmem:[#allocation13_spill] sm:$0xff]  ;;  %v10018_v4 = vpack.c.bf16 %v15604_v44, %v13300_v57  ;;  %v10020_v5 = vpack.c.bf16 %v15605_v37, %v13324_v18 }
 0x240   :  { %10001 = vmatprep.subr.bf16.mxu0 %v10000_v51  ;;  %v10016_v29 = vpack.c.bf16 %v15601_v2, %v15600_v10 }
 0x241   :  { %9995 = vmatpush3.bf16.msra.mxu1 %v9994_v22  ;;  %v15606_v22 = vld [vmem:[#allocation23_spill] sm:$0xff] }
 0x242   :  { %10029 = vmatprep.subr.bf16.mxu1 %v13128_v48 }
 0x243   :  { %10003 = vmatpush3.bf16.msra.mxu0 %v10002_v39 }
 0x244   :  { %10005 = vmatprep.subr.bf16.mxu0 %v10004_v54  ;;  %5027 = vmatmul.mubr.f32.vlgmr.msra.gmra.mrb[30].mxu1 %v13379_v46  ;;  %v15607_v54 = vld [vmem:[#allocation19_spill] sm:$0xff]  ;;  %v5602_v46 = vand.u32 4294901760, %v13533_v53 }
 0x245   :  { %10031 = vmatpush3.bf16.msra.mxu1 %v13130_v31  ;;  %5269 = vmatprep.mubr.f32.mxu1 %v15596_v26 }
 0x246   :  { %10033 = vmatprep.subr.bf16.mxu1 %v13138_v9 }
 0x247   :  { %10007 = vmatpush3.bf16.msra.mxu0 %v10006_v28  ;;  %v10022_v28 = vpack.c.bf16 %v13372_v32, %v13350_v1 }
 0x248   :  { %10009 = vmatprep.subr.bf16.mxu0 %v10008_v30  ;;  %v10024_v30 = vpack.c.bf16 %v13392_v61, %v13387_v24 }
 0x249   :  { %10035 = vmatpush3.bf16.msra.mxu1 %v13140_v56 }
 0x24a   :  { %10037 = vmatprep.subr.bf16.mxu1 %v13154_v16 }
 0x24b   :  { %10011 = vmatpush3.bf16.msra.mxu0 %v10010_v8  ;;  %v15608_v8 = vld [vmem:[#allocation17_spill] sm:$0xff] }
 0x24c   :  { %10013 = vmatprep.subr.bf16.mxu0 %v10012_v13  ;;  %v15609_v13 = vld [vmem:[#allocation27_spill] sm:$0xff] }
 0x24d   :  { %10039 = vmatpush3.bf16.msra.mxu1 %v15602_v11 }
 0x24e   :  { %10041 = vmatprep.subr.bf16.mxu1 %v15603_v34 }
 0x24f   :  { %10015 = vmatpush3.bf16.msra.mxu0 %v10014_v38  ;;  %v10026_v38 = vpack.c.bf16 %v13413_v15, %v13408_v20 }
 0x250   :  { %10017 = vmatprep.subr.bf16.mxu0 %v10016_v29 }
 0x251   :  { %v7954_v58 = vpop.f32.mrb[18].mxu0  ;;  %10043 = vmatpush3.bf16.msra.mxu1 %v15606_v22 }
 0x252   :  { %v7955_v51 = vpop.f32.mrb[19].mxu0  ;;  %10045 = vmatprep.subr.bf16.mxu1 %v15607_v54 }
 0x253   :  { %v7956_v39 = vadd.f32 %v7955_v51, %v7954_v58  ;;  %10019 = vmatpush3.bf16.msra.mxu0 %v10018_v4  ;;  %v15610_v4 = vand.u32 4294901760, %v13036_v12  ;;  %v15611_v58 = vand.u32 4294901760, %v13044_v25  ;;  %v15612_v12 = vand.u32 4294901760, %v13051_v23 }
 0x254   :  { %10021 = vmatprep.subr.bf16.mxu0 %v10020_v5  ;;  %v13531_v5 = vld [vmem:[#allocation5 + $0x680] sm:$0xff]  ;;  %v15613_v25 = vand.u32 4294901760, %v13054_v7  ;;  %v15616_v23 = vand.u32 4294901760, %v13149_v27  ;;  %v15617_v7 = vand.u32 4294901760, %v13151_v0  ;;  %v15621_v27 = vand.u32 4294901760, %v15594_v49 }
 0x255   :  { %v3073_v26 = vadd.f32 %v7956_v39, %v2961_v33  ;;  %10047 = vmatpush3.bf16.msra.mxu1 %v15608_v8  ;;  %v10060_v51 = vpack.c.bf16 %v15611_v58, %v15610_v4  ;;  %v13536_v39 = vld [vmem:[#allocation5 + $0x600] sm:$0xff]  ;;  %v5599_v4 = vand.u32 4294901760, %v13531_v5  ;;  %v15622_v0 = vand.u32 4294901760, %v15595_v17 }
 0x256   :  { %10049 = vmatprep.subr.bf16.mxu1 %v15609_v13  ;;  %v15626_v49 = vand.u32 4294901760, %v15598_v21  ;;  %v15627_v17 = vand.u32 4294901760, %v13230_v3  ;;  %v15632_v21 = vand.u32 4294901760, %v15601_v2  ;;  %v15638_v2 = vand.u32 4294901760, %v13372_v32 }
 0x257   :  { %10023 = vmatpush3.bf16.msra.mxu0 %v10022_v28  ;;  %v7989_v29 = vpop.f32.mrb[18].mxu1  ;;  %v13538_v28 = vld [vmem:[#allocation5 + $0x608] sm:$0xff]  ;;  %v15641_v32 = vand.u32 4294901760, %v13392_v61 }
 0x258   :  { %10025 = vmatprep.subr.bf16.mxu0 %v10024_v30  ;;  %v7990_v42 = vpop.f32.mrb[19].mxu1  ;;  %v10062_v30 = vpack.c.bf16 %v15613_v25, %v15612_v12  ;;  %v15620_v25 = vld [vmem:[#allocation25_spill] sm:$0xff] }
 0x259   :  { %v7991_v33 = vadd.f32 %v7990_v42, %v7989_v29  ;;  %10051 = vmatpush3.bf16.msra.mxu1 %v13298_v35  ;;  %v15614_v42 = vand.u32 4294901760, %v13119_v60  ;;  %v15615_v29 = vand.u32 4294901760, %v13123_v45  ;;  %v10066_v60 = vpack.c.bf16 %v15617_v7, %v15616_v23 }
 0x25a   :  { %10053 = vmatprep.subr.bf16.mxu1 %v13432_v40  ;;  %v5554_v40 = vand.u32 4294901760, %v13538_v28  ;;  %v13563_v45 = vsub.f32 %v13531_v5, %v5599_v4  ;;  %v15625_v23 = vand.u32 4294901760, %v15597_v36  ;;  %v15631_v36 = vand.u32 4294901760, %v15600_v10 }
 0x25b   :  { %10027 = vmatpush3.bf16.msra.mxu0 %v10026_v38  ;;  %v13546_v58 = vadd.f32 %v7991_v33, %v3073_v26  ;;  %v10064_v14 = vpack.c.bf16 %v15615_v29, %v15614_v42  ;;  %v5551_v38 = vand.u32 4294901760, %v13536_v39  ;;  %v250_v26 = vld [vmem:[#allocation5 + $0x690] sm:$0xff]  ;;  %v15619_v33 = vand.u32 4294901760, %v13160_v47  ;;  %v251_v42 = vld [vmem:[#allocation5 + $0x698] sm:$0xff] }
 0x25c   :  { %10061 = vmatprep.subr.bf16.mxu0 %v10060_v51  ;;  %v15618_v51 = vand.u32 4294901760, %v13158_v41  ;;  %v10070_v29 = vpack.c.bf16 %v15622_v0, %v15621_v27  ;;  %v15623_v41 = vand.u32 4294901760, %v13191_v52  ;;  %v15624_v47 = vand.u32 4294901760, %v13205_v19  ;;  %v235_v27 = vld [vmem:[#allocation5 + $0x618] sm:$0xff] }
 0x25d   :  { %10055 = vmatpush3.bf16.msra.mxu1 %v13436_v59  ;;  %v13578_v5 = vsub.f32 %v13536_v39, %v5551_v38  ;;  %v10074_v7 = vpack.c.bf16 %v15626_v49, %v15625_v23  ;;  %v15628_v39 = vand.u32 4294901760, %v13233_v6  ;;  %v15629_v52 = vand.u32 4294901760, %v13258_v50 }
 0x25e   :  { %5165 = vmatmul.mubr.f32.vlgmr.msra.gmra.mrb[32].mxu0 %v13416_v43  ;;  %10057 = vmatprep.subr.bf16.mxu1 %v13459_v63  ;;  %v10068_v12 = vpack.c.bf16 %v15619_v33, %v15618_v51  ;;  %v5605_v33 = vand.u32 4294901760, %v250_v26  ;;  %v15630_v19 = vand.u32 4294901760, %v15599_v55  ;;  %v13607_v3 = vpack.c.bf16 %v15632_v21, %v15631_v36 }
 0x25f   :  { %10063 = vmatpush3.bf16.msra.mxu0 %v10062_v30  ;;  %5439 = vmatprep.mubr.f32.mxu0 %v15620_v25  ;;  %v13571_v30 = vsub.f32 %v13533_v53, %v5602_v46  ;;  %v10072_v53 = vpack.c.bf16 %v15624_v47, %v15623_v41  ;;  %v10076_v51 = vpack.c.bf16 %v15628_v39, %v15627_v17  ;;  %v5608_v6 = vand.u32 4294901760, %v251_v42  ;;  %v252_v17 = vld [vmem:[#allocation5 + $0x6a0] sm:$0xff] }
 0x260   :  { %10065 = vmatprep.subr.bf16.mxu0 %v10064_v14  ;;  %v13581_v14 = vsub.f32 %v13538_v28, %v5554_v40  ;;  %v234_v28 = vld [vmem:[#allocation5 + $0x610] sm:$0xff]  ;;  %v13601_v0 = vpack.c.bf16 %v15630_v19, %v15629_v52  ;;  %v15012_v41 = vand.u32 4294901760, %v13563_v45  ;;  %v15635_v50 = vand.u32 4294901760, %v13324_v18 }
 0x261   :  { %10059 = vmatpush3.bf16.msra.mxu1 %v13476_v62  ;;  %v15636_v55 = vand.u32 4294901760, %v15605_v37  ;;  %v15637_v10 = vand.u32 4294901760, %v13350_v1  ;;  %v5557_v39 = vand.u32 4294901760, %v234_v28  ;;  %v5560_v52 = vand.u32 4294901760, %v235_v27 }
 0x262   :  { %10093 = vmatprep.subr.bf16.mxu1 %v13128_v48  ;;  %v15634_v48 = vand.u32 4294901760, %v15604_v44  ;;  %v15639_v44 = vand.u32 4294901760, %v13416_v43  ;;  %v15009_v18 = vand.u32 4294901760, %v13578_v5  ;;  %v15008_v37 = vand.u32 4294901760, %v13581_v14 }
 0x263   :  { %10067 = vmatpush3.bf16.msra.mxu0 %v10066_v60  ;;  %v15633_v60 = vand.u32 4294901760, %v13300_v57  ;;  %v13620_v23 = vpack.c.bf16 %v15636_v55, %v15635_v50  ;;  %v13626_v49 = vpack.c.bf16 %v15638_v2, %v15637_v10  ;;  %v15010_v57 = vand.u32 4294901760, %v13571_v30  ;;  %v237_v50 = vld [vmem:[#allocation5 + $0x628] sm:$0xff] }
 0x264   :  { %10069 = vmatprep.subr.bf16.mxu0 %v10068_v12  ;;  %v253_v12 = vld [vmem:[#allocation5 + $0x6a8] sm:$0xff]  ;;  %5273 = vmatmul.mubr.f32.vlgmr.msra.gmra.mrb[32].mxu1 %v15639_v44  ;;  %v15640_v1 = vand.u32 4294901760, %v13387_v24  ;;  %v15642_v36 = vand.u32 4294901760, %v13408_v20  ;;  %v15643_v21 = vand.u32 4294901760, %v13413_v15  ;;  %v5611_v24 = vand.u32 4294901760, %v252_v17  ;;  %v236_v20 = vld [vmem:[#allocation5 + $0x620] sm:$0xff] }
 0x265   :  { %v13614_v47 = vpack.c.bf16 %v15634_v48, %v15633_v60  ;;  %10095 = vmatpush3.bf16.msra.mxu1 %v13130_v31  ;;  %v13646_v60 = vsub.f32 %v250_v26, %v5605_v33  ;;  %5543 = vmatprep.mubr.f32.mxu1 %v15620_v25  ;;  %v13650_v31 = vsub.f32 %v251_v42, %v5608_v6  ;;  %v5614_v48 = vand.u32 4294901760, %v253_v12 }
 0x266   :  { %v13638_v19 = vpack.c.bf16 %v15641_v32, %v15640_v1  ;;  %v13644_v43 = vpack.c.bf16 %v15643_v21, %v15642_v36  ;;  %10097 = vmatprep.subr.bf16.mxu1 %v13138_v9  ;;  %v5778_v61 = vsub.f32 %v13563_v45, %v15012_v41  ;;  %v13655_v15 = vpack.c.bf16 %v5602_v46, %v5599_v4  ;;  %v15644_v9 = vld [vmem:[#allocation11_spill] sm:$0xff] }
 0x267   :  { %10071 = vmatpush3.bf16.msra.mxu0 %v10070_v29  ;;  %v13657_v26 = vpack.c.bf16 %v5554_v40, %v5551_v38  ;;  %v5785_v25 = vsub.f32 %v13571_v30, %v15010_v57  ;;  %v15645_v42 = vsub.s32 5, %v15644_v9  ;;  %v15646_v29 = vld [vmem:[#allocation12_spill] sm:$0xff]  ;;  %v13665_v10 = vpack.c.bf16 %v5608_v6, %v5605_v33  ;;  %v255_v6 = vld [vmem:[#allocation5 + $0x6b8] sm:$0xff] }
 0x268   :  { %10073 = vmatprep.subr.bf16.mxu0 %v10072_v53  ;;  %v13667_v2 = vpack.c.bf16 %v5560_v52, %v5557_v39  ;;  %v5666_v53 = vsub.f32 %v13578_v5, %v15009_v18  ;;  %v5673_v46 = vsub.f32 %v13581_v14, %v15008_v37  ;;  %v13676_v40 = vsub.f32 %v234_v28, %v5557_v39  ;;  %v254_v33 = vld [vmem:[#allocation5 + $0x6b0] sm:$0xff]  ;;  %v239_v18 = vld [vmem:[#allocation5 + $0x638] sm:$0xff] }
 0x269   :  { %v353_v55 = vrot.slane %v15646_v29, %v15645_v42  ;;  %10099 = vmatpush3.bf16.msra.mxu1 %v13140_v56  ;;  %v13678_v4 = vsub.f32 %v235_v27, %v5560_v52  ;;  %v5563_v38 = vand.u32 4294901760, %v236_v20  ;;  %v5566_v44 = vand.u32 4294901760, %v237_v50 }
 0x26a   :  { %10101 = vmatprep.subr.bf16.mxu1 %v13154_v16  ;;  %v13681_v1 = vpack.c.bf16 %v5614_v48, %v5611_v24  ;;  %v5779_v32 = vand.u32 4294901760, %v5778_v61  ;;  %v15011_v36 = vand.u32 4294901760, %v13646_v60  ;;  %v15015_v21 = vand.u32 4294901760, %v13650_v31  ;;  %v238_v16 = vld [vmem:[#allocation5 + $0x630] sm:$0xff] }
 0x26b   :  { %10075 = vmatpush3.bf16.msra.mxu0 %v10074_v7  ;;  %v13685_v56 = vsub.f32 %v252_v17, %v5611_v24  ;;  %v13687_v28 = vsub.f32 %v253_v12, %v5614_v48  ;;  %v5786_v27 = vand.u32 4294901760, %v5785_v25  ;;  %v13689_v39 = vand.u32 4294901760, %v353_v55  ;;  %v256_v12 = vld [vmem:[#allocation5 + $0x6c0] sm:$0xff] }
 0x26c   :  { %10077 = vmatprep.subr.bf16.mxu0 %v10076_v51  ;;  %v5667_v52 = vand.u32 4294901760, %v5666_v53  ;;  %v5674_v42 = vand.u32 4294901760, %v5673_v46  ;;  %v5617_v7 = vand.u32 4294901760, %v254_v33  ;;  %v5620_v37 = vand.u32 4294901760, %v255_v6  ;;  %v257_v46 = vld [vmem:[#allocation5 + $0x6c8] sm:$0xff] }
 0x26d   :  { %15647 = vst [vmem:[#allocation24_spill] sm:$0xff] %v13689_v39  ;;  %10103 = vmatpush3.bf16.msra.mxu1 %v15602_v11  ;;  %v13692_v61 = vpack.c.bf16 %v5566_v44, %v5563_v38  ;;  %v13694_v57 = vsub.f32 %v236_v20, %v5563_v38  ;;  %v15013_v51 = vand.u32 4294901760, %v13676_v40  ;;  %v15014_v17 = vand.u32 4294901760, %v13678_v4 }
 0x26e   :  { %10105 = vmatprep.subr.bf16.mxu1 %v15603_v34  ;;  %v13700_v24 = vsub.f32 %v237_v50, %v5566_v44  ;;  %v5792_v48 = vsub.f32 %v13646_v60, %v15011_v36  ;;  %v5799_v11 = vsub.f32 %v13650_v31, %v15015_v21  ;;  %v13709_v20 = vpack.c.bf16 %v5786_v27, %v5779_v32 }
 0x26f   :  { %15648 = vst [vmem:[#allocation20_spill] sm:$0xff] %v13692_v61  ;;  %15649 = vst [vmem:[#allocation15_spill] sm:$0xff] %v13694_v57  ;;  %10079 = vmatpush3.bf16.msra.mxu0 %v13601_v0  ;;  %v5569_v25 = vand.u32 4294901760, %v238_v16  ;;  %v5572_v53 = vand.u32 4294901760, %v239_v18  ;;  %v13712_v0 = vsub.f32 %v353_v55, %v13689_v39  ;;  %v13714_v50 = vpack.c.bf16 %v5674_v42, %v5667_v52 }
 0x270   :  { %15650 = vst [vmem:[#allocation16_spill] sm:$0xff] %v13700_v24  ;;  %10081 = vmatprep.subr.bf16.mxu0 %v13607_v3  ;;  %v13716_v38 = vpack.c.bf16 %v5620_v37, %v5617_v7  ;;  %v13718_v44 = vsub.f32 %v254_v33, %v5617_v7  ;;  %v5623_v36 = vand.u32 4294901760, %v256_v12  ;;  %v5680_v3 = vsub.f32 %v13676_v40, %v15013_v51 }
 0x271   :  { %15651 = vst [vmem:[#allocation29_spill] sm:$0xff] %v13712_v0  ;;  %v8024_v34 = vpop.f32.mrb[20].mxu0  ;;  %10107 = vmatpush3.bf16.msra.mxu1 %v15606_v22  ;;  %v5687_v55 = vsub.f32 %v13678_v4, %v15014_v17  ;;  %v15018_v32 = vand.u32 4294901760, %v13685_v56  ;;  %v5793_v33 = vand.u32 4294901760, %v5792_v48  ;;  %v5800_v42 = vand.u32 4294901760, %v5799_v11 }
 0x272   :  { %15652 = vst [vmem:[#allocation13_spill] sm:$0xff] %v13716_v38  ;;  %v8025_v41 = vpop.f32.mrb[21].mxu0  ;;  %10109 = vmatprep.subr.bf16.mxu1 %v15607_v54  ;;  %v5626_v22 = vand.u32 4294901760, %v257_v46  ;;  %v13732_v7 = vsub.f32 %v255_v6, %v5620_v37  ;;  %v15017_v51 = vand.u32 4294901760, %v13694_v57  ;;  %v15016_v17 = vand.u32 4294901760, %v13700_v24 }
 0x273   :  { %v8026_v52 = vadd.f32 %v8025_v41, %v8024_v34  ;;  %10083 = vmatpush3.bf16.msra.mxu0 %v13614_v47  ;;  %v15019_v21 = vand.u32 4294901760, %v13712_v0  ;;  %v13738_v41 = vpack.c.bf16 %v5572_v53, %v5569_v25  ;;  %v13740_v47 = vsub.f32 %v238_v16, %v5569_v25  ;;  %v240_v34 = vld [vmem:[#allocation5 + $0x640] sm:$0xff] }
 0x274   :  { %10085 = vmatprep.subr.bf16.mxu0 %v13620_v23  ;;  %v13742_v54 = vsub.f32 %v239_v18, %v5572_v53  ;;  %v5681_v48 = vand.u32 4294901760, %v5680_v3  ;;  %v5688_v23 = vand.u32 4294901760, %v5687_v55  ;;  %v5806_v37 = vsub.f32 %v13685_v56, %v15018_v32  ;;  %v259_v55 = vld [vmem:[#allocation5 + $0x6d8] sm:$0xff] }
 0x275   :  { %v3443_v27 = vadd.f32 %v8026_v52, %v13546_v58  ;;  %15653 = vst [vmem:[#allocation18_spill] sm:$0xff] %v13738_v41  ;;  %15654 = vst [vmem:[#allocation21_spill] sm:$0xff] %v13740_v47  ;;  %10111 = vmatpush3.bf16.msra.mxu1 %v15608_v8  ;;  %v15656_v6 = vand.u32 4294901760, %v13687_v28  ;;  %v241_v58 = vld [vmem:[#allocation5 + $0x648] sm:$0xff]  ;;  %v13753_v18 = vpack.c.bf16 %v5800_v42, %v5793_v33  ;;  %v5575_v52 = vand.u32 4294901760, %v240_v34 }
 0x276   :  { %15655 = vst [vmem:[#allocation14_spill] sm:$0xff] %v13742_v54  ;;  %10113 = vmatprep.subr.bf16.mxu1 %v15609_v13  ;;  %v13755_v16 = vpack.c.bf16 %v5626_v22, %v5623_v36  ;;  %v13757_v8 = vsub.f32 %v256_v12, %v5623_v36  ;;  %v13760_v53 = vsub.f32 %v257_v46, %v5626_v22  ;;  %v258_v13 = vld [vmem:[#allocation5 + $0x6d0] sm:$0xff]  ;;  %v5578_v33 = vand.u32 4294901760, %v241_v58 }
 0x277   :  { %v5813_v11 = vsub.f32 %v13687_v28, %v15656_v6  ;;  %10087 = vmatpush3.bf16.msra.mxu0 %v13626_v49  ;;  %v8059_v25 = vpop.f32.mrb[20].mxu1  ;;  %v5694_v3 = vsub.f32 %v13694_v57, %v15017_v51  ;;  %v5701_v49 = vsub.f32 %v13700_v24, %v15016_v17  ;;  %v5649_v36 = vsub.f32 %v13712_v0, %v15019_v21  ;;  %v15658_v51 = vld [vmem:[#allocation28_spill] sm:$0xff]  ;;  %v243_v57 = vld [vmem:[#allocation5 + $0x658] sm:$0xff] }
 0x278   :  { %15657 = vst [vmem:[#allocation26_spill] sm:$0xff] %v13755_v16  ;;  %10089 = vmatprep.subr.bf16.mxu0 %v13638_v19  ;;  %v8060_v12 = vpop.f32.mrb[21].mxu1  ;;  %v13774_v22 = vpack.c.bf16 %v5688_v23, %v5681_v48  ;;  %v5807_v6 = vand.u32 4294901760, %v5806_v37  ;;  %v5629_v32 = vand.u32 4294901760, %v258_v13  ;;  %v5632_v21 = vand.u32 4294901760, %v259_v55  ;;  %v242_v24 = vld [vmem:[#allocation5 + $0x650] sm:$0xff] }
 0x279   :  { %v8061_v42 = vadd.f32 %v8060_v12, %v8059_v25  ;;  %10115 = vmatpush3.bf16.msra.mxu1 %v13298_v35  ;;  %v5814_v17 = vand.u32 4294901760, %v5813_v11  ;;  %v15026_v0 = vand.u32 4294901760, %v13740_v47  ;;  %v5695_v35 = vand.u32 4294901760, %v5694_v3  ;;  %v15662_v19 = vld [vmem:[#allocation30_spill] sm:$0xff] }
 0x27a   :  { %10117 = vmatprep.subr.bf16.mxu1 %v15658_v51  ;;  %v5702_v48 = vand.u32 4294901760, %v5701_v49  ;;  %v5650_v23 = vand.u32 4294901760, %v5649_v36  ;;  %v13783_v37 = vpack.c.bf16 %v5578_v33, %v5575_v52  ;;  %v15660_v51 = vand.u32 4294901760, %v13718_v44 }
 0x27b   :  { %10091 = vmatpush3.bf16.msra.mxu0 %v13644_v43  ;;  %v13780_v46 = vadd.f32 %v8061_v42, %v3443_v27  ;;  %v13785_v43 = vsub.f32 %v240_v34, %v5575_v52  ;;  %v15661_v25 = vand.u32 4294901760, %v13732_v7  ;;  %v13795_v27 = vpack.c.bf16 %v5814_v17, %v5807_v6  ;;  %v13799_v34 = vld [vmem:[#allocation5 + $0x6e0] sm:$0xff] }
 0x27c   :  { %10125 = vmatprep.subr.bf16.mxu0 %v13655_v15  ;;  %15659 = vst [vmem:[#allocation22_spill] sm:$0xff] %v13783_v37  ;;  %v5820_v11 = vsub.f32 %v13718_v44, %v15660_v51  ;;  %v13797_v3 = vsub.f32 %v241_v58, %v5578_v33  ;;  %v5581_v49 = vand.u32 4294901760, %v242_v24  ;;  %v5584_v36 = vand.u32 4294901760, %v243_v57  ;;  %v13811_v58 = vld [vmem:[#allocation5 + $0x6e8] sm:$0xff] }
 0x27d   :  { %v5827_v12 = vsub.f32 %v13732_v7, %v15661_v25  ;;  %10119 = vmatpush3.bf16.msra.mxu1 %v13436_v59  ;;  %v13803_v52 = vsub.f32 %v258_v13, %v5629_v32  ;;  %v5708_v42 = vsub.f32 %v13740_v47, %v15026_v0  ;;  %v15664_v59 = vand.u32 4294901760, %v13742_v54 }
 0x27e   :  { %5441 = vmatmul.mubr.f32.vlgmr.msra.gmra.mrb[34].mxu0 %v15662_v19  ;;  %10121 = vmatprep.subr.bf16.mxu1 %v13459_v63  ;;  %v13814_v33 = vpack.c.bf16 %v5702_v48, %v5695_v35  ;;  %v13816_v6 = vpack.c.bf16 %v5632_v21, %v5629_v32  ;;  %v13818_v51 = vsub.f32 %v259_v55, %v5632_v21  ;;  %v13820_v63 = vld [vmem:[#allocation5 + $0x660] sm:$0xff]  ;;  %v5821_v13 = vand.u32 4294901760, %v5820_v11  ;;  %v13831_v55 = vld [vmem:[#allocation5 + $0x668] sm:$0xff]  ;;  %v13879_v21 = vld [vmem:[#allocation5 + $0x670] sm:$0xff] }
 0x27f   :  { %10127 = vmatpush3.bf16.msra.mxu0 %v13657_v26  ;;  %15663 = vst [vmem:[#allocation23_spill] sm:$0xff] %v13803_v52  ;;  %v5715_v17 = vsub.f32 %v13742_v54, %v15664_v59  ;;  %5651 = vmatprep.mubr.f32.mxu0 %v5650_v23  ;;  %v5828_v25 = vand.u32 4294901760, %v5827_v12  ;;  %v15031_v0 = vand.u32 4294901760, %v13799_v34  ;;  %v15032_v47 = vand.u32 4294901760, %v13757_v8  ;;  %v13841_v12 = vld [vmem:[#allocation5 + $0x6f0] sm:$0xff]  ;;  %v13881_v11 = vld [vmem:[#allocation5 + $0x678] sm:$0xff] }
 0x280   :  { %10129 = vmatprep.subr.bf16.mxu0 %v13665_v10  ;;  %15665 = vst [vmem:[#allocation19_spill] sm:$0xff] %v13816_v6  ;;  %15666 = vst [vmem:[#allocation17_spill] sm:$0xff] %v13818_v51  ;;  %v13825_v59 = vpack.c.bf16 %v5584_v36, %v5581_v49  ;;  %v13827_v54 = vsub.f32 %v242_v24, %v5581_v49  ;;  %v15033_v32 = vand.u32 4294901760, %v13811_v58  ;;  %v5709_v48 = vand.u32 4294901760, %v5708_v42  ;;  %v13843_v49 = vld [vmem:[#allocation5 + $0x6f8] sm:$0xff] }
 0x281   :  { %10123 = vmatpush3.bf16.msra.mxu1 %v13476_v62  ;;  %v13835_v35 = vsub.f32 %v243_v57, %v5584_v36  ;;  %v5716_v23 = vand.u32 4294901760, %v5715_v17  ;;  %v15034_v62 = vand.u32 4294901760, %v13820_v63  ;;  %v15038_v24 = vand.u32 4294901760, %v13785_v43 }
 0x282   :  { %10157 = vmatprep.subr.bf16.mxu1 %v13709_v20  ;;  %v10168_v57 = vpack.c.bf16 %v5828_v25, %v5821_v13  ;;  %v13851_v36 = vsub.f32 %v13799_v34, %v15031_v0  ;;  %v5834_v42 = vsub.f32 %v13757_v8, %v15032_v47  ;;  %v5590_v17 = vand.u32 4294901760, %v13831_v55 }
 0x283   :  { %10131 = vmatpush3.bf16.msra.mxu0 %v13667_v2  ;;  %15667 = vst [vmem:[#allocation27_spill] sm:$0xff] %v13835_v35  ;;  %v13861_v20 = vsub.f32 %v13811_v58, %v15033_v32  ;;  %v15670_v25 = vsub.s32 4, %v15644_v9  ;;  %v13875_v47 = vsub.f32 %v13820_v63, %v15034_v62  ;;  %v15673_v62 = vand.u32 4294901760, %v13818_v51 }
 0x284   :  { %10133 = vmatprep.subr.bf16.mxu0 %v13681_v1  ;;  %5545 = vmatmul.mubr.f32.vlgmr.msra.gmra.mrb[34].mxu1 %v15662_v19  ;;  %v15669_v19 = vand.u32 4294901760, %v13760_v53  ;;  %v5835_v32 = vand.u32 4294901760, %v5834_v42  ;;  %v13897_v9 = vsub.f32 %v13831_v55, %v5590_v17 }
 0x285   :  { %10159 = vmatpush3.bf16.msra.mxu1 %v13714_v50  ;;  %15668 = vst [vmem:[#allocation25_spill] sm:$0xff] %v13861_v20  ;;  %v349_v0 = vrot.slane %v15646_v29, %v15670_v25  ;;  %5887 = vmatprep.mubr.f32.mxu1 %v13689_v39  ;;  %v10170_v50 = vpack.c.bf16 %v5716_v23, %v5709_v48  ;;  %v15672_v23 = vand.u32 4294901760, %v13803_v52 }
 0x286   :  { %v5841_v13 = vsub.f32 %v13760_v53, %v15669_v19  ;;  %10161 = vmatprep.subr.bf16.mxu1 %v13753_v18  ;;  %v5722_v29 = vsub.f32 %v13785_v43, %v15038_v24  ;;  %v15671_v18 = vand.u32 4294901760, %v13797_v3  ;;  %v5855_v19 = vsub.f32 %v13818_v51, %v15673_v62 }
 0x287   :  { %10135 = vmatpush3.bf16.msra.mxu0 %v13692_v61  ;;  %v5848_v25 = vsub.f32 %v13803_v52, %v15672_v23  ;;  %v13904_v61 = vand.u32 4294901760, %v349_v0  ;;  %v15675_v62 = vand.u32 4294901760, %v13841_v12  ;;  %v15687_v52 = vand.u32 4294901760, %v13875_v47 }
 0x288   :  { %10137 = vmatprep.subr.bf16.mxu0 %v13716_v38  ;;  %v5729_v48 = vsub.f32 %v13797_v3, %v15671_v18  ;;  %v5842_v55 = vand.u32 4294901760, %v5841_v13  ;;  %v5723_v23 = vand.u32 4294901760, %v5722_v29  ;;  %v15679_v38 = vand.u32 4294901760, %v13879_v21 }
 0x289   :  { %10163 = vmatpush3.bf16.msra.mxu1 %v13774_v22  ;;  %15674 = vst [vmem:[#allocation12_spill] sm:$0xff] %v13904_v61  ;;  %v13912_v42 = vsub.f32 %v13841_v12, %v15675_v62  ;;  %v15676_v22 = vand.u32 4294901760, %v13843_v49  ;;  %v5849_v39 = vand.u32 4294901760, %v5848_v25  ;;  %v15678_v62 = vand.u32 4294901760, %v13835_v35 }
 0x28a   :  { %10165 = vmatprep.subr.bf16.mxu1 %v13795_v27  ;;  %v5730_v24 = vand.u32 4294901760, %v5729_v48  ;;  %v15677_v27 = vand.u32 4294901760, %v13827_v54  ;;  %v13933_v29 = vsub.f32 %v13879_v21, %v15679_v38  ;;  %v13941_v25 = vsub.f32 %v349_v0, %v13904_v61 }
 0x28b   :  { %10139 = vmatpush3.bf16.msra.mxu0 %v13738_v41  ;;  %v13917_v18 = vsub.f32 %v13843_v49, %v15676_v22  ;;  %v5856_v41 = vand.u32 4294901760, %v5855_v19  ;;  %v5743_v51 = vsub.f32 %v13835_v35, %v15678_v62  ;;  %v15680_v19 = vand.u32 4294901760, %v13881_v11 }
 0x28c   :  { %10141 = vmatprep.subr.bf16.mxu0 %v13755_v16  ;;  %v5736_v13 = vsub.f32 %v13827_v54, %v15677_v27  ;;  %v15681_v27 = vand.u32 4294901760, %v13851_v36  ;;  %v15682_v22 = vand.u32 4294901760, %v13861_v20  ;;  %v15683_v0 = vand.u32 4294901760, %v13799_v34 }
 0x28d   :  { %10167 = vmatpush3.bf16.msra.mxu1 %v13814_v33  ;;  %v13938_v48 = vsub.f32 %v13881_v11, %v15680_v19  ;;  %v10172_v33 = vpack.c.bf16 %v5842_v55, %v5835_v32  ;;  %v15684_v16 = vand.u32 4294901760, %v13811_v58  ;;  %v10174_v32 = vpack.c.bf16 %v5730_v24, %v5723_v23 }
 0x28e   :  { %v5862_v62 = vsub.f32 %v13851_v36, %v15681_v27  ;;  %10169 = vmatprep.subr.bf16.mxu1 %v10168_v57  ;;  %v5869_v38 = vsub.f32 %v13861_v20, %v15682_v22  ;;  %v15686_v27 = vand.u32 4294901760, %v13820_v63  ;;  %v10176_v55 = vpack.c.bf16 %v5856_v41, %v5849_v39 }
 0x28f   :  { %10143 = vmatpush3.bf16.msra.mxu0 %v13783_v37  ;;  %v13957_v35 = vpack.c.bf16 %v15684_v16, %v15683_v0  ;;  %v5737_v22 = vand.u32 4294901760, %v5736_v13  ;;  %v5744_v20 = vand.u32 4294901760, %v5743_v51  ;;  %v5750_v19 = vsub.f32 %v13875_v47, %v15687_v52 }
 0x290   :  { %10145 = vmatprep.subr.bf16.mxu0 %v13816_v6  ;;  %v13961_v57 = vpack.c.bf16 %v5590_v17, %v15686_v27  ;;  %v15688_v6 = vand.u32 4294901760, %v13897_v9  ;;  %v15061_v16 = vand.u32 4294901760, %v13941_v25  ;;  %v5863_v63 = vand.u32 4294901760, %v5862_v62 }
 0x291   :  { %15685 = vst [vmem:[#allocation28_spill] sm:$0xff] %v13957_v35  ;;  %v8094_v37 = vpop.f32.mrb[22].mxu0  ;;  %10171 = vmatpush3.bf16.msra.mxu1 %v10170_v50  ;;  %v15060_v17 = vand.u32 4294901760, %v13933_v29  ;;  %v15059_v39 = vand.u32 4294901760, %v13938_v48  ;;  %v5870_v51 = vand.u32 4294901760, %v5869_v38  ;;  %v15689_v52 = vand.u32 4294901760, %v13912_v42 }
 0x292   :  { %v5757_v34 = vsub.f32 %v13897_v9, %v15688_v6  ;;  %v8095_v58 = vpop.f32.mrb[23].mxu0  ;;  %10173 = vmatprep.subr.bf16.mxu1 %v10172_v33  ;;  %v15690_v6 = vand.u32 4294901760, %v13917_v18  ;;  %v15691_v23 = vand.u32 4294901760, %v13841_v12  ;;  %v15692_v13 = vand.u32 4294901760, %v13843_v49 }
 0x293   :  { %v8096_v41 = vadd.f32 %v8095_v58, %v8094_v37  ;;  %10147 = vmatpush3.bf16.msra.mxu0 %v13825_v59  ;;  %v5876_v24 = vsub.f32 %v13912_v42, %v15689_v52  ;;  %v5751_v33 = vand.u32 4294901760, %v5750_v19  ;;  %v10178_v0 = vpack.c.bf16 %v5744_v20, %v5737_v22 }
 0x294   :  { %v5883_v50 = vsub.f32 %v13917_v18, %v15690_v6  ;;  %10149 = vmatprep.subr.bf16.mxu0 %v13957_v35  ;;  %v13984_v62 = vpack.c.bf16 %v15692_v13, %v15691_v23  ;;  %v5758_v38 = vand.u32 4294901760, %v5757_v34  ;;  %v5655_v27 = vsub.f32 %v13941_v25, %v15061_v16 }
 0x295   :  { %v3719_v37 = vadd.f32 %v8096_v41, %v13780_v46  ;;  %10175 = vmatpush3.bf16.msra.mxu1 %v10174_v32  ;;  %v5764_v58 = vsub.f32 %v13933_v29, %v15060_v17  ;;  %v5771_v12 = vsub.f32 %v13938_v48, %v15059_v39  ;;  %v15693_v46 = vand.u32 4294901760, %v13879_v21  ;;  %v14058_v17 = vld [vmem:[#allocation5 + $0x788] sm:$0xff] }
 0x296   :  { %10177 = vmatprep.subr.bf16.mxu1 %v10176_v55  ;;  %v15694_v49 = vand.u32 4294901760, %v13881_v11  ;;  %v10180_v19 = vpack.c.bf16 %v5870_v51, %v5863_v63  ;;  %v5877_v32 = vand.u32 4294901760, %v5876_v24  ;;  %v5884_v22 = vand.u32 4294901760, %v5883_v50 }
 0x297   :  { %10151 = vmatpush3.bf16.msra.mxu0 %v13961_v57  ;;  %v8129_v34 = vpop.f32.mrb[22].mxu1  ;;  %v10188_v41 = vpack.c.bf16 %v13571_v30, %v13563_v45  ;;  %v10182_v6 = vpack.c.bf16 %v5758_v38, %v5751_v33  ;;  %v5656_v55 = vand.u32 4294901760, %v5655_v27  ;;  %v5765_v13 = vand.u32 4294901760, %v5764_v58  ;;  %v15697_v27 = vld [vmem:[#allocation16_spill] sm:$0xff] }
 0x298   :  { %v14001_v20 = vpack.c.bf16 %v15694_v49, %v15693_v46  ;;  %10153 = vmatprep.subr.bf16.mxu0 %v13984_v62  ;;  %v8130_v52 = vpop.f32.mrb[23].mxu1  ;;  %v5772_v21 = vand.u32 4294901760, %v5771_v12  ;;  %v10190_v11 = vpack.c.bf16 %v13581_v14, %v13578_v5  ;;  %v10184_v63 = vpack.c.bf16 %v5884_v22, %v5877_v32  ;;  %v15699_v49 = vld [vmem:[#allocation21_spill] sm:$0xff] }
 0x299   :  { %v8131_v23 = vadd.f32 %v8130_v52, %v8129_v34  ;;  %10179 = vmatpush3.bf16.msra.mxu1 %v10178_v0  ;;  %v10192_v24 = vpack.c.bf16 %v13650_v31, %v13646_v60  ;;  %v10194_v33 = vpack.c.bf16 %v13678_v4, %v13676_v40  ;;  %v10196_v38 = vpack.c.bf16 %v13687_v28, %v13685_v56  ;;  %v15695_v0 = vld [vmem:[#allocation29_spill] sm:$0xff] }
 0x29a   :  { %10181 = vmatprep.subr.bf16.mxu1 %v10180_v19  ;;  %v10186_v50 = vpack.c.bf16 %v5772_v21, %v5765_v13  ;;  %v10200_v12 = vpack.c.bf16 %v13732_v7, %v13718_v44  ;;  %v15698_v46 = vand.u32 4294901760, %v15695_v0  ;;  %v15700_v19 = vld [vmem:[#allocation14_spill] sm:$0xff]  ;;  %v10204_v22 = vpack.c.bf16 %v13760_v53, %v13757_v8  ;;  %v15702_v52 = vld [vmem:[#allocation17_spill] sm:$0xff]  ;;  %v15705_v13 = vld [vmem:[#allocation27_spill] sm:$0xff] }
 0x29b   :  { %10155 = vmatpush3.bf16.msra.mxu0 %v14001_v20  ;;  %v3823_v51 = vadd.f32 %v8131_v23, %v3719_v37  ;;  %v15696_v37 = vld [vmem:[#allocation15_spill] sm:$0xff]  ;;  %v10202_v32 = vpack.c.bf16 %v15700_v19, %v15699_v49  ;;  %v10206_v34 = vpack.c.bf16 %v13797_v3, %v13785_v43  ;;  %v15703_v23 = vld [vmem:[#allocation20_spill] sm:$0xff]  ;;  %v10210_v21 = vpack.c.bf16 %v15705_v13, %v13827_v54 }
 0x29c   :  { %10189 = vmatprep.subr.bf16.mxu0 %v10188_v41  ;;  %v10198_v58 = vpack.c.bf16 %v15697_v27, %v15696_v37  ;;  %v15701_v41 = vld [vmem:[#allocation23_spill] sm:$0xff] }
 0x29d   :  { %10183 = vmatpush3.bf16.msra.mxu1 %v10182_v6  ;;  %v10208_v6 = vpack.c.bf16 %v15702_v52, %v15701_v41 }
 0x29e   :  { %5657 = vmatmul.mubr.f32.vlgmr.msra.gmra.mrb[36].mxu0 %v5656_v55  ;;  %10185 = vmatprep.subr.bf16.mxu1 %v10184_v63  ;;  %v15704_v55 = vld [vmem:[#allocation13_spill] sm:$0xff] }
 0x29f   :  { %10191 = vmatpush3.bf16.msra.mxu0 %v10190_v11  ;;  %6024 = vmatprep.mubr.f32.mxu0 %v15695_v0  ;;  %v15706_v11 = vld [vmem:[#allocation25_spill] sm:$0xff]  ;;  %v15708_v0 = vld [vmem:[#allocation26_spill] sm:$0xff] }
 0x2a0   :  { %10193 = vmatprep.subr.bf16.mxu0 %v10192_v24  ;;  %v10212_v63 = vpack.c.bf16 %v15706_v11, %v13851_v36 }
 0x2a1   :  { %10187 = vmatpush3.bf16.msra.mxu1 %v10186_v50 }
 0x2a2   :  { %10221 = vmatprep.subr.bf16.mxu1 %v13655_v15 }
 0x2a3   :  { %10195 = vmatpush3.bf16.msra.mxu0 %v10194_v33  ;;  %v15707_v33 = vld [vmem:[#allocation18_spill] sm:$0xff] }
 0x2a4   :  { %10197 = vmatprep.subr.bf16.mxu0 %v10196_v38  ;;  %5889 = vmatmul.mubr.f32.vlgmr.msra.gmra.mrb[36].mxu1 %v13904_v61  ;;  %v6464_v61 = vand.u32 4294901760, %v14058_v17 }
 0x2a5   :  { %10223 = vmatpush3.bf16.msra.mxu1 %v13657_v26  ;;  %6131 = vmatprep.mubr.f32.mxu1 %v15698_v46 }
 0x2a6   :  { %10225 = vmatprep.subr.bf16.mxu1 %v13665_v10 }
 0x2a7   :  { %10199 = vmatpush3.bf16.msra.mxu0 %v10198_v58  ;;  %v10214_v58 = vpack.c.bf16 %v13897_v9, %v13875_v47 }
 0x2a8   :  { %10201 = vmatprep.subr.bf16.mxu0 %v10200_v12  ;;  %v10216_v12 = vpack.c.bf16 %v13917_v18, %v13912_v42 }
 0x2a9   :  { %10227 = vmatpush3.bf16.msra.mxu1 %v13667_v2 }
 0x2aa   :  { %10229 = vmatprep.subr.bf16.mxu1 %v13681_v1 }
 0x2ab   :  { %10203 = vmatpush3.bf16.msra.mxu0 %v10202_v32  ;;  %v15709_v32 = vld [vmem:[#allocation22_spill] sm:$0xff] }
 0x2ac   :  { %10205 = vmatprep.subr.bf16.mxu0 %v10204_v22  ;;  %v15710_v22 = vld [vmem:[#allocation19_spill] sm:$0xff] }
 0x2ad   :  { %10231 = vmatpush3.bf16.msra.mxu1 %v15703_v23 }
 0x2ae   :  { %10233 = vmatprep.subr.bf16.mxu1 %v15704_v55 }
 0x2af   :  { %10207 = vmatpush3.bf16.msra.mxu0 %v10206_v34  ;;  %v10218_v34 = vpack.c.bf16 %v13938_v48, %v13933_v29 }
 0x2b0   :  { %10209 = vmatprep.subr.bf16.mxu0 %v10208_v6 }
 0x2b1   :  { %v8164_v24 = vpop.f32.mrb[24].mxu0  ;;  %10235 = vmatpush3.bf16.msra.mxu1 %v15707_v33 }
 0x2b2   :  { %v8165_v50 = vpop.f32.mrb[25].mxu0  ;;  %10237 = vmatprep.subr.bf16.mxu1 %v15708_v0 }
 0x2b3   :  { %v8166_v38 = vadd.f32 %v8165_v50, %v8164_v24  ;;  %10211 = vmatpush3.bf16.msra.mxu0 %v10210_v21  ;;  %v15711_v21 = vand.u32 4294901760, %v13563_v45  ;;  %v15712_v24 = vand.u32 4294901760, %v13571_v30  ;;  %v15713_v45 = vand.u32 4294901760, %v13578_v5 }
 0x2b4   :  { %10213 = vmatprep.subr.bf16.mxu0 %v10212_v63  ;;  %v14056_v63 = vld [vmem:[#allocation5 + $0x780] sm:$0xff]  ;;  %v15714_v30 = vand.u32 4294901760, %v13581_v14  ;;  %v15717_v5 = vand.u32 4294901760, %v13676_v40  ;;  %v15718_v14 = vand.u32 4294901760, %v13678_v4  ;;  %v15722_v40 = vand.u32 4294901760, %v15696_v37 }
 0x2b5   :  { %v3935_v46 = vadd.f32 %v8166_v38, %v3823_v51  ;;  %10239 = vmatpush3.bf16.msra.mxu1 %v15709_v32  ;;  %v10252_v50 = vpack.c.bf16 %v15712_v24, %v15711_v21  ;;  %v14061_v38 = vld [vmem:[#allocation5 + $0x700] sm:$0xff]  ;;  %v6461_v21 = vand.u32 4294901760, %v14056_v63  ;;  %v15723_v4 = vand.u32 4294901760, %v15697_v27 }
 0x2b6   :  { %10241 = vmatprep.subr.bf16.mxu1 %v15710_v22  ;;  %v15727_v37 = vand.u32 4294901760, %v15700_v19  ;;  %v15728_v27 = vand.u32 4294901760, %v13757_v8  ;;  %v15733_v19 = vand.u32 4294901760, %v15702_v52  ;;  %v15739_v52 = vand.u32 4294901760, %v13897_v9 }
 0x2b7   :  { %10215 = vmatpush3.bf16.msra.mxu0 %v10214_v58  ;;  %v8199_v6 = vpop.f32.mrb[24].mxu1  ;;  %v14063_v58 = vld [vmem:[#allocation5 + $0x708] sm:$0xff]  ;;  %v15742_v9 = vand.u32 4294901760, %v13917_v18 }
 0x2b8   :  { %10217 = vmatprep.subr.bf16.mxu0 %v10216_v12  ;;  %v8200_v39 = vpop.f32.mrb[25].mxu1  ;;  %v10254_v12 = vpack.c.bf16 %v15714_v30, %v15713_v45  ;;  %v15721_v30 = vld [vmem:[#allocation24_spill] sm:$0xff] }
 0x2b9   :  { %v8201_v51 = vadd.f32 %v8200_v39, %v8199_v6  ;;  %10243 = vmatpush3.bf16.msra.mxu1 %v13825_v59  ;;  %v15715_v39 = vand.u32 4294901760, %v13646_v60  ;;  %v15716_v6 = vand.u32 4294901760, %v13650_v31  ;;  %v10258_v60 = vpack.c.bf16 %v15718_v14, %v15717_v5 }
 0x2ba   :  { %10245 = vmatprep.subr.bf16.mxu1 %v13957_v35  ;;  %v6416_v35 = vand.u32 4294901760, %v14063_v58  ;;  %v14088_v31 = vsub.f32 %v14056_v63, %v6461_v21  ;;  %v15726_v5 = vand.u32 4294901760, %v15699_v49  ;;  %v15732_v49 = vand.u32 4294901760, %v15701_v41 }
 0x2bb   :  { %10219 = vmatpush3.bf16.msra.mxu0 %v10218_v34  ;;  %v14071_v24 = vadd.f32 %v8201_v51, %v3935_v46  ;;  %v10256_v16 = vpack.c.bf16 %v15716_v6, %v15715_v39  ;;  %v6413_v34 = vand.u32 4294901760, %v14061_v38  ;;  %v282_v46 = vld [vmem:[#allocation5 + $0x790] sm:$0xff]  ;;  %v15720_v51 = vand.u32 4294901760, %v13687_v28  ;;  %v283_v39 = vld [vmem:[#allocation5 + $0x798] sm:$0xff] }
 0x2bc   :  { %10253 = vmatprep.subr.bf16.mxu0 %v10252_v50  ;;  %v15719_v50 = vand.u32 4294901760, %v13685_v56  ;;  %v10262_v6 = vpack.c.bf16 %v15723_v4, %v15722_v40  ;;  %v15724_v56 = vand.u32 4294901760, %v13718_v44  ;;  %v15725_v28 = vand.u32 4294901760, %v13732_v7  ;;  %v267_v40 = vld [vmem:[#allocation5 + $0x718] sm:$0xff] }
 0x2bd   :  { %10247 = vmatpush3.bf16.msra.mxu1 %v13961_v57  ;;  %v14103_v63 = vsub.f32 %v14061_v38, %v6413_v34  ;;  %v10266_v14 = vpack.c.bf16 %v15727_v37, %v15726_v5  ;;  %v15729_v38 = vand.u32 4294901760, %v13760_v53  ;;  %v15730_v44 = vand.u32 4294901760, %v13785_v43 }
 0x2be   :  { %6027 = vmatmul.mubr.f32.vlgmr.msra.gmra.mrb[38].mxu0 %v13941_v25  ;;  %10249 = vmatprep.subr.bf16.mxu1 %v13984_v62  ;;  %v10260_v45 = vpack.c.bf16 %v15720_v51, %v15719_v50  ;;  %v6467_v51 = vand.u32 4294901760, %v282_v46  ;;  %v15731_v7 = vand.u32 4294901760, %v13797_v3  ;;  %v14132_v8 = vpack.c.bf16 %v15733_v19, %v15732_v49 }
 0x2bf   :  { %10255 = vmatpush3.bf16.msra.mxu0 %v10254_v12  ;;  %6301 = vmatprep.mubr.f32.mxu0 %v15721_v30  ;;  %v14096_v12 = vsub.f32 %v14058_v17, %v6464_v61  ;;  %v10264_v17 = vpack.c.bf16 %v15725_v28, %v15724_v56  ;;  %v10268_v50 = vpack.c.bf16 %v15729_v38, %v15728_v27  ;;  %v6470_v53 = vand.u32 4294901760, %v283_v39  ;;  %v284_v27 = vld [vmem:[#allocation5 + $0x7a0] sm:$0xff] }
 0x2c0   :  { %10257 = vmatprep.subr.bf16.mxu0 %v10256_v16  ;;  %v14106_v16 = vsub.f32 %v14063_v58, %v6416_v35  ;;  %v266_v58 = vld [vmem:[#allocation5 + $0x710] sm:$0xff]  ;;  %v14126_v4 = vpack.c.bf16 %v15731_v7, %v15730_v44  ;;  %v15069_v56 = vand.u32 4294901760, %v14088_v31  ;;  %v15736_v43 = vand.u32 4294901760, %v13851_v36 }
 0x2c1   :  { %10251 = vmatpush3.bf16.msra.mxu1 %v14001_v20  ;;  %v15737_v3 = vand.u32 4294901760, %v15706_v11  ;;  %v15738_v41 = vand.u32 4294901760, %v13875_v47  ;;  %v6419_v38 = vand.u32 4294901760, %v266_v58  ;;  %v6422_v44 = vand.u32 4294901760, %v267_v40 }
 0x2c2   :  { %10285 = vmatprep.subr.bf16.mxu1 %v13655_v15  ;;  %v15735_v15 = vand.u32 4294901760, %v15705_v13  ;;  %v15740_v13 = vand.u32 4294901760, %v13941_v25  ;;  %v15066_v36 = vand.u32 4294901760, %v14103_v63  ;;  %v15065_v11 = vand.u32 4294901760, %v14106_v16 }
 0x2c3   :  { %10259 = vmatpush3.bf16.msra.mxu0 %v10258_v60  ;;  %v15734_v60 = vand.u32 4294901760, %v13827_v54  ;;  %v14145_v5 = vpack.c.bf16 %v15737_v3, %v15736_v43  ;;  %v14151_v37 = vpack.c.bf16 %v15739_v52, %v15738_v41  ;;  %v15067_v54 = vand.u32 4294901760, %v14096_v12  ;;  %v269_v43 = vld [vmem:[#allocation5 + $0x728] sm:$0xff] }
 0x2c4   :  { %10261 = vmatprep.subr.bf16.mxu0 %v10260_v45  ;;  %v285_v45 = vld [vmem:[#allocation5 + $0x7a8] sm:$0xff]  ;;  %6135 = vmatmul.mubr.f32.vlgmr.msra.gmra.mrb[38].mxu1 %v15740_v13  ;;  %v15741_v47 = vand.u32 4294901760, %v13912_v42  ;;  %v15743_v49 = vand.u32 4294901760, %v13933_v29  ;;  %v15744_v19 = vand.u32 4294901760, %v13938_v48  ;;  %v6473_v42 = vand.u32 4294901760, %v284_v27  ;;  %v268_v29 = vld [vmem:[#allocation5 + $0x720] sm:$0xff] }
 0x2c5   :  { %v14139_v28 = vpack.c.bf16 %v15735_v15, %v15734_v60  ;;  %10287 = vmatpush3.bf16.msra.mxu1 %v13657_v26  ;;  %v14171_v60 = vsub.f32 %v282_v46, %v6467_v51  ;;  %6405 = vmatprep.mubr.f32.mxu1 %v15721_v30  ;;  %v14175_v26 = vsub.f32 %v283_v39, %v6470_v53  ;;  %v6476_v15 = vand.u32 4294901760, %v285_v45  ;;  %v15745_v39 = vld [vmem:[#allocation11_spill] sm:$0xff] }
 0x2c6   :  { %v14163_v7 = vpack.c.bf16 %v15742_v9, %v15741_v47  ;;  %v14169_v25 = vpack.c.bf16 %v15744_v19, %v15743_v49  ;;  %10289 = vmatprep.subr.bf16.mxu1 %v13665_v10  ;;  %v6640_v18 = vsub.f32 %v14088_v31, %v15069_v56  ;;  %v14180_v48 = vpack.c.bf16 %v6464_v61, %v6461_v21  ;;  %v14187_v10 = vld [vmem:[#allocation2 + $0x8] sm:$0xff] }
 0x2c7   :  { %10263 = vmatpush3.bf16.msra.mxu0 %v10262_v6  ;;  %v14182_v46 = vpack.c.bf16 %v6416_v35, %v6413_v34  ;;  %v6647_v30 = vsub.f32 %v14096_v12, %v15067_v54  ;;  %v15746_v6 = vsub.s32 7, %v15745_v39  ;;  %v14192_v41 = vpack.c.bf16 %v6470_v53, %v6467_v51  ;;  %v286_v51 = vld [vmem:[#allocation5 + $0x7b0] sm:$0xff]  ;;  %v287_v53 = vld [vmem:[#allocation5 + $0x7b8] sm:$0xff] }
 0x2c8   :  { %10265 = vmatprep.subr.bf16.mxu0 %v10264_v17  ;;  %v14194_v52 = vpack.c.bf16 %v6422_v44, %v6419_v38  ;;  %v6528_v61 = vsub.f32 %v14103_v63, %v15066_v36  ;;  %v6535_v35 = vsub.f32 %v14106_v16, %v15065_v11  ;;  %v14203_v21 = vsub.f32 %v266_v58, %v6419_v38  ;;  %v271_v36 = vld [vmem:[#allocation5 + $0x738] sm:$0xff] }
 0x2c9   :  { %v361_v3 = vrot.slane %v14187_v10, %v15746_v6  ;;  %10291 = vmatpush3.bf16.msra.mxu1 %v13667_v2  ;;  %v14205_v34 = vsub.f32 %v267_v40, %v6422_v44  ;;  %v6425_v17 = vand.u32 4294901760, %v268_v29  ;;  %v6428_v13 = vand.u32 4294901760, %v269_v43 }
 0x2ca   :  { %10293 = vmatprep.subr.bf16.mxu1 %v13681_v1  ;;  %v14208_v47 = vpack.c.bf16 %v6476_v15, %v6473_v42  ;;  %v6641_v9 = vand.u32 4294901760, %v6640_v18  ;;  %v15068_v49 = vand.u32 4294901760, %v14171_v60  ;;  %v15072_v19 = vand.u32 4294901760, %v14175_v26  ;;  %v270_v1 = vld [vmem:[#allocation5 + $0x730] sm:$0xff] }
 0x2cb   :  { %10267 = vmatpush3.bf16.msra.mxu0 %v10266_v14  ;;  %v14212_v2 = vsub.f32 %v284_v27, %v6473_v42  ;;  %v14214_v58 = vsub.f32 %v285_v45, %v6476_v15  ;;  %v6648_v40 = vand.u32 4294901760, %v6647_v30  ;;  %v14216_v38 = vand.u32 4294901760, %v361_v3  ;;  %v288_v45 = vld [vmem:[#allocation5 + $0x7c0] sm:$0xff] }
 0x2cc   :  { %10269 = vmatprep.subr.bf16.mxu0 %v10268_v50  ;;  %v6529_v44 = vand.u32 4294901760, %v6528_v61  ;;  %v6536_v6 = vand.u32 4294901760, %v6535_v35  ;;  %v6479_v14 = vand.u32 4294901760, %v286_v51  ;;  %v6482_v11 = vand.u32 4294901760, %v287_v53  ;;  %v289_v35 = vld [vmem:[#allocation5 + $0x7c8] sm:$0xff] }
 0x2cd   :  { %15747 = vst [vmem:[#allocation30_spill] sm:$0xff] %v14216_v38  ;;  %10295 = vmatpush3.bf16.msra.mxu1 %v15703_v23  ;;  %v14219_v18 = vpack.c.bf16 %v6428_v13, %v6425_v17  ;;  %v14221_v54 = vsub.f32 %v268_v29, %v6425_v17  ;;  %v15070_v50 = vand.u32 4294901760, %v14203_v21  ;;  %v15071_v27 = vand.u32 4294901760, %v14205_v34 }
 0x2ce   :  { %10297 = vmatprep.subr.bf16.mxu1 %v15704_v55  ;;  %v14227_v42 = vsub.f32 %v269_v43, %v6428_v13  ;;  %v6654_v15 = vsub.f32 %v14171_v60, %v15068_v49  ;;  %v6661_v23 = vsub.f32 %v14175_v26, %v15072_v19  ;;  %v14236_v29 = vpack.c.bf16 %v6648_v40, %v6641_v9 }
 0x2cf   :  { %15748 = vst [vmem:[#allocation29_spill] sm:$0xff] %v14219_v18  ;;  %15749 = vst [vmem:[#allocation15_spill] sm:$0xff] %v14221_v54  ;;  %10271 = vmatpush3.bf16.msra.mxu0 %v14126_v4  ;;  %v6431_v30 = vand.u32 4294901760, %v270_v1  ;;  %v6434_v61 = vand.u32 4294901760, %v271_v36  ;;  %v14239_v4 = vsub.f32 %v361_v3, %v14216_v38  ;;  %v14241_v43 = vpack.c.bf16 %v6536_v6, %v6529_v44 }
 0x2d0   :  { %15750 = vst [vmem:[#allocation16_spill] sm:$0xff] %v14227_v42  ;;  %10273 = vmatprep.subr.bf16.mxu0 %v14132_v8  ;;  %v14243_v17 = vpack.c.bf16 %v6482_v11, %v6479_v14  ;;  %v14245_v13 = vsub.f32 %v286_v51, %v6479_v14  ;;  %v6485_v49 = vand.u32 4294901760, %v288_v45  ;;  %v6542_v8 = vsub.f32 %v14203_v21, %v15070_v50 }
 0x2d1   :  { %15751 = vst [vmem:[#allocation21_spill] sm:$0xff] %v14239_v4  ;;  %v8234_v55 = vpop.f32.mrb[26].mxu0  ;;  %10299 = vmatpush3.bf16.msra.mxu1 %v15707_v33  ;;  %v6549_v3 = vsub.f32 %v14205_v34, %v15071_v27  ;;  %v15075_v9 = vand.u32 4294901760, %v14212_v2  ;;  %v6655_v51 = vand.u32 4294901760, %v6654_v15  ;;  %v6662_v6 = vand.u32 4294901760, %v6661_v23 }
 0x2d2   :  { %15752 = vst [vmem:[#allocation14_spill] sm:$0xff] %v14243_v17  ;;  %v8235_v56 = vpop.f32.mrb[27].mxu0  ;;  %10301 = vmatprep.subr.bf16.mxu1 %v15708_v0  ;;  %v6488_v33 = vand.u32 4294901760, %v289_v35  ;;  %v14259_v14 = vsub.f32 %v287_v53, %v6482_v11  ;;  %v15074_v50 = vand.u32 4294901760, %v14221_v54  ;;  %v15073_v27 = vand.u32 4294901760, %v14227_v42 }
 0x2d3   :  { %v8236_v44 = vadd.f32 %v8235_v56, %v8234_v55  ;;  %10275 = vmatpush3.bf16.msra.mxu0 %v14139_v28  ;;  %v15076_v19 = vand.u32 4294901760, %v14239_v4  ;;  %v14265_v56 = vpack.c.bf16 %v6434_v61, %v6431_v30  ;;  %v14267_v28 = vsub.f32 %v270_v1, %v6431_v30  ;;  %v272_v55 = vld [vmem:[#allocation5 + $0x740] sm:$0xff] }
 0x2d4   :  { %10277 = vmatprep.subr.bf16.mxu0 %v14145_v5  ;;  %v14269_v0 = vsub.f32 %v271_v36, %v6434_v61  ;;  %v6543_v15 = vand.u32 4294901760, %v6542_v8  ;;  %v6550_v5 = vand.u32 4294901760, %v6549_v3  ;;  %v6668_v11 = vsub.f32 %v14212_v2, %v15075_v9  ;;  %v291_v3 = vld [vmem:[#allocation5 + $0x7d8] sm:$0xff] }
 0x2d5   :  { %v4305_v40 = vadd.f32 %v8236_v44, %v14071_v24  ;;  %15753 = vst [vmem:[#allocation23_spill] sm:$0xff] %v14265_v56  ;;  %15754 = vst [vmem:[#allocation17_spill] sm:$0xff] %v14267_v28  ;;  %10303 = vmatpush3.bf16.msra.mxu1 %v15709_v32  ;;  %v15756_v53 = vand.u32 4294901760, %v14214_v58  ;;  %v273_v24 = vld [vmem:[#allocation5 + $0x748] sm:$0xff]  ;;  %v14280_v36 = vpack.c.bf16 %v6662_v6, %v6655_v51  ;;  %v6437_v44 = vand.u32 4294901760, %v272_v55 }
 0x2d6   :  { %15755 = vst [vmem:[#allocation20_spill] sm:$0xff] %v14269_v0  ;;  %10305 = vmatprep.subr.bf16.mxu1 %v15710_v22  ;;  %v14282_v1 = vpack.c.bf16 %v6488_v33, %v6485_v49  ;;  %v14284_v32 = vsub.f32 %v288_v45, %v6485_v49  ;;  %v14287_v61 = vsub.f32 %v289_v35, %v6488_v33  ;;  %v290_v22 = vld [vmem:[#allocation5 + $0x7d0] sm:$0xff]  ;;  %v6440_v51 = vand.u32 4294901760, %v273_v24 }
 0x2d7   :  { %v6675_v23 = vsub.f32 %v14214_v58, %v15756_v53  ;;  %10279 = vmatpush3.bf16.msra.mxu0 %v14151_v37  ;;  %v8269_v30 = vpop.f32.mrb[26].mxu1  ;;  %v6556_v8 = vsub.f32 %v14221_v54, %v15074_v50  ;;  %v6563_v37 = vsub.f32 %v14227_v42, %v15073_v27  ;;  %v6511_v49 = vsub.f32 %v14239_v4, %v15076_v19  ;;  %v15758_v50 = vld [vmem:[#allocation28_spill] sm:$0xff]  ;;  %v275_v54 = vld [vmem:[#allocation5 + $0x758] sm:$0xff] }
 0x2d8   :  { %15757 = vst [vmem:[#allocation13_spill] sm:$0xff] %v14282_v1  ;;  %10281 = vmatprep.subr.bf16.mxu0 %v14163_v7  ;;  %v8270_v45 = vpop.f32.mrb[27].mxu1  ;;  %v14301_v33 = vpack.c.bf16 %v6550_v5, %v6543_v15  ;;  %v6669_v53 = vand.u32 4294901760, %v6668_v11  ;;  %v6491_v9 = vand.u32 4294901760, %v290_v22  ;;  %v6494_v19 = vand.u32 4294901760, %v291_v3  ;;  %v274_v42 = vld [vmem:[#allocation5 + $0x750] sm:$0xff] }
 0x2d9   :  { %v8271_v6 = vadd.f32 %v8270_v45, %v8269_v30  ;;  %10307 = vmatpush3.bf16.msra.mxu1 %v13825_v59  ;;  %v6676_v27 = vand.u32 4294901760, %v6675_v23  ;;  %v15083_v4 = vand.u32 4294901760, %v14267_v28  ;;  %v6557_v59 = vand.u32 4294901760, %v6556_v8  ;;  %v15762_v7 = vld [vmem:[#allocation12_spill] sm:$0xff] }
 0x2da   :  { %10309 = vmatprep.subr.bf16.mxu1 %v15758_v50  ;;  %v6564_v15 = vand.u32 4294901760, %v6563_v37  ;;  %v6512_v5 = vand.u32 4294901760, %v6511_v49  ;;  %v14310_v11 = vpack.c.bf16 %v6440_v51, %v6437_v44  ;;  %v15760_v50 = vand.u32 4294901760, %v14245_v13 }
 0x2db   :  { %10283 = vmatpush3.bf16.msra.mxu0 %v14169_v25  ;;  %v14307_v35 = vadd.f32 %v8271_v6, %v4305_v40  ;;  %v14312_v25 = vsub.f32 %v272_v55, %v6437_v44  ;;  %v15761_v30 = vand.u32 4294901760, %v14259_v14  ;;  %v14322_v40 = vpack.c.bf16 %v6676_v27, %v6669_v53  ;;  %v14326_v55 = vld [vmem:[#allocation5 + $0x7e0] sm:$0xff] }
 0x2dc   :  { %10317 = vmatprep.subr.bf16.mxu0 %v14180_v48  ;;  %15759 = vst [vmem:[#allocation27_spill] sm:$0xff] %v14310_v11  ;;  %v6682_v23 = vsub.f32 %v14245_v13, %v15760_v50  ;;  %v14324_v8 = vsub.f32 %v273_v24, %v6440_v51  ;;  %v6443_v37 = vand.u32 4294901760, %v274_v42  ;;  %v6446_v49 = vand.u32 4294901760, %v275_v54  ;;  %v14338_v24 = vld [vmem:[#allocation5 + $0x7e8] sm:$0xff] }
 0x2dd   :  { %v6689_v45 = vsub.f32 %v14259_v14, %v15761_v30  ;;  %10311 = vmatpush3.bf16.msra.mxu1 %v13961_v57  ;;  %v14330_v44 = vsub.f32 %v290_v22, %v6491_v9  ;;  %v6570_v6 = vsub.f32 %v14267_v28, %v15083_v4  ;;  %v15764_v57 = vand.u32 4294901760, %v14269_v0 }
 0x2de   :  { %6303 = vmatmul.mubr.f32.vlgmr.msra.gmra.mrb[40].mxu0 %v15762_v7  ;;  %10313 = vmatprep.subr.bf16.mxu1 %v13984_v62  ;;  %v14341_v51 = vpack.c.bf16 %v6564_v15, %v6557_v59  ;;  %v14343_v53 = vpack.c.bf16 %v6494_v19, %v6491_v9  ;;  %v14345_v50 = vsub.f32 %v291_v3, %v6494_v19  ;;  %v14347_v62 = vld [vmem:[#allocation5 + $0x760] sm:$0xff]  ;;  %v6683_v22 = vand.u32 4294901760, %v6682_v23  ;;  %v14358_v3 = vld [vmem:[#allocation5 + $0x768] sm:$0xff]  ;;  %v14406_v19 = vld [vmem:[#allocation5 + $0x770] sm:$0xff] }
 0x2df   :  { %10319 = vmatpush3.bf16.msra.mxu0 %v14182_v46  ;;  %15763 = vst [vmem:[#allocation25_spill] sm:$0xff] %v14330_v44  ;;  %v6577_v27 = vsub.f32 %v14269_v0, %v15764_v57  ;;  %6513 = vmatprep.mubr.f32.mxu0 %v6512_v5  ;;  %v6690_v30 = vand.u32 4294901760, %v6689_v45  ;;  %v15088_v4 = vand.u32 4294901760, %v14326_v55  ;;  %v15089_v28 = vand.u32 4294901760, %v14284_v32  ;;  %v14368_v45 = vld [vmem:[#allocation5 + $0x7f0] sm:$0xff] }
 0x2e0   :  { %10321 = vmatprep.subr.bf16.mxu0 %v14192_v41  ;;  %15765 = vst [vmem:[#allocation18_spill] sm:$0xff] %v14343_v53  ;;  %15766 = vst [vmem:[#allocation26_spill] sm:$0xff] %v14345_v50  ;;  %v14352_v57 = vpack.c.bf16 %v6446_v49, %v6443_v37  ;;  %v14354_v0 = vsub.f32 %v274_v42, %v6443_v37  ;;  %v15090_v9 = vand.u32 4294901760, %v14338_v24  ;;  %v6571_v15 = vand.u32 4294901760, %v6570_v6  ;;  %v14370_v37 = vld [vmem:[#allocation5 + $0x7f8] sm:$0xff] }
 0x2e1   :  { %10315 = vmatpush3.bf16.msra.mxu1 %v14001_v20  ;;  %v14362_v59 = vsub.f32 %v275_v54, %v6446_v49  ;;  %v6578_v5 = vand.u32 4294901760, %v6577_v27  ;;  %v15091_v20 = vand.u32 4294901760, %v14347_v62  ;;  %v15094_v42 = vand.u32 4294901760, %v14312_v25 }
 0x2e2   :  { %10349 = vmatprep.subr.bf16.mxu1 %v14236_v29  ;;  %v15095_v23 = vand.u32 4294901760, %v14324_v8  ;;  %v10360_v54 = vpack.c.bf16 %v6690_v30, %v6683_v22  ;;  %v14378_v49 = vsub.f32 %v14326_v55, %v15088_v4  ;;  %v6696_v6 = vsub.f32 %v14284_v32, %v15089_v28 }
 0x2e3   :  { %10323 = vmatpush3.bf16.msra.mxu0 %v14194_v52  ;;  %15767 = vst [vmem:[#allocation22_spill] sm:$0xff] %v14362_v59  ;;  %v6452_v27 = vand.u32 4294901760, %v14358_v3  ;;  %v14388_v29 = vsub.f32 %v14338_v24, %v15090_v9  ;;  %v15770_v30 = vsub.s32 6, %v15745_v39  ;;  %v14402_v28 = vsub.f32 %v14347_v62, %v15091_v20  ;;  %v14408_v39 = vld [vmem:[#allocation5 + $0x778] sm:$0xff] }
 0x2e4   :  { %10325 = vmatprep.subr.bf16.mxu0 %v14208_v47  ;;  %6407 = vmatmul.mubr.f32.vlgmr.msra.gmra.mrb[40].mxu1 %v15762_v7  ;;  %v15769_v7 = vand.u32 4294901760, %v14287_v61 }
 0x2e5   :  { %10351 = vmatpush3.bf16.msra.mxu1 %v14241_v43  ;;  %15768 = vst [vmem:[#allocation19_spill] sm:$0xff] %v14388_v29  ;;  %v357_v4 = vrot.slane %v14187_v10, %v15770_v30  ;;  %6749 = vmatprep.mubr.f32.mxu1 %v14216_v38  ;;  %v10362_v43 = vpack.c.bf16 %v6578_v5, %v6571_v15  ;;  %v15771_v15 = vand.u32 4294901760, %v14330_v44  ;;  %v15772_v30 = vand.u32 4294901760, %v14345_v50 }
 0x2e6   :  { %v6703_v22 = vsub.f32 %v14287_v61, %v15769_v7  ;;  %10353 = vmatprep.subr.bf16.mxu1 %v14280_v36  ;;  %v6584_v10 = vsub.f32 %v14312_v25, %v15094_v42  ;;  %v6591_v36 = vsub.f32 %v14324_v8, %v15095_v23  ;;  %v6697_v7 = vand.u32 4294901760, %v6696_v6 }
 0x2e7   :  { %10327 = vmatpush3.bf16.msra.mxu0 %v14219_v18  ;;  %v6710_v5 = vsub.f32 %v14330_v44, %v15771_v15  ;;  %v6717_v20 = vsub.f32 %v14345_v50, %v15772_v30  ;;  %v14424_v9 = vsub.f32 %v14358_v3, %v6452_v27  ;;  %v14431_v18 = vand.u32 4294901760, %v357_v4 }
 0x2e8   :  { %10329 = vmatprep.subr.bf16.mxu0 %v14243_v17  ;;  %v6704_v3 = vand.u32 4294901760, %v6703_v22  ;;  %v15773_v6 = vand.u32 4294901760, %v14368_v45  ;;  %v6585_v15 = vand.u32 4294901760, %v6584_v10  ;;  %v6592_v42 = vand.u32 4294901760, %v6591_v36 }
 0x2e9   :  { %10355 = vmatpush3.bf16.msra.mxu1 %v14301_v33  ;;  %v15774_v33 = vand.u32 4294901760, %v14370_v37  ;;  %v6711_v38 = vand.u32 4294901760, %v6710_v5  ;;  %v15777_v17 = vand.u32 4294901760, %v14406_v19  ;;  %v14468_v5 = vsub.f32 %v357_v4, %v14431_v18 }
 0x2ea   :  { %10357 = vmatprep.subr.bf16.mxu1 %v14322_v40  ;;  %v14439_v30 = vsub.f32 %v14368_v45, %v15773_v6  ;;  %v15775_v40 = vand.u32 4294901760, %v14354_v0  ;;  %v15776_v6 = vand.u32 4294901760, %v14362_v59  ;;  %v15781_v4 = vand.u32 4294901760, %v14326_v55 }
 0x2eb   :  { %10331 = vmatpush3.bf16.msra.mxu0 %v14265_v56  ;;  %v14444_v23 = vsub.f32 %v14370_v37, %v15774_v33  ;;  %v6718_v56 = vand.u32 4294901760, %v6717_v20  ;;  %v14460_v10 = vsub.f32 %v14406_v19, %v15777_v17  ;;  %v15778_v20 = vand.u32 4294901760, %v14408_v39 }
 0x2ec   :  { %10333 = vmatprep.subr.bf16.mxu0 %v14282_v1  ;;  %v6598_v22 = vsub.f32 %v14354_v0, %v15775_v40  ;;  %v6605_v50 = vsub.f32 %v14362_v59, %v15776_v6  ;;  %v15779_v40 = vand.u32 4294901760, %v14378_v49  ;;  %v15780_v33 = vand.u32 4294901760, %v14388_v29 }
 0x2ed   :  { %10359 = vmatpush3.bf16.msra.mxu1 %v14341_v51  ;;  %v14465_v36 = vsub.f32 %v14408_v39, %v15778_v20  ;;  %v10364_v51 = vpack.c.bf16 %v6704_v3, %v6697_v7  ;;  %v15782_v1 = vand.u32 4294901760, %v14338_v24  ;;  %v10366_v7 = vpack.c.bf16 %v6592_v42, %v6585_v15 }
 0x2ee   :  { %v6724_v6 = vsub.f32 %v14378_v49, %v15779_v40  ;;  %10361 = vmatprep.subr.bf16.mxu1 %v10360_v54  ;;  %v6731_v17 = vsub.f32 %v14388_v29, %v15780_v33  ;;  %v15783_v40 = vand.u32 4294901760, %v14347_v62  ;;  %v10368_v3 = vpack.c.bf16 %v6718_v56, %v6711_v38 }
 0x2ef   :  { %10335 = vmatpush3.bf16.msra.mxu0 %v14310_v11  ;;  %v14484_v59 = vpack.c.bf16 %v15782_v1, %v15781_v4  ;;  %v6599_v33 = vand.u32 4294901760, %v6598_v22  ;;  %v6606_v29 = vand.u32 4294901760, %v6605_v50  ;;  %v15784_v44 = vand.u32 4294901760, %v14402_v28 }
 0x2f0   :  { %10337 = vmatprep.subr.bf16.mxu0 %v14343_v53  ;;  %v14488_v54 = vpack.c.bf16 %v6452_v27, %v15783_v40  ;;  %v15785_v53 = vand.u32 4294901760, %v14424_v9  ;;  %v6516_v1 = vand.u32 4294901760, %v14468_v5  ;;  %v6725_v62 = vand.u32 4294901760, %v6724_v6 }
 0x2f1   :  { %v8304_v11 = vpop.f32.mrb[28].mxu0  ;;  %v6612_v20 = vsub.f32 %v14402_v28, %v15784_v44  ;;  %10363 = vmatpush3.bf16.msra.mxu1 %v10362_v43  ;;  %v15117_v27 = vand.u32 4294901760, %v14460_v10  ;;  %v15116_v38 = vand.u32 4294901760, %v14465_v36  ;;  %v6732_v50 = vand.u32 4294901760, %v6731_v17 }
 0x2f2   :  { %v6619_v55 = vsub.f32 %v14424_v9, %v15785_v53  ;;  %v8305_v24 = vpop.f32.mrb[29].mxu0  ;;  %10365 = vmatprep.subr.bf16.mxu1 %v10364_v51  ;;  %v15786_v44 = vand.u32 4294901760, %v14439_v30  ;;  %v15787_v53 = vand.u32 4294901760, %v14444_v23  ;;  %v15788_v15 = vand.u32 4294901760, %v14368_v45 }
 0x2f3   :  { %v8306_v56 = vadd.f32 %v8305_v24, %v8304_v11  ;;  %10339 = vmatpush3.bf16.msra.mxu0 %v14352_v57  ;;  %v15789_v22 = vand.u32 4294901760, %v14370_v37  ;;  %v6613_v51 = vand.u32 4294901760, %v6612_v20  ;;  %v10370_v4 = vpack.c.bf16 %v6606_v29, %v6599_v33 }
 0x2f4   :  { %v6738_v42 = vsub.f32 %v14439_v30, %v15786_v44  ;;  %v6745_v43 = vsub.f32 %v14444_v23, %v15787_v53  ;;  %10341 = vmatprep.subr.bf16.mxu0 %v14484_v59  ;;  %v6620_v17 = vand.u32 4294901760, %v6619_v55  ;;  %v6517_v40 = vsub.f32 %v14468_v5, %v6516_v1 }
 0x2f5   :  { %v14511_v6 = vpack.c.bf16 %v15789_v22, %v15788_v15  ;;  %v4581_v11 = vadd.f32 %v8306_v56, %v14307_v35  ;;  %10367 = vmatpush3.bf16.msra.mxu1 %v10366_v7  ;;  %v6626_v24 = vsub.f32 %v14460_v10, %v15117_v27  ;;  %v6633_v45 = vsub.f32 %v14465_v36, %v15116_v38 }
 0x2f6   :  { %10369 = vmatprep.subr.bf16.mxu1 %v10368_v3  ;;  %v15790_v35 = vand.u32 4294901760, %v14406_v19  ;;  %v15791_v37 = vand.u32 4294901760, %v14408_v39  ;;  %v10372_v20 = vpack.c.bf16 %v6732_v50, %v6725_v62  ;;  %v6739_v7 = vand.u32 4294901760, %v6738_v42 }
 0x2f7   :  { %10343 = vmatpush3.bf16.msra.mxu0 %v14488_v54  ;;  %v6746_v33 = vand.u32 4294901760, %v6745_v43  ;;  %v8339_v55 = vpop.f32.mrb[28].mxu1  ;;  %v10380_v56 = vpack.c.bf16 %v14096_v12, %v14088_v31  ;;  %v10374_v53 = vpack.c.bf16 %v6620_v17, %v6613_v51  ;;  %v6518_v3 = vand.u32 4294901760, %v6517_v40  ;;  %v15794_v40 = vld [vmem:[#allocation16_spill] sm:$0xff] }
 0x2f8   :  { %v14528_v29 = vpack.c.bf16 %v15791_v37, %v15790_v35  ;;  %10345 = vmatprep.subr.bf16.mxu0 %v14511_v6  ;;  %v8340_v44 = vpop.f32.mrb[29].mxu1  ;;  %v6627_v22 = vand.u32 4294901760, %v6626_v24  ;;  %v6634_v19 = vand.u32 4294901760, %v6633_v45  ;;  %v10382_v39 = vpack.c.bf16 %v14106_v16, %v14103_v63  ;;  %v15796_v37 = vld [vmem:[#allocation17_spill] sm:$0xff] }
 0x2f9   :  { %v8341_v15 = vadd.f32 %v8340_v44, %v8339_v55  ;;  %10371 = vmatpush3.bf16.msra.mxu1 %v10370_v4  ;;  %v10376_v62 = vpack.c.bf16 %v6746_v33, %v6739_v7  ;;  %v10384_v42 = vpack.c.bf16 %v14175_v26, %v14171_v60  ;;  %v10386_v51 = vpack.c.bf16 %v14205_v34, %v14203_v21  ;;  %v15792_v4 = vld [vmem:[#allocation21_spill] sm:$0xff]  ;;  %v15799_v44 = vld [vmem:[#allocation26_spill] sm:$0xff] }
 0x2fa   :  { %10373 = vmatprep.subr.bf16.mxu1 %v10372_v20  ;;  %v10378_v43 = vpack.c.bf16 %v6634_v19, %v6627_v22  ;;  %v10388_v17 = vpack.c.bf16 %v14214_v58, %v14212_v2  ;;  %v10392_v45 = vpack.c.bf16 %v14259_v14, %v14245_v13  ;;  %v15795_v35 = vand.u32 4294901760, %v15792_v4  ;;  %v15797_v20 = vld [vmem:[#allocation20_spill] sm:$0xff]  ;;  %v15802_v22 = vld [vmem:[#allocation22_spill] sm:$0xff] }
 0x2fb   :  { %10347 = vmatpush3.bf16.msra.mxu0 %v14528_v29  ;;  %v4685_v50 = vadd.f32 %v8341_v15, %v4581_v11  ;;  %v15793_v11 = vld [vmem:[#allocation15_spill] sm:$0xff]  ;;  %v10394_v7 = vpack.c.bf16 %v15797_v20, %v15796_v37  ;;  %v10396_v33 = vpack.c.bf16 %v14287_v61, %v14284_v32  ;;  %v10398_v55 = vpack.c.bf16 %v14324_v8, %v14312_v25  ;;  %v15800_v15 = vld [vmem:[#allocation29_spill] sm:$0xff] }
 0x2fc   :  { %10381 = vmatprep.subr.bf16.mxu0 %v10380_v56  ;;  %v10390_v24 = vpack.c.bf16 %v15794_v40, %v15793_v11  ;;  %v15798_v56 = vld [vmem:[#allocation25_spill] sm:$0xff]  ;;  %v10402_v19 = vpack.c.bf16 %v15802_v22, %v14354_v0 }
 0x2fd   :  { %10375 = vmatpush3.bf16.msra.mxu1 %v10374_v53  ;;  %v10400_v53 = vpack.c.bf16 %v15799_v44, %v15798_v56 }
 0x2fe   :  { %6519 = vmatmul.mubr.f32.vlgmr.msra.gmra.mrb[42].mxu0 %v6518_v3  ;;  %10377 = vmatprep.subr.bf16.mxu1 %v10376_v62  ;;  %v15801_v3 = vld [vmem:[#allocation14_spill] sm:$0xff] }
 0x2ff   :  { %10383 = vmatpush3.bf16.msra.mxu0 %v10382_v39  ;;  %6886 = vmatprep.mubr.f32.mxu0 %v15792_v4  ;;  %v15803_v39 = vld [vmem:[#allocation19_spill] sm:$0xff]  ;;  %v15805_v4 = vld [vmem:[#allocation13_spill] sm:$0xff] }
 0x300   :  { %10385 = vmatprep.subr.bf16.mxu0 %v10384_v42  ;;  %v10404_v62 = vpack.c.bf16 %v15803_v39, %v14378_v49 }
 0x301   :  { %10379 = vmatpush3.bf16.msra.mxu1 %v10378_v43 }
 0x302   :  { %10413 = vmatprep.subr.bf16.mxu1 %v14180_v48 }
 0x303   :  { %10387 = vmatpush3.bf16.msra.mxu0 %v10386_v51  ;;  %v15804_v51 = vld [vmem:[#allocation23_spill] sm:$0xff] }
 0x304   :  { %10389 = vmatprep.subr.bf16.mxu0 %v10388_v17  ;;  %6751 = vmatmul.mubr.f32.vlgmr.msra.gmra.mrb[42].mxu1 %v14431_v18 }
 0x305   :  { %10415 = vmatpush3.bf16.msra.mxu1 %v14182_v46  ;;  %6993 = vmatprep.mubr.f32.mxu1 %v15795_v35 }
 0x306   :  { %10417 = vmatprep.subr.bf16.mxu1 %v14192_v41 }
 0x307   :  { %10391 = vmatpush3.bf16.msra.mxu0 %v10390_v24  ;;  %v10406_v24 = vpack.c.bf16 %v14424_v9, %v14402_v28 }
 0x308   :  { %10393 = vmatprep.subr.bf16.mxu0 %v10392_v45  ;;  %v10408_v45 = vpack.c.bf16 %v14444_v23, %v14439_v30 }
 0x309   :  { %10419 = vmatpush3.bf16.msra.mxu1 %v14194_v52 }
 0x30a   :  { %10421 = vmatprep.subr.bf16.mxu1 %v14208_v47 }
 0x30b   :  { %10395 = vmatpush3.bf16.msra.mxu0 %v10394_v7  ;;  %v15806_v7 = vld [vmem:[#allocation27_spill] sm:$0xff] }
 0x30c   :  { %10397 = vmatprep.subr.bf16.mxu0 %v10396_v33  ;;  %v15807_v33 = vld [vmem:[#allocation18_spill] sm:$0xff] }
 0x30d   :  { %10423 = vmatpush3.bf16.msra.mxu1 %v15800_v15 }
 0x30e   :  { %10425 = vmatprep.subr.bf16.mxu1 %v15801_v3 }
 0x30f   :  { %10399 = vmatpush3.bf16.msra.mxu0 %v10398_v55  ;;  %v10410_v55 = vpack.c.bf16 %v14465_v36, %v14460_v10 }
 0x310   :  { %10401 = vmatprep.subr.bf16.mxu0 %v10400_v53 }
 0x311   :  { %v8374_v42 = vpop.f32.mrb[30].mxu0  ;;  %10427 = vmatpush3.bf16.msra.mxu1 %v15804_v51 }
 0x312   :  { %v8375_v43 = vpop.f32.mrb[31].mxu0  ;;  %10429 = vmatprep.subr.bf16.mxu1 %v15805_v4 }
 0x313   :  { %v8376_v17 = vadd.f32 %v8375_v43, %v8374_v42  ;;  %10403 = vmatpush3.bf16.msra.mxu0 %v10402_v19  ;;  %v15808_v19 = vand.u32 4294901760, %v14088_v31  ;;  %v15809_v42 = vand.u32 4294901760, %v14096_v12  ;;  %v15813_v31 = vand.u32 4294901760, %v14175_v26  ;;  %v15818_v26 = vld [vmem:[#allocation30_spill] sm:$0xff] }
 0x314   :  { %10405 = vmatprep.subr.bf16.mxu0 %v10404_v62 }
 0x315   :  { %v4797_v35 = vadd.f32 %v8376_v17, %v4685_v50  ;;  %10431 = vmatpush3.bf16.msra.mxu1 %v15806_v7  ;;  %v10444_v43 = vpack.c.bf16 %v15809_v42, %v15808_v19  ;;  %v15810_v50 = vand.u32 4294901760, %v14103_v63  ;;  %v15811_v17 = vand.u32 4294901760, %v14106_v16 }
 0x316   :  { %10433 = vmatprep.subr.bf16.mxu1 %v15807_v33  ;;  %v15815_v63 = vand.u32 4294901760, %v14205_v34  ;;  %v15821_v34 = vand.u32 4294901760, %v14245_v13  ;;  %v15825_v13 = vand.u32 4294901760, %v14284_v32 }
 0x317   :  { %10407 = vmatpush3.bf16.msra.mxu0 %v10406_v24  ;;  %v8409_v53 = vpop.f32.mrb[30].mxu1  ;;  %v10446_v24 = vpack.c.bf16 %v15811_v17, %v15810_v50 }
 0x318   :  { %10409 = vmatprep.subr.bf16.mxu0 %v10408_v45  ;;  %v8410_v62 = vpop.f32.mrb[31].mxu1  ;;  %v15812_v45 = vand.u32 4294901760, %v14171_v60  ;;  %v15817_v60 = vand.u32 4294901760, %v14214_v58  ;;  %v15824_v58 = vand.u32 4294901760, %v15797_v20 }
 0x319   :  { %v8411_v38 = vadd.f32 %v8410_v62, %v8409_v53  ;;  %10435 = vmatpush3.bf16.msra.mxu1 %v14352_v57  ;;  %v15819_v53 = vand.u32 4294901760, %v15793_v11 }
 0x31a   :  { %10437 = vmatprep.subr.bf16.mxu1 %v14484_v59  ;;  %v10448_v12 = vpack.c.bf16 %v15813_v31, %v15812_v45 }
 0x31b   :  { %10411 = vmatpush3.bf16.msra.mxu0 %v10410_v55  ;;  %v5029_v27 = vadd.f32 %v8411_v38, %v4797_v35  ;;  %v15814_v55 = vand.u32 4294901760, %v14203_v21  ;;  %v15816_v38 = vand.u32 4294901760, %v14212_v2  ;;  %v15820_v21 = vand.u32 4294901760, %v15794_v40 }
 0x31c   :  { %10445 = vmatprep.subr.bf16.mxu0 %v10444_v43  ;;  %v15822_v2 = vand.u32 4294901760, %v14259_v14  ;;  %v15826_v14 = vand.u32 4294901760, %v14287_v61  ;;  %v15833_v61 = vand.u32 4294901760, %v14378_v49  ;;  %v15838_v49 = vand.u32 4294901760, %v14444_v23 }
 0x31d   :  { %10439 = vmatpush3.bf16.msra.mxu1 %v14488_v54  ;;  %v10450_v16 = vpack.c.bf16 %v15815_v63, %v15814_v55  ;;  %v10452_v35 = vpack.c.bf16 %v15817_v60, %v15816_v38  ;;  %v10454_v19 = vpack.c.bf16 %v15820_v21, %v15819_v53 }
 0x31e   :  { %6889 = vmatmul.mubr.f32.vlgmr.msra.gmra.mrb[44].mxu0 %v14468_v5  ;;  %10441 = vmatprep.subr.bf16.mxu1 %v14511_v6  ;;  %v10456_v42 = vpack.c.bf16 %v15822_v2, %v15821_v34  ;;  %v10460_v40 = vpack.c.bf16 %v15826_v14, %v15825_v13 }
 0x31f   :  { %10447 = vmatpush3.bf16.msra.mxu0 %v10446_v24  ;;  %7163 = vmatprep.mubr.f32.mxu0 %v15818_v26 }
 0x320   :  { %10449 = vmatprep.subr.bf16.mxu0 %v10448_v12 }
 0x321   :  { %10443 = vmatpush3.bf16.msra.mxu1 %v14528_v29 }
 0x322   :  { %10477 = vmatprep.subr.bf16.mxu1 %v14180_v48  ;;  %v15823_v48 = vand.u32 4294901760, %v15796_v37  ;;  %v15830_v37 = vand.u32 4294901760, %v15799_v44 }
 0x323   :  { %10451 = vmatpush3.bf16.msra.mxu0 %v10450_v16 }
 0x324   :  { %10453 = vmatprep.subr.bf16.mxu0 %v10452_v35  ;;  %6997 = vmatmul.mubr.f32.vlgmr.msra.gmra.mrb[44].mxu1 %v6516_v1  ;;  %v10458_v11 = vpack.c.bf16 %v15824_v58, %v15823_v48  ;;  %v15829_v1 = vand.u32 4294901760, %v15798_v56 }
 0x325   :  { %10479 = vmatpush3.bf16.msra.mxu1 %v14182_v46  ;;  %7267 = vmatprep.mubr.f32.mxu1 %v15818_v26  ;;  %v15827_v46 = vand.u32 4294901760, %v14312_v25  ;;  %v15834_v25 = vand.u32 4294901760, %v15803_v39 }
 0x326   :  { %10481 = vmatprep.subr.bf16.mxu1 %v14192_v41  ;;  %v15828_v41 = vand.u32 4294901760, %v14324_v8  ;;  %v10464_v20 = vpack.c.bf16 %v15830_v37, %v15829_v1 }
 0x327   :  { %10455 = vmatpush3.bf16.msra.mxu0 %v10454_v19  ;;  %v10468_v8 = vpack.c.bf16 %v15834_v25, %v15833_v61 }
 0x328   :  { %10457 = vmatprep.subr.bf16.mxu0 %v10456_v42  ;;  %v10462_v5 = vpack.c.bf16 %v15828_v41, %v15827_v46 }
 0x329   :  { %10483 = vmatpush3.bf16.msra.mxu1 %v14194_v52  ;;  %v15831_v52 = vand.u32 4294901760, %v14354_v0  ;;  %v15836_v0 = vand.u32 4294901760, %v14424_v9 }
 0x32a   :  { %10485 = vmatprep.subr.bf16.mxu1 %v14208_v47  ;;  %v15832_v47 = vand.u32 4294901760, %v15802_v22  ;;  %v15837_v22 = vand.u32 4294901760, %v14439_v30 }
 0x32b   :  { %10459 = vmatpush3.bf16.msra.mxu0 %v10458_v11 }
 0x32c   :  { %10461 = vmatprep.subr.bf16.mxu0 %v10460_v40  ;;  %v10466_v32 = vpack.c.bf16 %v15832_v47, %v15831_v52  ;;  %v10472_v39 = vpack.c.bf16 %v15838_v49, %v15837_v22 }
 0x32d   :  { %10487 = vmatpush3.bf16.msra.mxu1 %v15800_v15  ;;  %v15835_v15 = vand.u32 4294901760, %v14402_v28 }
 0x32e   :  { %10489 = vmatprep.subr.bf16.mxu1 %v15801_v3 }
 0x32f   :  { %10463 = vmatpush3.bf16.msra.mxu0 %v10462_v5  ;;  %v10470_v3 = vpack.c.bf16 %v15836_v0, %v15835_v15 }
 0x330   :  { %10465 = vmatprep.subr.bf16.mxu0 %v10464_v20 }
 0x331   :  { %v8444_v56 = vpop.f32.mrb[32].mxu0  ;;  %10491 = vmatpush3.bf16.msra.mxu1 %v15804_v51  ;;  %v15839_v51 = vand.u32 4294901760, %v14460_v10 }
 0x332   :  { %v8445_v43 = vpop.f32.mrb[33].mxu0  ;;  %10493 = vmatprep.subr.bf16.mxu1 %v15805_v4  ;;  %v15840_v4 = vand.u32 4294901760, %v14465_v36 }
 0x333   :  { %v8446_v44 = vadd.f32 %v8445_v43, %v8444_v56  ;;  %10467 = vmatpush3.bf16.msra.mxu0 %v10466_v32 }
 0x334   :  { %10469 = vmatprep.subr.bf16.mxu0 %v10468_v8  ;;  %v10474_v28 = vpack.c.bf16 %v15840_v4, %v15839_v51 }
 0x335   :  { %v5167_v62 = vadd.f32 %v8446_v44, %v5029_v27  ;;  %10495 = vmatpush3.bf16.msra.mxu1 %v15806_v7 }
 0x336   :  { %10497 = vmatprep.subr.bf16.mxu1 %v15807_v33 }
 0x337   :  { %10471 = vmatpush3.bf16.msra.mxu0 %v10470_v3  ;;  %v8479_v50 = vpop.f32.mrb[32].mxu1 }
 0x338   :  { %10473 = vmatprep.subr.bf16.mxu0 %v10472_v39  ;;  %v8480_v9 = vpop.f32.mrb[33].mxu1 }
 0x339   :  { %v8481_v17 = vadd.f32 %v8480_v9, %v8479_v50  ;;  %10499 = vmatpush3.bf16.msra.mxu1 %v14352_v57 }
 0x33a   :  { %10501 = vmatprep.subr.bf16.mxu1 %v14484_v59 }
 0x33b   :  { %10475 = vmatpush3.bf16.msra.mxu0 %v10474_v28  ;;  %v5275_v23 = vadd.f32 %v8481_v17, %v5167_v62 }
 0x33d   :  { %10503 = vmatpush3.bf16.msra.mxu1 %v14488_v54 }
 0x33e   :  { %7165 = vmatmul.mubr.f32.vlgmr.msra.gmra.mrb[46].mxu0 %v14431_v18  ;;  %10505 = vmatprep.subr.bf16.mxu1 %v14511_v6 }
 0x341   :  { %10507 = vmatpush3.bf16.msra.mxu1 %v14528_v29 }
 0x344   :  { %7269 = vmatmul.mubr.f32.vlgmr.msra.gmra.mrb[46].mxu1 %v14431_v18 }
 0x351   :  { %v8514_v30 = vpop.f32.mrb[34].mxu0 }
 0x352   :  { %v8515_v10 = vpop.f32.mrb[35].mxu0 }
 0x353   :  { %v8516_v36 = vadd.f32 %v8515_v10, %v8514_v30 }
 0x355   :  { %v5443_v27 = vadd.f32 %v8516_v36, %v5275_v23 }
 0x357   :  { %v8549_v7 = vpop.f32.mrb[34].mxu1 }
 0x358   :  { %v8550_v57 = vpop.f32.mrb[35].mxu1 }
 0x359   :  { %v8551_v33 = vadd.f32 %v8550_v57, %v8549_v7 }
 0x35b   :  { %v5547_v24 = vadd.f32 %v8551_v33, %v5443_v27 }
 0x371   :  { %v8584_v59 = vpop.f32.mrb[36].mxu0 }
 0x372   :  { %v8585_v45 = vpop.f32.mrb[37].mxu0 }
 0x373   :  { %v8586_v31 = vadd.f32 %v8585_v45, %v8584_v59 }
 0x375   :  { %v5659_v12 = vadd.f32 %v8586_v31, %v5547_v24 }
 0x377   :  { %v8619_v55 = vpop.f32.mrb[36].mxu1 }
 0x378   :  { %v8620_v54 = vpop.f32.mrb[37].mxu1 }
 0x379   :  { %v8621_v63 = vadd.f32 %v8620_v54, %v8619_v55 }
 0x37b   :  { %v5891_v6 = vadd.f32 %v8621_v63, %v5659_v12 }
 0x391   :  { %v8654_v16 = vpop.f32.mrb[38].mxu0 }
 0x392   :  { %v8655_v29 = vpop.f32.mrb[39].mxu0 }
 0x393   :  { %v8656_v38 = vadd.f32 %v8655_v29, %v8654_v16 }
 0x395   :  { %v6029_v18 = vadd.f32 %v8656_v38, %v5891_v6 }
 0x397   :  { %v8689_v60 = vpop.f32.mrb[38].mxu1 }
 0x398   :  { %v8690_v35 = vpop.f32.mrb[39].mxu1 }
 0x399   :  { %v8691_v26 = vadd.f32 %v8690_v35, %v8689_v60 }
 0x39b   :  { %v6137_v53 = vadd.f32 %v8691_v26, %v6029_v18 }
 0x3b1   :  { %v8724_v21 = vpop.f32.mrb[40].mxu0 }
 0x3b2   :  { %v8725_v19 = vpop.f32.mrb[41].mxu0 }
 0x3b3   :  { %v8726_v34 = vadd.f32 %v8725_v19, %v8724_v21 }
 0x3b5   :  { %v6305_v2 = vadd.f32 %v8726_v34, %v6137_v53 }
 0x3b7   :  { %v8759_v42 = vpop.f32.mrb[40].mxu1 }
 0x3b8   :  { %v8760_v48 = vpop.f32.mrb[41].mxu1 }
 0x3b9   :  { %v8761_v58 = vadd.f32 %v8760_v48, %v8759_v42 }
 0x3bb   :  { %v6409_v11 = vadd.f32 %v8761_v58, %v6305_v2 }
 0x3d1   :  { %v8794_v13 = vpop.f32.mrb[42].mxu0 }
 0x3d2   :  { %v8795_v14 = vpop.f32.mrb[43].mxu0 }
 0x3d3   :  { %v8796_v40 = vadd.f32 %v8795_v14, %v8794_v13 }
 0x3d5   :  { %v6521_v46 = vadd.f32 %v8796_v40, %v6409_v11 }
 0x3d7   :  { %v8829_v41 = vpop.f32.mrb[42].mxu1 }
 0x3d8   :  { %v8830_v5 = vpop.f32.mrb[43].mxu1 }
 0x3d9   :  { %v8831_v1 = vadd.f32 %v8830_v5, %v8829_v41 }
 0x3db   :  { %v6753_v37 = vadd.f32 %v8831_v1, %v6521_v46 }
 0x3f1   :  { %v8864_v20 = vpop.f32.mrb[44].mxu0 }
 0x3f2   :  { %v8865_v52 = vpop.f32.mrb[45].mxu0 }
 0x3f3   :  { %v8866_v47 = vadd.f32 %v8865_v52, %v8864_v20 }
 0x3f5   :  { %v6891_v32 = vadd.f32 %v8866_v47, %v6753_v37 }
 0x3f7   :  { %v8899_v61 = vpop.f32.mrb[44].mxu1 }
 0x3f8   :  { %v8900_v25 = vpop.f32.mrb[45].mxu1 }
 0x3f9   :  { %v8901_v8 = vadd.f32 %v8900_v25, %v8899_v61 }
 0x3fb   :  { %v6999_v56 = vadd.f32 %v8901_v8, %v6891_v32 }
 0x411   :  { %v8934_v43 = vpop.f32.mrb[46].mxu0 }
 0x412   :  { %v8935_v44 = vpop.f32.mrb[47].mxu0 }
 0x413   :  { %v8936_v15 = vadd.f32 %v8935_v44, %v8934_v43 }
 0x415   :  { %v7167_v0 = vadd.f32 %v8936_v15, %v6999_v56 }
 0x417   :  { %v8969_v3 = vpop.f32.mrb[46].mxu1 }
 0x418   :  { %v8970_v22 = vpop.f32.mrb[47].mxu1 }
 0x419   :  { %v8971_v49 = vadd.f32 %v8970_v22, %v8969_v3 }
 0x41b   :  { %v7271_v39 = vadd.f32 %v8971_v49, %v7167_v0 }
 0x41d   :  { %10513 = vtanh.f32 %v7271_v39 }
 0x427   :  { %v10514_v62 = vpop.eup %10513 }
 0x428   :  { %7275 = vst [vmem:[#allocation7] sm:$0x1] %v10514_v62 }
 0x429   :  { %10574 = shalt.err (!%p10571_p6)
}
 0x42a   :  { %s10575_s11 = scalar_lea.hbm %s14685_s2, 16 }
 0x42b   :  { %p10576_p7 = scmp.ne.s32.totalorder %s14685_s2, %s10575_s11  ;;  %p10579_p8 = scmp.lt.u32.totalorder %s10575_s11, %s14685_s2 }
 0x42d   :  { %p10581_p9 = pnand %p10579_p8, %p10576_p7 }
 0x42f   :  { %10584 = shalt.err (!%p10581_p9)
}
 0x430   :  { %7285 = dma.vmem_to_hbm [thread:$0]  %s7283_s6, 16, %s14685_s2, [#allocation4]  }
 0x431   :  { %10589 = dma.done.wait [#allocation4], 16  }
 0x432   :  { %10590 = vsyncadd [#allocation4], 4294967280 }
 0x433   :  { %7289 = vsyncpa [#allocation3], 1 }
 0x434   :  { %7290 = vsyncpa [#allocation6], 1 }
 0x435   :  { %7291 = vsyncpa [#allocation4], 1 }

</bundles_post_ra>
